<compile_context>
chip_gen: v5e
topology: v5e:2x2
jax: 0.10.0
libtpu: 0.0.40
codegen_flags: <defaults>
</compile_context>

<pallas_src>
import jax
import jax.numpy as jnp
import numpy as np
from jax.experimental import pallas as pl
from jax.experimental.pallas import tpu as pltpu


# ------------------------- fused bidirectional GRU -------------------------- #
def make_bigru_kernel(S: int, Bc: int, Hp: int):
    """S timesteps, combined batch Bc rows, gate width padded to Hp lanes."""

    def step(h, gi, gh, b_hn, m):
        # gate order (r, z, n); each gate is a lane-aligned Hp-wide slice.
        r = jax.nn.sigmoid(gi[:, 0:Hp] + gh[:, 0:Hp])
        z = jax.nn.sigmoid(gi[:, Hp:2 * Hp] + gh[:, Hp:2 * Hp])
        n = jnp.tanh(gi[:, 2 * Hp:3 * Hp] + r * (gh[:, 2 * Hp:3 * Hp] + b_hn))
        h_new = (1.0 - z) * n + z * h
        # length masking (m is exactly 0.0 or 1.0): h <- m*h_new + (1-m)*h
        return h + m * (h_new - h)

    def kernel(x_ref, mask_ref, h0f_ref, h0b_ref,
               wihf_ref, whhf_ref, bgif_ref, bhnf_ref,
               wihb_ref, whhb_ref, bgib_ref, bhnb_ref,
               out_ref, gif_scr, gib_scr):
        # Hoisted input projection: one matmul per direction covering every
        # timestep; fused b_ih (+ b_hh for r,z) already folded into bgi*.
        x = x_ref[...]                                            # (S*Bc, E)
        gif_scr[...] = (jnp.dot(x, wihf_ref[...],
                                preferred_element_type=jnp.float32)
                        + bgif_ref[...])                          # (S*Bc, 3Hp)
        gib_scr[...] = (jnp.dot(x, wihb_ref[...],
                                preferred_element_type=jnp.float32)
                        + bgib_ref[...])

        b_hn_f = bhnf_ref[...]                                    # (1, Hp)
        b_hn_b = bhnb_ref[...]
        h_f = h0f_ref[...]                                        # (Bc, Hp)
        h_b = h0b_ref[...]

        # Fully unrolled recurrence; forward and backward are independent so
        # their serial h @ W_hh chains interleave on the MXU.
        for s in range(S):
            tf = s              # forward: actual time == step
            tb = S - 1 - s      # backward: scan from the end
            gh_f = jnp.dot(h_f, whhf_ref[...],
                           preferred_element_type=jnp.float32)
            h_f = step(h_f,
                       gif_scr[tf * Bc:(tf + 1) * Bc, :],
                       gh_f, b_hn_f,
                       mask_ref[tf * Bc:(tf + 1) * Bc, :])
            gh_b = jnp.dot(h_b, whhb_ref[...],
                           preferred_element_type=jnp.float32)
            h_b = step(h_b,
                       gib_scr[tb * Bc:(tb + 1) * Bc, :],
                       gh_b, b_hn_b,
                       mask_ref[tb * Bc:(tb + 1) * Bc, :])

        out_ref[0] = h_f
        out_ref[1] = h_b

    return kernel


def bigru_final_hidden(x_flat, mask, h0_f, h0_b, params_f, params_b):
    """x_flat: (S*Bc, E) time-major; mask: (S*Bc, Hp) {0,1}; returns (2, Bc, Hp)."""
    S_Bc = x_flat.shape[0]
    Bc, Hp = h0_f.shape
    S = S_Bc // Bc
    return pl.pallas_call(
        make_bigru_kernel(S, Bc, Hp),
        out_shape=jax.ShapeDtypeStruct((2, Bc, Hp), jnp.float32),
        scratch_shapes=[pltpu.VMEM((S * Bc, 3 * Hp), jnp.float32),
                        pltpu.VMEM((S * Bc, 3 * Hp), jnp.float32)],
    )(x_flat, mask, h0_f, h0_b, *params_f, *params_b)


# ------------------------------ decoder kernel ------------------------------ #
def decoder_kernel(x_ref, w1_ref, b1_ref, w2_ref, b2_ref, out_ref):
    h = jnp.dot(x_ref[...], w1_ref[...],
                preferred_element_type=jnp.float32) + b1_ref[...]
    h = jnp.maximum(h, 0.0)  # ReLU; Dropout(p=dw) is identity in eval mode
    out_ref[...] = jnp.dot(h, w2_ref[...],
                           preferred_element_type=jnp.float32) + b2_ref[...]


def decoder(x, w1, b1, w2, b2):
    B = x.shape[0]
    C = w2.shape[1]
    return pl.pallas_call(
        decoder_kernel,
        out_shape=jax.ShapeDtypeStruct((B, C), jnp.float32),
    )(x, w1, b1, w2, b2)


# ------------------------------ module glue --------------------------------- #
class RNNWithDropoutPallas:
    def __init__(self, emb_size, hidden_size, num_layers, num_classes,
                 weight, dw, key):
        # init_hidden() in the reference returns (2, B, H) => num_layers must be 1
        assert num_layers == 1
        self.emb_size = emb_size
        self.hidden_size = hidden_size
        self.Hp = max(128, -(-hidden_size // 128) * 128)   # lane-aligned gate width
        self.embedding = weight  # (vocab, emb), "pretrained"
        keys = iter(jax.random.split(key, 16))
        scale = 0.1
        H, E = hidden_size, emb_size

        def mk(shape):
            return jax.random.normal(next(keys), shape, jnp.float32) * scale

        # GRU weights; PyTorch stores (3H, E)/(3H, H) with gate order (r, z, n).
        # Kept pre-transposed for x @ W.  (Unpadded copies used by the reference.)
        self.w_ih_f = mk((E, 3 * H)); self.w_hh_f = mk((H, 3 * H))
        self.b_ih_f = mk((1, 3 * H)); self.b_hh_f = mk((1, 3 * H))
        self.w_ih_b = mk((E, 3 * H)); self.w_hh_b = mk((H, 3 * H))
        self.b_ih_b = mk((1, 3 * H)); self.b_hh_b = mk((1, 3 * H))
        # decoder: Linear(4H, 512) -> Dropout -> ReLU -> Linear(512, num_classes)
        self.w1 = mk((4 * H, 512)); self.b1 = mk((1, 512))
        self.w2 = mk((512, num_classes)); self.b2 = mk((1, num_classes))
        self.hidden_key = next(keys)

        # Lane-padded (Hp per gate) + bias-fused parameter sets for the kernel.
        self._pf = self._pad_gru(self.w_ih_f, self.w_hh_f,
                                 self.b_ih_f, self.b_hh_f)
        self._pb = self._pad_gru(self.w_ih_b, self.w_hh_b,
                                 self.b_ih_b, self.b_hh_b)

    def _pad_gru(self, w_ih, w_hh, b_ih, b_hh):
        H, Hp, E = self.hidden_size, self.Hp, self.emb_size
        w_ih_p = jnp.zeros((E, 3 * Hp), jnp.float32)
        w_hh_p = jnp.zeros((Hp, 3 * Hp), jnp.float32)
        b_ih_p = jnp.zeros((1, 3 * Hp), jnp.float32)
        b_hh_p = jnp.zeros((1, 3 * Hp), jnp.float32)
        for g in range(3):
            w_ih_p = w_ih_p.at[:, g * Hp:g * Hp + H].set(w_ih[:, g * H:(g + 1) * H])
            w_hh_p = w_hh_p.at[:H, g * Hp:g * Hp + H].set(w_hh[:, g * H:(g + 1) * H])
            b_ih_p = b_ih_p.at[:, g * Hp:g * Hp + H].set(b_ih[:, g * H:(g + 1) * H])
            b_hh_p = b_hh_p.at[:, g * Hp:g * Hp + H].set(b_hh[:, g * H:(g + 1) * H])
        # Fuse b_hh into b_ih for the r,z gates; keep b_hh_n separate (needed
        # inside r * (gh_n + b_hh_n)).
        b_gi = b_ih_p.at[:, :2 * Hp].add(b_hh_p[:, :2 * Hp])   # (1, 3Hp)
        b_hn = b_hh_p[:, 2 * Hp:3 * Hp]                        # (1, Hp)
        return (w_ih_p, w_hh_p, b_gi, b_hn)

    def init_hidden(self, batch_size):
        # torch.randn(2, B, H), made deterministic
        return jax.random.normal(self.hidden_key,
                                 (2, batch_size, self.hidden_size), jnp.float32)

    def forward(self, first, second, length1, length2, order_1, order_2):
        B, S = first.shape
        H, Hp = self.hidden_size, self.Hp
        Bc = 2 * B
        hidden = self.init_hidden(B)                            # (2, B, H)

        # Combined batch (first ++ second): one GRU kernel covers both encodes.
        tokens = jnp.concatenate([first, second], axis=0)       # (2B, S)
        lengths = jnp.concatenate([length1, length2], axis=0)   # (2B,)
        embed = self.embedding[tokens]                          # (2B,S,E) gather (glue)
        x_flat = jnp.transpose(embed, (1, 0, 2)).reshape(S * Bc, self.emb_size)

        # Precomputed pack_padded mask, lane-broadcast: mask[t, b] = t < len[b].
        t_idx = jnp.arange(S, dtype=jnp.int32)[:, None]
        mask = (t_idx < lengths[None, :]).astype(jnp.float32)   # (S, 2B)
        mask = jnp.broadcast_to(mask[:, :, None], (S, Bc, Hp)).reshape(S * Bc, Hp)

        # Initial hiddens, replicated for the two sentence batches, lane-padded.
        h0_f = jnp.zeros((Bc, Hp), jnp.float32).at[:, :H].set(
            jnp.concatenate([hidden[0], hidden[0]], axis=0))
        h0_b = jnp.zeros((Bc, Hp), jnp.float32).at[:, :H].set(
            jnp.concatenate([hidden[1], hidden[1]], axis=0))

        hout = bigru_final_hidden(x_flat, mask, h0_f, h0_b, self._pf, self._pb)
        h_f = hout[0, :, :H]                                    # (2B, H)
        h_b = hout[1, :, :H]
        hc = jnp.concatenate([h_f, h_b], axis=1)                # (2B, 2H)

        hc1 = hc[:B][order_1]                                   # torch.index_select
        hc2 = hc[B:][order_2]
        final_hidden = jnp.concatenate([hc1, hc2], axis=1)      # (B, 4H) lane-dense
        return decoder(final_hidden, self.w1, self.b1, self.w2, self.b2)


# --------------------------- pure-JAX reference ------------------------------ #
def _gru_dir_ref(x_tm, lengths, h0, w_ih, w_hh, b_ih, b_hh, reverse):
    S, B, _ = x_tm.shape
    H = h0.shape[-1]
    order = list(reversed(range(S))) if reverse else list(range(S))
    h = h0
    for t in order:
        gi = x_tm[t] @ w_ih + b_ih
        gh = h @ w_hh + b_hh
        r = jax.nn.sigmoid(gi[:, :H] + gh[:, :H])
        z = jax.nn.sigmoid(gi[:, H:2 * H] + gh[:, H:2 * H])
        n = jnp.tanh(gi[:, 2 * H:] + r * gh[:, 2 * H:])
        h_new = (1.0 - z) * n + z * h
        mask = t < lengths.reshape(B, 1)
        h = jnp.where(mask, h_new, h)
    return h


def _forward_ref(m, first, second, length1, length2, order_1, order_2):
    B = first.shape[0]
    hidden = m.init_hidden(B)

    def enc(tokens, lengths):
        x_tm = jnp.transpose(m.embedding[tokens], (1, 0, 2))
        hf = _gru_dir_ref(x_tm, lengths, hidden[0], m.w_ih_f, m.w_hh_f,
                          m.b_ih_f, m.b_hh_f, reverse=False)
        hb = _gru_dir_ref(x_tm, lengths, hidden[1], m.w_ih_b, m.w_hh_b,
                          m.b_ih_b, m.b_hh_b, reverse=True)
        return jnp.concatenate([hf, hb], axis=1)

    hc1 = enc(first, length1)[order_1]
    hc2 = enc(second, length2)[order_2]
    fh = jnp.concatenate([hc1, hc2], axis=1)
    h = jnp.maximum(fh @ m.w1 + m.b1, 0.0)
    return h @ m.w2 + m.b2


# --------------------------------- main -------------------------------------- #
if __name__ == "__main__":
    vocab, emb_size, hidden_size, num_classes = 50, 16, 32, 3
    B, S = 4, 8
    dw = 0.3

    key = jax.random.PRNGKey(0)
    k_w, k_m, k_t1, k_t2 = jax.random.split(key, 4)
    weight = jax.random.normal(k_w, (vocab, emb_size), jnp.float32)

    model = RNNWithDropoutPallas(emb_size, hidden_size, 1, num_classes,
                                 weight, dw, k_m)

    first = jax.random.randint(k_t1, (B, S), 0, vocab, dtype=jnp.int32)
    second = jax.random.randint(k_t2, (B, S), 0, vocab, dtype=jnp.int32)
    # pack_padded_sequence requires lengths sorted descending
    length1 = jnp.array([8, 6, 5, 3], dtype=jnp.int32)
    length2 = jnp.array([7, 7, 4, 2], dtype=jnp.int32)
    order_1 = jnp.array([2, 0, 3, 1], dtype=jnp.int32)
    order_2 = jnp.array([1, 3, 0, 2], dtype=jnp.int32)

    logits = model.forward(first, second, length1, length2, order_1, order_2)
    logits = jax.block_until_ready(logits)

    ref = _forward_ref(model, first, second, length1, length2, order_1, order_2)
    np.testing.assert_allclose(np.asarray(logits), np.asarray(ref),
                               rtol=1e-3, atol=1e-3)
    assert logits.shape == (B, num_classes)
    print("KERNEL_OK")
</pallas_src>

<mosaic_0001>
module attributes {stable_mosaic.version = 11 : i64} {
  func.func @kernel(%arg0: memref<64x16xf32, #tpu.memory_space<vmem>>, %arg1: memref<64x128xf32, #tpu.memory_space<vmem>>, %arg2: memref<8x128xf32, #tpu.memory_space<vmem>>, %arg3: memref<8x128xf32, #tpu.memory_space<vmem>>, %arg4: memref<16x384xf32, #tpu.memory_space<vmem>>, %arg5: memref<128x384xf32, #tpu.memory_space<vmem>>, %arg6: memref<1x384xf32, #tpu.memory_space<vmem>>, %arg7: memref<1x128xf32, #tpu.memory_space<vmem>>, %arg8: memref<16x384xf32, #tpu.memory_space<vmem>>, %arg9: memref<128x384xf32, #tpu.memory_space<vmem>>, %arg10: memref<1x384xf32, #tpu.memory_space<vmem>>, %arg11: memref<1x128xf32, #tpu.memory_space<vmem>>, %arg12: memref<2x8x128xf32, #tpu.memory_space<vmem>>, %arg13: memref<64x384xf32, #tpu.memory_space<vmem>>, %arg14: memref<64x384xf32, #tpu.memory_space<vmem>>) attributes {dimension_semantics = [], scalar_prefetch = 0 : i64, scratch_operands = 2 : i64, tpu.core_type = #tpu.core_type<tc>} {
    %c0 = arith.constant 0 : index
    %c0_0 = arith.constant 0 : index
    %0 = vector.load %arg0[%c0, %c0_0] : memref<64x16xf32, #tpu.memory_space<vmem>>, vector<64x16xf32>
    %c0_1 = arith.constant 0 : index
    %c0_2 = arith.constant 0 : index
    %1 = vector.load %arg4[%c0_1, %c0_2] : memref<16x384xf32, #tpu.memory_space<vmem>>, vector<16x384xf32>
    %cst = arith.constant dense<0.000000e+00> : vector<64x384xf32>
    %2 = tpu.matmul %0, %1, %cst {dimension_numbers = #tpu.dot_dimension_numbers<[1], [0], [0], [1], [0, 0, 1, 1], [], []>} : vector<64x16xf32>, vector<16x384xf32>, vector<64x384xf32> -> vector<64x384xf32>
    %c0_3 = arith.constant 0 : index
    %c0_4 = arith.constant 0 : index
    %3 = vector.load %arg6[%c0_3, %c0_4] : memref<1x384xf32, #tpu.memory_space<vmem>>, vector<1x384xf32>
    %4 = vector.broadcast %3 : vector<1x384xf32> to vector<64x384xf32>
    %5 = arith.addf %2, %4 : vector<64x384xf32>
    %c0_5 = arith.constant 0 : index
    %c0_6 = arith.constant 0 : index
    %6 = vector.load %arg13[%c0_5, %c0_6] : memref<64x384xf32, #tpu.memory_space<vmem>>, vector<64x384xf32>
    tpu.vector_store %arg13[%c0_5, %c0_6], %5 {strides = array<i32>} : memref<64x384xf32, #tpu.memory_space<vmem>>, vector<64x384xf32>,
    %c0_7 = arith.constant 0 : index
    %c0_8 = arith.constant 0 : index
    %7 = vector.load %arg8[%c0_7, %c0_8] : memref<16x384xf32, #tpu.memory_space<vmem>>, vector<16x384xf32>
    %cst_9 = arith.constant dense<0.000000e+00> : vector<64x384xf32>
    %8 = tpu.matmul %0, %7, %cst_9 {dimension_numbers = #tpu.dot_dimension_numbers<[1], [0], [0], [1], [0, 0, 1, 1], [], []>} : vector<64x16xf32>, vector<16x384xf32>, vector<64x384xf32> -> vector<64x384xf32>
    %c0_10 = arith.constant 0 : index
    %c0_11 = arith.constant 0 : index
    %9 = vector.load %arg10[%c0_10, %c0_11] : memref<1x384xf32, #tpu.memory_space<vmem>>, vector<1x384xf32>
    %10 = vector.broadcast %9 : vector<1x384xf32> to vector<64x384xf32>
    %11 = arith.addf %8, %10 : vector<64x384xf32>
    %c0_12 = arith.constant 0 : index
    %c0_13 = arith.constant 0 : index
    %12 = vector.load %arg14[%c0_12, %c0_13] : memref<64x384xf32, #tpu.memory_space<vmem>>, vector<64x384xf32>
    tpu.vector_store %arg14[%c0_12, %c0_13], %11 {strides = array<i32>} : memref<64x384xf32, #tpu.memory_space<vmem>>, vector<64x384xf32>,
    %c0_14 = arith.constant 0 : index
    %c0_15 = arith.constant 0 : index
    %13 = vector.load %arg7[%c0_14, %c0_15] : memref<1x128xf32, #tpu.memory_space<vmem>>, vector<1x128xf32>
    %c0_16 = arith.constant 0 : index
    %c0_17 = arith.constant 0 : index
    %14 = vector.load %arg11[%c0_16, %c0_17] : memref<1x128xf32, #tpu.memory_space<vmem>>, vector<1x128xf32>
    %c0_18 = arith.constant 0 : index
    %c0_19 = arith.constant 0 : index
    %15 = vector.load %arg2[%c0_18, %c0_19] : memref<8x128xf32, #tpu.memory_space<vmem>>, vector<8x128xf32>
    %c0_20 = arith.constant 0 : index
    %c0_21 = arith.constant 0 : index
    %16 = vector.load %arg3[%c0_20, %c0_21] : memref<8x128xf32, #tpu.memory_space<vmem>>, vector<8x128xf32>
    %c0_22 = arith.constant 0 : index
    %c0_23 = arith.constant 0 : index
    %17 = vector.load %arg5[%c0_22, %c0_23] : memref<128x384xf32, #tpu.memory_space<vmem>>, vector<128x384xf32>
    %cst_24 = arith.constant dense<0.000000e+00> : vector<8x384xf32>
    %18 = tpu.matmul %15, %17, %cst_24 {dimension_numbers = #tpu.dot_dimension_numbers<[1], [0], [0], [1], [0, 0, 1, 1], [], []>} : vector<8x128xf32>, vector<128x384xf32>, vector<8x384xf32> -> vector<8x384xf32>
    %c0_25 = arith.constant 0 : index
    %c0_26 = arith.constant 0 : index
    %19 = vector.load %arg13[%c0_25, %c0_26] : memref<64x384xf32, #tpu.memory_space<vmem>>, vector<8x384xf32>
    %c0_27 = arith.constant 0 : index
    %c0_28 = arith.constant 0 : index
    %20 = vector.load %arg1[%c0_27, %c0_28] : memref<64x128xf32, #tpu.memory_space<vmem>>, vector<8x128xf32>
    %21 = vector.extract_strided_slice %19 {offsets = [0, 0], sizes = [8, 128], strides = [1, 1]} : vector<8x384xf32> to vector<8x128xf32>
    %22 = vector.extract_strided_slice %18 {offsets = [0, 0], sizes = [8, 128], strides = [1, 1]} : vector<8x384xf32> to vector<8x128xf32>
    %23 = arith.addf %21, %22 : vector<8x128xf32>
    %24 = arith.negf %23 : vector<8x128xf32>
    %25 = math.exp %24 : vector<8x128xf32>
    %cst_29 = arith.constant 1.000000e+00 : f32
    %26 = vector.broadcast %cst_29 : f32 to vector<8x128xf32>
    %27 = arith.addf %26, %25 : vector<8x128xf32>
    %28 = arith.divf %26, %27 : vector<8x128xf32>
    %29 = vector.extract_strided_slice %19 {offsets = [0, 128], sizes = [8, 128], strides = [1, 1]} : vector<8x384xf32> to vector<8x128xf32>
    %30 = vector.extract_strided_slice %18 {offsets = [0, 128], sizes = [8, 128], strides = [1, 1]} : vector<8x384xf32> to vector<8x128xf32>
    %31 = arith.addf %29, %30 : vector<8x128xf32>
    %32 = arith.negf %31 : vector<8x128xf32>
    %33 = math.exp %32 : vector<8x128xf32>
    %cst_30 = arith.constant 1.000000e+00 : f32
    %34 = vector.broadcast %cst_30 : f32 to vector<8x128xf32>
    %35 = arith.addf %34, %33 : vector<8x128xf32>
    %36 = arith.divf %34, %35 : vector<8x128xf32>
    %37 = vector.extract_strided_slice %19 {offsets = [0, 256], sizes = [8, 128], strides = [1, 1]} : vector<8x384xf32> to vector<8x128xf32>
    %38 = vector.extract_strided_slice %18 {offsets = [0, 256], sizes = [8, 128], strides = [1, 1]} : vector<8x384xf32> to vector<8x128xf32>
    %39 = vector.broadcast %13 : vector<1x128xf32> to vector<8x128xf32>
    %40 = arith.addf %38, %39 : vector<8x128xf32>
    %41 = arith.mulf %28, %40 : vector<8x128xf32>
    %42 = arith.addf %37, %41 : vector<8x128xf32>
    %43 = math.tanh %42 : vector<8x128xf32>
    %cst_31 = arith.constant 1.000000e+00 : f32
    %44 = vector.broadcast %cst_31 : f32 to vector<8x128xf32>
    %45 = arith.subf %44, %36 : vector<8x128xf32>
    %46 = arith.mulf %45, %43 : vector<8x128xf32>
    %47 = arith.mulf %36, %15 : vector<8x128xf32>
    %48 = arith.addf %46, %47 : vector<8x128xf32>
    %49 = arith.subf %48, %15 : vector<8x128xf32>
    %50 = arith.mulf %20, %49 : vector<8x128xf32>
    %51 = arith.addf %15, %50 : vector<8x128xf32>
    %c0_32 = arith.constant 0 : index
    %c0_33 = arith.constant 0 : index
    %52 = vector.load %arg9[%c0_32, %c0_33] : memref<128x384xf32, #tpu.memory_space<vmem>>, vector<128x384xf32>
    %cst_34 = arith.constant dense<0.000000e+00> : vector<8x384xf32>
    %53 = tpu.matmul %16, %52, %cst_34 {dimension_numbers = #tpu.dot_dimension_numbers<[1], [0], [0], [1], [0, 0, 1, 1], [], []>} : vector<8x128xf32>, vector<128x384xf32>, vector<8x384xf32> -> vector<8x384xf32>
    %c56 = arith.constant 56 : index
    %c0_35 = arith.constant 0 : index
    %54 = vector.load %arg14[%c56, %c0_35] : memref<64x384xf32, #tpu.memory_space<vmem>>, vector<8x384xf32>
    %c56_36 = arith.constant 56 : index
    %c0_37 = arith.constant 0 : index
    %55 = vector.load %arg1[%c56_36, %c0_37] : memref<64x128xf32, #tpu.memory_space<vmem>>, vector<8x128xf32>
    %56 = vector.extract_strided_slice %54 {offsets = [0, 0], sizes = [8, 128], strides = [1, 1]} : vector<8x384xf32> to vector<8x128xf32>
    %57 = vector.extract_strided_slice %53 {offsets = [0, 0], sizes = [8, 128], strides = [1, 1]} : vector<8x384xf32> to vector<8x128xf32>
    %58 = arith.addf %56, %57 : vector<8x128xf32>
    %59 = arith.negf %58 : vector<8x128xf32>
    %60 = math.exp %59 : vector<8x128xf32>
    %cst_38 = arith.constant 1.000000e+00 : f32
    %61 = vector.broadcast %cst_38 : f32 to vector<8x128xf32>
    %62 = arith.addf %61, %60 : vector<8x128xf32>
    %63 = arith.divf %61, %62 : vector<8x128xf32>
    %64 = vector.extract_strided_slice %54 {offsets = [0, 128], sizes = [8, 128], strides = [1, 1]} : vector<8x384xf32> to vector<8x128xf32>
    %65 = vector.extract_strided_slice %53 {offsets = [0, 128], sizes = [8, 128], strides = [1, 1]} : vector<8x384xf32> to vector<8x128xf32>
    %66 = arith.addf %64, %65 : vector<8x128xf32>
    %67 = arith.negf %66 : vector<8x128xf32>
    %68 = math.exp %67 : vector<8x128xf32>
    %cst_39 = arith.constant 1.000000e+00 : f32
    %69 = vector.broadcast %cst_39 : f32 to vector<8x128xf32>
    %70 = arith.addf %69, %68 : vector<8x128xf32>
    %71 = arith.divf %69, %70 : vector<8x128xf32>
    %72 = vector.extract_strided_slice %54 {offsets = [0, 256], sizes = [8, 128], strides = [1, 1]} : vector<8x384xf32> to vector<8x128xf32>
    %73 = vector.extract_strided_slice %53 {offsets = [0, 256], sizes = [8, 128], strides = [1, 1]} : vector<8x384xf32> to vector<8x128xf32>
    %74 = vector.broadcast %14 : vector<1x128xf32> to vector<8x128xf32>
    %75 = arith.addf %73, %74 : vector<8x128xf32>
    %76 = arith.mulf %63, %75 : vector<8x128xf32>
    %77 = arith.addf %72, %76 : vector<8x128xf32>
    %78 = math.tanh %77 : vector<8x128xf32>
    %cst_40 = arith.constant 1.000000e+00 : f32
    %79 = vector.broadcast %cst_40 : f32 to vector<8x128xf32>
    %80 = arith.subf %79, %71 : vector<8x128xf32>
    %81 = arith.mulf %80, %78 : vector<8x128xf32>
    %82 = arith.mulf %71, %16 : vector<8x128xf32>
    %83 = arith.addf %81, %82 : vector<8x128xf32>
    %84 = arith.subf %83, %16 : vector<8x128xf32>
    %85 = arith.mulf %55, %84 : vector<8x128xf32>
    %86 = arith.addf %16, %85 : vector<8x128xf32>
    %c0_41 = arith.constant 0 : index
    %c0_42 = arith.constant 0 : index
    %87 = vector.load %arg5[%c0_41, %c0_42] : memref<128x384xf32, #tpu.memory_space<vmem>>, vector<128x384xf32>
    %cst_43 = arith.constant dense<0.000000e+00> : vector<8x384xf32>
    %88 = tpu.matmul %51, %87, %cst_43 {dimension_numbers = #tpu.dot_dimension_numbers<[1], [0], [0], [1], [0, 0, 1, 1], [], []>} : vector<8x128xf32>, vector<128x384xf32>, vector<8x384xf32> -> vector<8x384xf32>
    %c8 = arith.constant 8 : index
    %c0_44 = arith.constant 0 : index
    %89 = vector.load %arg13[%c8, %c0_44] : memref<64x384xf32, #tpu.memory_space<vmem>>, vector<8x384xf32>
    %c8_45 = arith.constant 8 : index
    %c0_46 = arith.constant 0 : index
    %90 = vector.load %arg1[%c8_45, %c0_46] : memref<64x128xf32, #tpu.memory_space<vmem>>, vector<8x128xf32>
    %91 = vector.extract_strided_slice %89 {offsets = [0, 0], sizes = [8, 128], strides = [1, 1]} : vector<8x384xf32> to vector<8x128xf32>
    %92 = vector.extract_strided_slice %88 {offsets = [0, 0], sizes = [8, 128], strides = [1, 1]} : vector<8x384xf32> to vector<8x128xf32>
    %93 = arith.addf %91, %92 : vector<8x128xf32>
    %94 = arith.negf %93 : vector<8x128xf32>
    %95 = math.exp %94 : vector<8x128xf32>
    %cst_47 = arith.constant 1.000000e+00 : f32
    %96 = vector.broadcast %cst_47 : f32 to vector<8x128xf32>
    %97 = arith.addf %96, %95 : vector<8x128xf32>
    %98 = arith.divf %96, %97 : vector<8x128xf32>
    %99 = vector.extract_strided_slice %89 {offsets = [0, 128], sizes = [8, 128], strides = [1, 1]} : vector<8x384xf32> to vector<8x128xf32>
    %100 = vector.extract_strided_slice %88 {offsets = [0, 128], sizes = [8, 128], strides = [1, 1]} : vector<8x384xf32> to vector<8x128xf32>
    %101 = arith.addf %99, %100 : vector<8x128xf32>
    %102 = arith.negf %101 : vector<8x128xf32>
    %103 = math.exp %102 : vector<8x128xf32>
    %cst_48 = arith.constant 1.000000e+00 : f32
    %104 = vector.broadcast %cst_48 : f32 to vector<8x128xf32>
    %105 = arith.addf %104, %103 : vector<8x128xf32>
    %106 = arith.divf %104, %105 : vector<8x128xf32>
    %107 = vector.extract_strided_slice %89 {offsets = [0, 256], sizes = [8, 128], strides = [1, 1]} : vector<8x384xf32> to vector<8x128xf32>
    %108 = vector.extract_strided_slice %88 {offsets = [0, 256], sizes = [8, 128], strides = [1, 1]} : vector<8x384xf32> to vector<8x128xf32>
    %109 = vector.broadcast %13 : vector<1x128xf32> to vector<8x128xf32>
    %110 = arith.addf %108, %109 : vector<8x128xf32>
    %111 = arith.mulf %98, %110 : vector<8x128xf32>
    %112 = arith.addf %107, %111 : vector<8x128xf32>
    %113 = math.tanh %112 : vector<8x128xf32>
    %cst_49 = arith.constant 1.000000e+00 : f32
    %114 = vector.broadcast %cst_49 : f32 to vector<8x128xf32>
    %115 = arith.subf %114, %106 : vector<8x128xf32>
    %116 = arith.mulf %115, %113 : vector<8x128xf32>
    %117 = arith.mulf %106, %51 : vector<8x128xf32>
    %118 = arith.addf %116, %117 : vector<8x128xf32>
    %119 = arith.subf %118, %51 : vector<8x128xf32>
    %120 = arith.mulf %90, %119 : vector<8x128xf32>
    %121 = arith.addf %51, %120 : vector<8x128xf32>
    %c0_50 = arith.constant 0 : index
    %c0_51 = arith.constant 0 : index
    %122 = vector.load %arg9[%c0_50, %c0_51] : memref<128x384xf32, #tpu.memory_space<vmem>>, vector<128x384xf32>
    %cst_52 = arith.constant dense<0.000000e+00> : vector<8x384xf32>
    %123 = tpu.matmul %86, %122, %cst_52 {dimension_numbers = #tpu.dot_dimension_numbers<[1], [0], [0], [1], [0, 0, 1, 1], [], []>} : vector<8x128xf32>, vector<128x384xf32>, vector<8x384xf32> -> vector<8x384xf32>
    %c48 = arith.constant 48 : index
    %c0_53 = arith.constant 0 : index
    %124 = vector.load %arg14[%c48, %c0_53] : memref<64x384xf32, #tpu.memory_space<vmem>>, vector<8x384xf32>
    %c48_54 = arith.constant 48 : index
    %c0_55 = arith.constant 0 : index
    %125 = vector.load %arg1[%c48_54, %c0_55] : memref<64x128xf32, #tpu.memory_space<vmem>>, vector<8x128xf32>
    %126 = vector.extract_strided_slice %124 {offsets = [0, 0], sizes = [8, 128], strides = [1, 1]} : vector<8x384xf32> to vector<8x128xf32>
    %127 = vector.extract_strided_slice %123 {offsets = [0, 0], sizes = [8, 128], strides = [1, 1]} : vector<8x384xf32> to vector<8x128xf32>
    %128 = arith.addf %126, %127 : vector<8x128xf32>
    %129 = arith.negf %128 : vector<8x128xf32>
    %130 = math.exp %129 : vector<8x128xf32>
    %cst_56 = arith.constant 1.000000e+00 : f32
    %131 = vector.broadcast %cst_56 : f32 to vector<8x128xf32>
    %132 = arith.addf %131, %130 : vector<8x128xf32>
    %133 = arith.divf %131, %132 : vector<8x128xf32>
    %134 = vector.extract_strided_slice %124 {offsets = [0, 128], sizes = [8, 128], strides = [1, 1]} : vector<8x384xf32> to vector<8x128xf32>
    %135 = vector.extract_strided_slice %123 {offsets = [0, 128], sizes = [8, 128], strides = [1, 1]} : vector<8x384xf32> to vector<8x128xf32>
    %136 = arith.addf %134, %135 : vector<8x128xf32>
    %137 = arith.negf %136 : vector<8x128xf32>
    %138 = math.exp %137 : vector<8x128xf32>
    %cst_57 = arith.constant 1.000000e+00 : f32
    %139 = vector.broadcast %cst_57 : f32 to vector<8x128xf32>
    %140 = arith.addf %139, %138 : vector<8x128xf32>
    %141 = arith.divf %139, %140 : vector<8x128xf32>
    %142 = vector.extract_strided_slice %124 {offsets = [0, 256], sizes = [8, 128], strides = [1, 1]} : vector<8x384xf32> to vector<8x128xf32>
    %143 = vector.extract_strided_slice %123 {offsets = [0, 256], sizes = [8, 128], strides = [1, 1]} : vector<8x384xf32> to vector<8x128xf32>
    %144 = vector.broadcast %14 : vector<1x128xf32> to vector<8x128xf32>
    %145 = arith.addf %143, %144 : vector<8x128xf32>
    %146 = arith.mulf %133, %145 : vector<8x128xf32>
    %147 = arith.addf %142, %146 : vector<8x128xf32>
    %148 = math.tanh %147 : vector<8x128xf32>
    %cst_58 = arith.constant 1.000000e+00 : f32
    %149 = vector.broadcast %cst_58 : f32 to vector<8x128xf32>
    %150 = arith.subf %149, %141 : vector<8x128xf32>
    %151 = arith.mulf %150, %148 : vector<8x128xf32>
    %152 = arith.mulf %141, %86 : vector<8x128xf32>
    %153 = arith.addf %151, %152 : vector<8x128xf32>
    %154 = arith.subf %153, %86 : vector<8x128xf32>
    %155 = arith.mulf %125, %154 : vector<8x128xf32>
    %156 = arith.addf %86, %155 : vector<8x128xf32>
    %c0_59 = arith.constant 0 : index
    %c0_60 = arith.constant 0 : index
    %157 = vector.load %arg5[%c0_59, %c0_60] : memref<128x384xf32, #tpu.memory_space<vmem>>, vector<128x384xf32>
    %cst_61 = arith.constant dense<0.000000e+00> : vector<8x384xf32>
    %158 = tpu.matmul %121, %157, %cst_61 {dimension_numbers = #tpu.dot_dimension_numbers<[1], [0], [0], [1], [0, 0, 1, 1], [], []>} : vector<8x128xf32>, vector<128x384xf32>, vector<8x384xf32> -> vector<8x384xf32>
    %c16 = arith.constant 16 : index
    %c0_62 = arith.constant 0 : index
    %159 = vector.load %arg13[%c16, %c0_62] : memref<64x384xf32, #tpu.memory_space<vmem>>, vector<8x384xf32>
    %c16_63 = arith.constant 16 : index
    %c0_64 = arith.constant 0 : index
    %160 = vector.load %arg1[%c16_63, %c0_64] : memref<64x128xf32, #tpu.memory_space<vmem>>, vector<8x128xf32>
    %161 = vector.extract_strided_slice %159 {offsets = [0, 0], sizes = [8, 128], strides = [1, 1]} : vector<8x384xf32> to vector<8x128xf32>
    %162 = vector.extract_strided_slice %158 {offsets = [0, 0], sizes = [8, 128], strides = [1, 1]} : vector<8x384xf32> to vector<8x128xf32>
    %163 = arith.addf %161, %162 : vector<8x128xf32>
    %164 = arith.negf %163 : vector<8x128xf32>
    %165 = math.exp %164 : vector<8x128xf32>
    %cst_65 = arith.constant 1.000000e+00 : f32
    %166 = vector.broadcast %cst_65 : f32 to vector<8x128xf32>
    %167 = arith.addf %166, %165 : vector<8x128xf32>
    %168 = arith.divf %166, %167 : vector<8x128xf32>
    %169 = vector.extract_strided_slice %159 {offsets = [0, 128], sizes = [8, 128], strides = [1, 1]} : vector<8x384xf32> to vector<8x128xf32>
    %170 = vector.extract_strided_slice %158 {offsets = [0, 128], sizes = [8, 128], strides = [1, 1]} : vector<8x384xf32> to vector<8x128xf32>
    %171 = arith.addf %169, %170 : vector<8x128xf32>
    %172 = arith.negf %171 : vector<8x128xf32>
    %173 = math.exp %172 : vector<8x128xf32>
    %cst_66 = arith.constant 1.000000e+00 : f32
    %174 = vector.broadcast %cst_66 : f32 to vector<8x128xf32>
    %175 = arith.addf %174, %173 : vector<8x128xf32>
    %176 = arith.divf %174, %175 : vector<8x128xf32>
    %177 = vector.extract_strided_slice %159 {offsets = [0, 256], sizes = [8, 128], strides = [1, 1]} : vector<8x384xf32> to vector<8x128xf32>
    %178 = vector.extract_strided_slice %158 {offsets = [0, 256], sizes = [8, 128], strides = [1, 1]} : vector<8x384xf32> to vector<8x128xf32>
    %179 = vector.broadcast %13 : vector<1x128xf32> to vector<8x128xf32>
    %180 = arith.addf %178, %179 : vector<8x128xf32>
    %181 = arith.mulf %168, %180 : vector<8x128xf32>
    %182 = arith.addf %177, %181 : vector<8x128xf32>
    %183 = math.tanh %182 : vector<8x128xf32>
    %cst_67 = arith.constant 1.000000e+00 : f32
    %184 = vector.broadcast %cst_67 : f32 to vector<8x128xf32>
    %185 = arith.subf %184, %176 : vector<8x128xf32>
    %186 = arith.mulf %185, %183 : vector<8x128xf32>
    %187 = arith.mulf %176, %121 : vector<8x128xf32>
    %188 = arith.addf %186, %187 : vector<8x128xf32>
    %189 = arith.subf %188, %121 : vector<8x128xf32>
    %190 = arith.mulf %160, %189 : vector<8x128xf32>
    %191 = arith.addf %121, %190 : vector<8x128xf32>
    %c0_68 = arith.constant 0 : index
    %c0_69 = arith.constant 0 : index
    %192 = vector.load %arg9[%c0_68, %c0_69] : memref<128x384xf32, #tpu.memory_space<vmem>>, vector<128x384xf32>
    %cst_70 = arith.constant dense<0.000000e+00> : vector<8x384xf32>
    %193 = tpu.matmul %156, %192, %cst_70 {dimension_numbers = #tpu.dot_dimension_numbers<[1], [0], [0], [1], [0, 0, 1, 1], [], []>} : vector<8x128xf32>, vector<128x384xf32>, vector<8x384xf32> -> vector<8x384xf32>
    %c40 = arith.constant 40 : index
    %c0_71 = arith.constant 0 : index
    %194 = vector.load %arg14[%c40, %c0_71] : memref<64x384xf32, #tpu.memory_space<vmem>>, vector<8x384xf32>
    %c40_72 = arith.constant 40 : index
    %c0_73 = arith.constant 0 : index
    %195 = vector.load %arg1[%c40_72, %c0_73] : memref<64x128xf32, #tpu.memory_space<vmem>>, vector<8x128xf32>
    %196 = vector.extract_strided_slice %194 {offsets = [0, 0], sizes = [8, 128], strides = [1, 1]} : vector<8x384xf32> to vector<8x128xf32>
    %197 = vector.extract_strided_slice %193 {offsets = [0, 0], sizes = [8, 128], strides = [1, 1]} : vector<8x384xf32> to vector<8x128xf32>
    %198 = arith.addf %196, %197 : vector<8x128xf32>
    %199 = arith.negf %198 : vector<8x128xf32>
    %200 = math.exp %199 : vector<8x128xf32>
    %cst_74 = arith.constant 1.000000e+00 : f32
    %201 = vector.broadcast %cst_74 : f32 to vector<8x128xf32>
    %202 = arith.addf %201, %200 : vector<8x128xf32>
    %203 = arith.divf %201, %202 : vector<8x128xf32>
    %204 = vector.extract_strided_slice %194 {offsets = [0, 128], sizes = [8, 128], strides = [1, 1]} : vector<8x384xf32> to vector<8x128xf32>
    %205 = vector.extract_strided_slice %193 {offsets = [0, 128], sizes = [8, 128], strides = [1, 1]} : vector<8x384xf32> to vector<8x128xf32>
    %206 = arith.addf %204, %205 : vector<8x128xf32>
    %207 = arith.negf %206 : vector<8x128xf32>
    %208 = math.exp %207 : vector<8x128xf32>
    %cst_75 = arith.constant 1.000000e+00 : f32
    %209 = vector.broadcast %cst_75 : f32 to vector<8x128xf32>
    %210 = arith.addf %209, %208 : vector<8x128xf32>
    %211 = arith.divf %209, %210 : vector<8x128xf32>
    %212 = vector.extract_strided_slice %194 {offsets = [0, 256], sizes = [8, 128], strides = [1, 1]} : vector<8x384xf32> to vector<8x128xf32>
    %213 = vector.extract_strided_slice %193 {offsets = [0, 256], sizes = [8, 128], strides = [1, 1]} : vector<8x384xf32> to vector<8x128xf32>
    %214 = vector.broadcast %14 : vector<1x128xf32> to vector<8x128xf32>
    %215 = arith.addf %213, %214 : vector<8x128xf32>
    %216 = arith.mulf %203, %215 : vector<8x128xf32>
    %217 = arith.addf %212, %216 : vector<8x128xf32>
    %218 = math.tanh %217 : vector<8x128xf32>
    %cst_76 = arith.constant 1.000000e+00 : f32
    %219 = vector.broadcast %cst_76 : f32 to vector<8x128xf32>
    %220 = arith.subf %219, %211 : vector<8x128xf32>
    %221 = arith.mulf %220, %218 : vector<8x128xf32>
    %222 = arith.mulf %211, %156 : vector<8x128xf32>
    %223 = arith.addf %221, %222 : vector<8x128xf32>
    %224 = arith.subf %223, %156 : vector<8x128xf32>
    %225 = arith.mulf %195, %224 : vector<8x128xf32>
    %226 = arith.addf %156, %225 : vector<8x128xf32>
    %c0_77 = arith.constant 0 : index
    %c0_78 = arith.constant 0 : index
    %227 = vector.load %arg5[%c0_77, %c0_78] : memref<128x384xf32, #tpu.memory_space<vmem>>, vector<128x384xf32>
    %cst_79 = arith.constant dense<0.000000e+00> : vector<8x384xf32>
    %228 = tpu.matmul %191, %227, %cst_79 {dimension_numbers = #tpu.dot_dimension_numbers<[1], [0], [0], [1], [0, 0, 1, 1], [], []>} : vector<8x128xf32>, vector<128x384xf32>, vector<8x384xf32> -> vector<8x384xf32>
    %c24 = arith.constant 24 : index
    %c0_80 = arith.constant 0 : index
    %229 = vector.load %arg13[%c24, %c0_80] : memref<64x384xf32, #tpu.memory_space<vmem>>, vector<8x384xf32>
    %c24_81 = arith.constant 24 : index
    %c0_82 = arith.constant 0 : index
    %230 = vector.load %arg1[%c24_81, %c0_82] : memref<64x128xf32, #tpu.memory_space<vmem>>, vector<8x128xf32>
    %231 = vector.extract_strided_slice %229 {offsets = [0, 0], sizes = [8, 128], strides = [1, 1]} : vector<8x384xf32> to vector<8x128xf32>
    %232 = vector.extract_strided_slice %228 {offsets = [0, 0], sizes = [8, 128], strides = [1, 1]} : vector<8x384xf32> to vector<8x128xf32>
    %233 = arith.addf %231, %232 : vector<8x128xf32>
    %234 = arith.negf %233 : vector<8x128xf32>
    %235 = math.exp %234 : vector<8x128xf32>
    %cst_83 = arith.constant 1.000000e+00 : f32
    %236 = vector.broadcast %cst_83 : f32 to vector<8x128xf32>
    %237 = arith.addf %236, %235 : vector<8x128xf32>
    %238 = arith.divf %236, %237 : vector<8x128xf32>
    %239 = vector.extract_strided_slice %229 {offsets = [0, 128], sizes = [8, 128], strides = [1, 1]} : vector<8x384xf32> to vector<8x128xf32>
    %240 = vector.extract_strided_slice %228 {offsets = [0, 128], sizes = [8, 128], strides = [1, 1]} : vector<8x384xf32> to vector<8x128xf32>
    %241 = arith.addf %239, %240 : vector<8x128xf32>
    %242 = arith.negf %241 : vector<8x128xf32>
    %243 = math.exp %242 : vector<8x128xf32>
    %cst_84 = arith.constant 1.000000e+00 : f32
    %244 = vector.broadcast %cst_84 : f32 to vector<8x128xf32>
    %245 = arith.addf %244, %243 : vector<8x128xf32>
    %246 = arith.divf %244, %245 : vector<8x128xf32>
    %247 = vector.extract_strided_slice %229 {offsets = [0, 256], sizes = [8, 128], strides = [1, 1]} : vector<8x384xf32> to vector<8x128xf32>
    %248 = vector.extract_strided_slice %228 {offsets = [0, 256], sizes = [8, 128], strides = [1, 1]} : vector<8x384xf32> to vector<8x128xf32>
    %249 = vector.broadcast %13 : vector<1x128xf32> to vector<8x128xf32>
    %250 = arith.addf %248, %249 : vector<8x128xf32>
    %251 = arith.mulf %238, %250 : vector<8x128xf32>
    %252 = arith.addf %247, %251 : vector<8x128xf32>
    %253 = math.tanh %252 : vector<8x128xf32>
    %cst_85 = arith.constant 1.000000e+00 : f32
    %254 = vector.broadcast %cst_85 : f32 to vector<8x128xf32>
    %255 = arith.subf %254, %246 : vector<8x128xf32>
    %256 = arith.mulf %255, %253 : vector<8x128xf32>
    %257 = arith.mulf %246, %191 : vector<8x128xf32>
    %258 = arith.addf %256, %257 : vector<8x128xf32>
    %259 = arith.subf %258, %191 : vector<8x128xf32>
    %260 = arith.mulf %230, %259 : vector<8x128xf32>
    %261 = arith.addf %191, %260 : vector<8x128xf32>
    %c0_86 = arith.constant 0 : index
    %c0_87 = arith.constant 0 : index
    %262 = vector.load %arg9[%c0_86, %c0_87] : memref<128x384xf32, #tpu.memory_space<vmem>>, vector<128x384xf32>
    %cst_88 = arith.constant dense<0.000000e+00> : vector<8x384xf32>
    %263 = tpu.matmul %226, %262, %cst_88 {dimension_numbers = #tpu.dot_dimension_numbers<[1], [0], [0], [1], [0, 0, 1, 1], [], []>} : vector<8x128xf32>, vector<128x384xf32>, vector<8x384xf32> -> vector<8x384xf32>
    %c32 = arith.constant 32 : index
    %c0_89 = arith.constant 0 : index
    %264 = vector.load %arg14[%c32, %c0_89] : memref<64x384xf32, #tpu.memory_space<vmem>>, vector<8x384xf32>
    %c32_90 = arith.constant 32 : index
    %c0_91 = arith.constant 0 : index
    %265 = vector.load %arg1[%c32_90, %c0_91] : memref<64x128xf32, #tpu.memory_space<vmem>>, vector<8x128xf32>
    %266 = vector.extract_strided_slice %264 {offsets = [0, 0], sizes = [8, 128], strides = [1, 1]} : vector<8x384xf32> to vector<8x128xf32>
    %267 = vector.extract_strided_slice %263 {offsets = [0, 0], sizes = [8, 128], strides = [1, 1]} : vector<8x384xf32> to vector<8x128xf32>
    %268 = arith.addf %266, %267 : vector<8x128xf32>
    %269 = arith.negf %268 : vector<8x128xf32>
    %270 = math.exp %269 : vector<8x128xf32>
    %cst_92 = arith.constant 1.000000e+00 : f32
    %271 = vector.broadcast %cst_92 : f32 to vector<8x128xf32>
    %272 = arith.addf %271, %270 : vector<8x128xf32>
    %273 = arith.divf %271, %272 : vector<8x128xf32>
    %274 = vector.extract_strided_slice %264 {offsets = [0, 128], sizes = [8, 128], strides = [1, 1]} : vector<8x384xf32> to vector<8x128xf32>
    %275 = vector.extract_strided_slice %263 {offsets = [0, 128], sizes = [8, 128], strides = [1, 1]} : vector<8x384xf32> to vector<8x128xf32>
    %276 = arith.addf %274, %275 : vector<8x128xf32>
    %277 = arith.negf %276 : vector<8x128xf32>
    %278 = math.exp %277 : vector<8x128xf32>
    %cst_93 = arith.constant 1.000000e+00 : f32
    %279 = vector.broadcast %cst_93 : f32 to vector<8x128xf32>
    %280 = arith.addf %279, %278 : vector<8x128xf32>
    %281 = arith.divf %279, %280 : vector<8x128xf32>
    %282 = vector.extract_strided_slice %264 {offsets = [0, 256], sizes = [8, 128], strides = [1, 1]} : vector<8x384xf32> to vector<8x128xf32>
    %283 = vector.extract_strided_slice %263 {offsets = [0, 256], sizes = [8, 128], strides = [1, 1]} : vector<8x384xf32> to vector<8x128xf32>
    %284 = vector.broadcast %14 : vector<1x128xf32> to vector<8x128xf32>
    %285 = arith.addf %283, %284 : vector<8x128xf32>
    %286 = arith.mulf %273, %285 : vector<8x128xf32>
    %287 = arith.addf %282, %286 : vector<8x128xf32>
    %288 = math.tanh %287 : vector<8x128xf32>
    %cst_94 = arith.constant 1.000000e+00 : f32
    %289 = vector.broadcast %cst_94 : f32 to vector<8x128xf32>
    %290 = arith.subf %289, %281 : vector<8x128xf32>
    %291 = arith.mulf %290, %288 : vector<8x128xf32>
    %292 = arith.mulf %281, %226 : vector<8x128xf32>
    %293 = arith.addf %291, %292 : vector<8x128xf32>
    %294 = arith.subf %293, %226 : vector<8x128xf32>
    %295 = arith.mulf %265, %294 : vector<8x128xf32>
    %296 = arith.addf %226, %295 : vector<8x128xf32>
    %c0_95 = arith.constant 0 : index
    %c0_96 = arith.constant 0 : index
    %297 = vector.load %arg5[%c0_95, %c0_96] : memref<128x384xf32, #tpu.memory_space<vmem>>, vector<128x384xf32>
    %cst_97 = arith.constant dense<0.000000e+00> : vector<8x384xf32>
    %298 = tpu.matmul %261, %297, %cst_97 {dimension_numbers = #tpu.dot_dimension_numbers<[1], [0], [0], [1], [0, 0, 1, 1], [], []>} : vector<8x128xf32>, vector<128x384xf32>, vector<8x384xf32> -> vector<8x384xf32>
    %c32_98 = arith.constant 32 : index
    %c0_99 = arith.constant 0 : index
    %299 = vector.load %arg13[%c32_98, %c0_99] : memref<64x384xf32, #tpu.memory_space<vmem>>, vector<8x384xf32>
    %c32_100 = arith.constant 32 : index
    %c0_101 = arith.constant 0 : index
    %300 = vector.load %arg1[%c32_100, %c0_101] : memref<64x128xf32, #tpu.memory_space<vmem>>, vector<8x128xf32>
    %301 = vector.extract_strided_slice %299 {offsets = [0, 0], sizes = [8, 128], strides = [1, 1]} : vector<8x384xf32> to vector<8x128xf32>
    %302 = vector.extract_strided_slice %298 {offsets = [0, 0], sizes = [8, 128], strides = [1, 1]} : vector<8x384xf32> to vector<8x128xf32>
    %303 = arith.addf %301, %302 : vector<8x128xf32>
    %304 = arith.negf %303 : vector<8x128xf32>
    %305 = math.exp %304 : vector<8x128xf32>
    %cst_102 = arith.constant 1.000000e+00 : f32
    %306 = vector.broadcast %cst_102 : f32 to vector<8x128xf32>
    %307 = arith.addf %306, %305 : vector<8x128xf32>
    %308 = arith.divf %306, %307 : vector<8x128xf32>
    %309 = vector.extract_strided_slice %299 {offsets = [0, 128], sizes = [8, 128], strides = [1, 1]} : vector<8x384xf32> to vector<8x128xf32>
    %310 = vector.extract_strided_slice %298 {offsets = [0, 128], sizes = [8, 128], strides = [1, 1]} : vector<8x384xf32> to vector<8x128xf32>
    %311 = arith.addf %309, %310 : vector<8x128xf32>
    %312 = arith.negf %311 : vector<8x128xf32>
    %313 = math.exp %312 : vector<8x128xf32>
    %cst_103 = arith.constant 1.000000e+00 : f32
    %314 = vector.broadcast %cst_103 : f32 to vector<8x128xf32>
    %315 = arith.addf %314, %313 : vector<8x128xf32>
    %316 = arith.divf %314, %315 : vector<8x128xf32>
    %317 = vector.extract_strided_slice %299 {offsets = [0, 256], sizes = [8, 128], strides = [1, 1]} : vector<8x384xf32> to vector<8x128xf32>
    %318 = vector.extract_strided_slice %298 {offsets = [0, 256], sizes = [8, 128], strides = [1, 1]} : vector<8x384xf32> to vector<8x128xf32>
    %319 = vector.broadcast %13 : vector<1x128xf32> to vector<8x128xf32>
    %320 = arith.addf %318, %319 : vector<8x128xf32>
    %321 = arith.mulf %308, %320 : vector<8x128xf32>
    %322 = arith.addf %317, %321 : vector<8x128xf32>
    %323 = math.tanh %322 : vector<8x128xf32>
    %cst_104 = arith.constant 1.000000e+00 : f32
    %324 = vector.broadcast %cst_104 : f32 to vector<8x128xf32>
    %325 = arith.subf %324, %316 : vector<8x128xf32>
    %326 = arith.mulf %325, %323 : vector<8x128xf32>
    %327 = arith.mulf %316, %261 : vector<8x128xf32>
    %328 = arith.addf %326, %327 : vector<8x128xf32>
    %329 = arith.subf %328, %261 : vector<8x128xf32>
    %330 = arith.mulf %300, %329 : vector<8x128xf32>
    %331 = arith.addf %261, %330 : vector<8x128xf32>
    %c0_105 = arith.constant 0 : index
    %c0_106 = arith.constant 0 : index
    %332 = vector.load %arg9[%c0_105, %c0_106] : memref<128x384xf32, #tpu.memory_space<vmem>>, vector<128x384xf32>
    %cst_107 = arith.constant dense<0.000000e+00> : vector<8x384xf32>
    %333 = tpu.matmul %296, %332, %cst_107 {dimension_numbers = #tpu.dot_dimension_numbers<[1], [0], [0], [1], [0, 0, 1, 1], [], []>} : vector<8x128xf32>, vector<128x384xf32>, vector<8x384xf32> -> vector<8x384xf32>
    %c24_108 = arith.constant 24 : index
    %c0_109 = arith.constant 0 : index
    %334 = vector.load %arg14[%c24_108, %c0_109] : memref<64x384xf32, #tpu.memory_space<vmem>>, vector<8x384xf32>
    %c24_110 = arith.constant 24 : index
    %c0_111 = arith.constant 0 : index
    %335 = vector.load %arg1[%c24_110, %c0_111] : memref<64x128xf32, #tpu.memory_space<vmem>>, vector<8x128xf32>
    %336 = vector.extract_strided_slice %334 {offsets = [0, 0], sizes = [8, 128], strides = [1, 1]} : vector<8x384xf32> to vector<8x128xf32>
    %337 = vector.extract_strided_slice %333 {offsets = [0, 0], sizes = [8, 128], strides = [1, 1]} : vector<8x384xf32> to vector<8x128xf32>
    %338 = arith.addf %336, %337 : vector<8x128xf32>
    %339 = arith.negf %338 : vector<8x128xf32>
    %340 = math.exp %339 : vector<8x128xf32>
    %cst_112 = arith.constant 1.000000e+00 : f32
    %341 = vector.broadcast %cst_112 : f32 to vector<8x128xf32>
    %342 = arith.addf %341, %340 : vector<8x128xf32>
    %343 = arith.divf %341, %342 : vector<8x128xf32>
    %344 = vector.extract_strided_slice %334 {offsets = [0, 128], sizes = [8, 128], strides = [1, 1]} : vector<8x384xf32> to vector<8x128xf32>
    %345 = vector.extract_strided_slice %333 {offsets = [0, 128], sizes = [8, 128], strides = [1, 1]} : vector<8x384xf32> to vector<8x128xf32>
    %346 = arith.addf %344, %345 : vector<8x128xf32>
    %347 = arith.negf %346 : vector<8x128xf32>
    %348 = math.exp %347 : vector<8x128xf32>
    %cst_113 = arith.constant 1.000000e+00 : f32
    %349 = vector.broadcast %cst_113 : f32 to vector<8x128xf32>
    %350 = arith.addf %349, %348 : vector<8x128xf32>
    %351 = arith.divf %349, %350 : vector<8x128xf32>
    %352 = vector.extract_strided_slice %334 {offsets = [0, 256], sizes = [8, 128], strides = [1, 1]} : vector<8x384xf32> to vector<8x128xf32>
    %353 = vector.extract_strided_slice %333 {offsets = [0, 256], sizes = [8, 128], strides = [1, 1]} : vector<8x384xf32> to vector<8x128xf32>
    %354 = vector.broadcast %14 : vector<1x128xf32> to vector<8x128xf32>
    %355 = arith.addf %353, %354 : vector<8x128xf32>
    %356 = arith.mulf %343, %355 : vector<8x128xf32>
    %357 = arith.addf %352, %356 : vector<8x128xf32>
    %358 = math.tanh %357 : vector<8x128xf32>
    %cst_114 = arith.constant 1.000000e+00 : f32
    %359 = vector.broadcast %cst_114 : f32 to vector<8x128xf32>
    %360 = arith.subf %359, %351 : vector<8x128xf32>
    %361 = arith.mulf %360, %358 : vector<8x128xf32>
    %362 = arith.mulf %351, %296 : vector<8x128xf32>
    %363 = arith.addf %361, %362 : vector<8x128xf32>
    %364 = arith.subf %363, %296 : vector<8x128xf32>
    %365 = arith.mulf %335, %364 : vector<8x128xf32>
    %366 = arith.addf %296, %365 : vector<8x128xf32>
    %c0_115 = arith.constant 0 : index
    %c0_116 = arith.constant 0 : index
    %367 = vector.load %arg5[%c0_115, %c0_116] : memref<128x384xf32, #tpu.memory_space<vmem>>, vector<128x384xf32>
    %cst_117 = arith.constant dense<0.000000e+00> : vector<8x384xf32>
    %368 = tpu.matmul %331, %367, %cst_117 {dimension_numbers = #tpu.dot_dimension_numbers<[1], [0], [0], [1], [0, 0, 1, 1], [], []>} : vector<8x128xf32>, vector<128x384xf32>, vector<8x384xf32> -> vector<8x384xf32>
    %c40_118 = arith.constant 40 : index
    %c0_119 = arith.constant 0 : index
    %369 = vector.load %arg13[%c40_118, %c0_119] : memref<64x384xf32, #tpu.memory_space<vmem>>, vector<8x384xf32>
    %c40_120 = arith.constant 40 : index
    %c0_121 = arith.constant 0 : index
    %370 = vector.load %arg1[%c40_120, %c0_121] : memref<64x128xf32, #tpu.memory_space<vmem>>, vector<8x128xf32>
    %371 = vector.extract_strided_slice %369 {offsets = [0, 0], sizes = [8, 128], strides = [1, 1]} : vector<8x384xf32> to vector<8x128xf32>
    %372 = vector.extract_strided_slice %368 {offsets = [0, 0], sizes = [8, 128], strides = [1, 1]} : vector<8x384xf32> to vector<8x128xf32>
    %373 = arith.addf %371, %372 : vector<8x128xf32>
    %374 = arith.negf %373 : vector<8x128xf32>
    %375 = math.exp %374 : vector<8x128xf32>
    %cst_122 = arith.constant 1.000000e+00 : f32
    %376 = vector.broadcast %cst_122 : f32 to vector<8x128xf32>
    %377 = arith.addf %376, %375 : vector<8x128xf32>
    %378 = arith.divf %376, %377 : vector<8x128xf32>
    %379 = vector.extract_strided_slice %369 {offsets = [0, 128], sizes = [8, 128], strides = [1, 1]} : vector<8x384xf32> to vector<8x128xf32>
    %380 = vector.extract_strided_slice %368 {offsets = [0, 128], sizes = [8, 128], strides = [1, 1]} : vector<8x384xf32> to vector<8x128xf32>
    %381 = arith.addf %379, %380 : vector<8x128xf32>
    %382 = arith.negf %381 : vector<8x128xf32>
    %383 = math.exp %382 : vector<8x128xf32>
    %cst_123 = arith.constant 1.000000e+00 : f32
    %384 = vector.broadcast %cst_123 : f32 to vector<8x128xf32>
    %385 = arith.addf %384, %383 : vector<8x128xf32>
    %386 = arith.divf %384, %385 : vector<8x128xf32>
    %387 = vector.extract_strided_slice %369 {offsets = [0, 256], sizes = [8, 128], strides = [1, 1]} : vector<8x384xf32> to vector<8x128xf32>
    %388 = vector.extract_strided_slice %368 {offsets = [0, 256], sizes = [8, 128], strides = [1, 1]} : vector<8x384xf32> to vector<8x128xf32>
    %389 = vector.broadcast %13 : vector<1x128xf32> to vector<8x128xf32>
    %390 = arith.addf %388, %389 : vector<8x128xf32>
    %391 = arith.mulf %378, %390 : vector<8x128xf32>
    %392 = arith.addf %387, %391 : vector<8x128xf32>
    %393 = math.tanh %392 : vector<8x128xf32>
    %cst_124 = arith.constant 1.000000e+00 : f32
    %394 = vector.broadcast %cst_124 : f32 to vector<8x128xf32>
    %395 = arith.subf %394, %386 : vector<8x128xf32>
    %396 = arith.mulf %395, %393 : vector<8x128xf32>
    %397 = arith.mulf %386, %331 : vector<8x128xf32>
    %398 = arith.addf %396, %397 : vector<8x128xf32>
    %399 = arith.subf %398, %331 : vector<8x128xf32>
    %400 = arith.mulf %370, %399 : vector<8x128xf32>
    %401 = arith.addf %331, %400 : vector<8x128xf32>
    %c0_125 = arith.constant 0 : index
    %c0_126 = arith.constant 0 : index
    %402 = vector.load %arg9[%c0_125, %c0_126] : memref<128x384xf32, #tpu.memory_space<vmem>>, vector<128x384xf32>
    %cst_127 = arith.constant dense<0.000000e+00> : vector<8x384xf32>
    %403 = tpu.matmul %366, %402, %cst_127 {dimension_numbers = #tpu.dot_dimension_numbers<[1], [0], [0], [1], [0, 0, 1, 1], [], []>} : vector<8x128xf32>, vector<128x384xf32>, vector<8x384xf32> -> vector<8x384xf32>
    %c16_128 = arith.constant 16 : index
    %c0_129 = arith.constant 0 : index
    %404 = vector.load %arg14[%c16_128, %c0_129] : memref<64x384xf32, #tpu.memory_space<vmem>>, vector<8x384xf32>
    %c16_130 = arith.constant 16 : index
    %c0_131 = arith.constant 0 : index
    %405 = vector.load %arg1[%c16_130, %c0_131] : memref<64x128xf32, #tpu.memory_space<vmem>>, vector<8x128xf32>
    %406 = vector.extract_strided_slice %404 {offsets = [0, 0], sizes = [8, 128], strides = [1, 1]} : vector<8x384xf32> to vector<8x128xf32>
    %407 = vector.extract_strided_slice %403 {offsets = [0, 0], sizes = [8, 128], strides = [1, 1]} : vector<8x384xf32> to vector<8x128xf32>
    %408 = arith.addf %406, %407 : vector<8x128xf32>
    %409 = arith.negf %408 : vector<8x128xf32>
    %410 = math.exp %409 : vector<8x128xf32>
    %cst_132 = arith.constant 1.000000e+00 : f32
    %411 = vector.broadcast %cst_132 : f32 to vector<8x128xf32>
    %412 = arith.addf %411, %410 : vector<8x128xf32>
    %413 = arith.divf %411, %412 : vector<8x128xf32>
    %414 = vector.extract_strided_slice %404 {offsets = [0, 128], sizes = [8, 128], strides = [1, 1]} : vector<8x384xf32> to vector<8x128xf32>
    %415 = vector.extract_strided_slice %403 {offsets = [0, 128], sizes = [8, 128], strides = [1, 1]} : vector<8x384xf32> to vector<8x128xf32>
    %416 = arith.addf %414, %415 : vector<8x128xf32>
    %417 = arith.negf %416 : vector<8x128xf32>
    %418 = math.exp %417 : vector<8x128xf32>
    %cst_133 = arith.constant 1.000000e+00 : f32
    %419 = vector.broadcast %cst_133 : f32 to vector<8x128xf32>
    %420 = arith.addf %419, %418 : vector<8x128xf32>
    %421 = arith.divf %419, %420 : vector<8x128xf32>
    %422 = vector.extract_strided_slice %404 {offsets = [0, 256], sizes = [8, 128], strides = [1, 1]} : vector<8x384xf32> to vector<8x128xf32>
    %423 = vector.extract_strided_slice %403 {offsets = [0, 256], sizes = [8, 128], strides = [1, 1]} : vector<8x384xf32> to vector<8x128xf32>
    %424 = vector.broadcast %14 : vector<1x128xf32> to vector<8x128xf32>
    %425 = arith.addf %423, %424 : vector<8x128xf32>
    %426 = arith.mulf %413, %425 : vector<8x128xf32>
    %427 = arith.addf %422, %426 : vector<8x128xf32>
    %428 = math.tanh %427 : vector<8x128xf32>
    %cst_134 = arith.constant 1.000000e+00 : f32
    %429 = vector.broadcast %cst_134 : f32 to vector<8x128xf32>
    %430 = arith.subf %429, %421 : vector<8x128xf32>
    %431 = arith.mulf %430, %428 : vector<8x128xf32>
    %432 = arith.mulf %421, %366 : vector<8x128xf32>
    %433 = arith.addf %431, %432 : vector<8x128xf32>
    %434 = arith.subf %433, %366 : vector<8x128xf32>
    %435 = arith.mulf %405, %434 : vector<8x128xf32>
    %436 = arith.addf %366, %435 : vector<8x128xf32>
    %c0_135 = arith.constant 0 : index
    %c0_136 = arith.constant 0 : index
    %437 = vector.load %arg5[%c0_135, %c0_136] : memref<128x384xf32, #tpu.memory_space<vmem>>, vector<128x384xf32>
    %cst_137 = arith.constant dense<0.000000e+00> : vector<8x384xf32>
    %438 = tpu.matmul %401, %437, %cst_137 {dimension_numbers = #tpu.dot_dimension_numbers<[1], [0], [0], [1], [0, 0, 1, 1], [], []>} : vector<8x128xf32>, vector<128x384xf32>, vector<8x384xf32> -> vector<8x384xf32>
    %c48_138 = arith.constant 48 : index
    %c0_139 = arith.constant 0 : index
    %439 = vector.load %arg13[%c48_138, %c0_139] : memref<64x384xf32, #tpu.memory_space<vmem>>, vector<8x384xf32>
    %c48_140 = arith.constant 48 : index
    %c0_141 = arith.constant 0 : index
    %440 = vector.load %arg1[%c48_140, %c0_141] : memref<64x128xf32, #tpu.memory_space<vmem>>, vector<8x128xf32>
    %441 = vector.extract_strided_slice %439 {offsets = [0, 0], sizes = [8, 128], strides = [1, 1]} : vector<8x384xf32> to vector<8x128xf32>
    %442 = vector.extract_strided_slice %438 {offsets = [0, 0], sizes = [8, 128], strides = [1, 1]} : vector<8x384xf32> to vector<8x128xf32>
    %443 = arith.addf %441, %442 : vector<8x128xf32>
    %444 = arith.negf %443 : vector<8x128xf32>
    %445 = math.exp %444 : vector<8x128xf32>
    %cst_142 = arith.constant 1.000000e+00 : f32
    %446 = vector.broadcast %cst_142 : f32 to vector<8x128xf32>
    %447 = arith.addf %446, %445 : vector<8x128xf32>
    %448 = arith.divf %446, %447 : vector<8x128xf32>
    %449 = vector.extract_strided_slice %439 {offsets = [0, 128], sizes = [8, 128], strides = [1, 1]} : vector<8x384xf32> to vector<8x128xf32>
    %450 = vector.extract_strided_slice %438 {offsets = [0, 128], sizes = [8, 128], strides = [1, 1]} : vector<8x384xf32> to vector<8x128xf32>
    %451 = arith.addf %449, %450 : vector<8x128xf32>
    %452 = arith.negf %451 : vector<8x128xf32>
    %453 = math.exp %452 : vector<8x128xf32>
    %cst_143 = arith.constant 1.000000e+00 : f32
    %454 = vector.broadcast %cst_143 : f32 to vector<8x128xf32>
    %455 = arith.addf %454, %453 : vector<8x128xf32>
    %456 = arith.divf %454, %455 : vector<8x128xf32>
    %457 = vector.extract_strided_slice %439 {offsets = [0, 256], sizes = [8, 128], strides = [1, 1]} : vector<8x384xf32> to vector<8x128xf32>
    %458 = vector.extract_strided_slice %438 {offsets = [0, 256], sizes = [8, 128], strides = [1, 1]} : vector<8x384xf32> to vector<8x128xf32>
    %459 = vector.broadcast %13 : vector<1x128xf32> to vector<8x128xf32>
    %460 = arith.addf %458, %459 : vector<8x128xf32>
    %461 = arith.mulf %448, %460 : vector<8x128xf32>
    %462 = arith.addf %457, %461 : vector<8x128xf32>
    %463 = math.tanh %462 : vector<8x128xf32>
    %cst_144 = arith.constant 1.000000e+00 : f32
    %464 = vector.broadcast %cst_144 : f32 to vector<8x128xf32>
    %465 = arith.subf %464, %456 : vector<8x128xf32>
    %466 = arith.mulf %465, %463 : vector<8x128xf32>
    %467 = arith.mulf %456, %401 : vector<8x128xf32>
    %468 = arith.addf %466, %467 : vector<8x128xf32>
    %469 = arith.subf %468, %401 : vector<8x128xf32>
    %470 = arith.mulf %440, %469 : vector<8x128xf32>
    %471 = arith.addf %401, %470 : vector<8x128xf32>
    %c0_145 = arith.constant 0 : index
    %c0_146 = arith.constant 0 : index
    %472 = vector.load %arg9[%c0_145, %c0_146] : memref<128x384xf32, #tpu.memory_space<vmem>>, vector<128x384xf32>
    %cst_147 = arith.constant dense<0.000000e+00> : vector<8x384xf32>
    %473 = tpu.matmul %436, %472, %cst_147 {dimension_numbers = #tpu.dot_dimension_numbers<[1], [0], [0], [1], [0, 0, 1, 1], [], []>} : vector<8x128xf32>, vector<128x384xf32>, vector<8x384xf32> -> vector<8x384xf32>
    %c8_148 = arith.constant 8 : index
    %c0_149 = arith.constant 0 : index
    %474 = vector.load %arg14[%c8_148, %c0_149] : memref<64x384xf32, #tpu.memory_space<vmem>>, vector<8x384xf32>
    %c8_150 = arith.constant 8 : index
    %c0_151 = arith.constant 0 : index
    %475 = vector.load %arg1[%c8_150, %c0_151] : memref<64x128xf32, #tpu.memory_space<vmem>>, vector<8x128xf32>
    %476 = vector.extract_strided_slice %474 {offsets = [0, 0], sizes = [8, 128], strides = [1, 1]} : vector<8x384xf32> to vector<8x128xf32>
    %477 = vector.extract_strided_slice %473 {offsets = [0, 0], sizes = [8, 128], strides = [1, 1]} : vector<8x384xf32> to vector<8x128xf32>
    %478 = arith.addf %476, %477 : vector<8x128xf32>
    %479 = arith.negf %478 : vector<8x128xf32>
    %480 = math.exp %479 : vector<8x128xf32>
    %cst_152 = arith.constant 1.000000e+00 : f32
    %481 = vector.broadcast %cst_152 : f32 to vector<8x128xf32>
    %482 = arith.addf %481, %480 : vector<8x128xf32>
    %483 = arith.divf %481, %482 : vector<8x128xf32>
    %484 = vector.extract_strided_slice %474 {offsets = [0, 128], sizes = [8, 128], strides = [1, 1]} : vector<8x384xf32> to vector<8x128xf32>
    %485 = vector.extract_strided_slice %473 {offsets = [0, 128], sizes = [8, 128], strides = [1, 1]} : vector<8x384xf32> to vector<8x128xf32>
    %486 = arith.addf %484, %485 : vector<8x128xf32>
    %487 = arith.negf %486 : vector<8x128xf32>
    %488 = math.exp %487 : vector<8x128xf32>
    %cst_153 = arith.constant 1.000000e+00 : f32
    %489 = vector.broadcast %cst_153 : f32 to vector<8x128xf32>
    %490 = arith.addf %489, %488 : vector<8x128xf32>
    %491 = arith.divf %489, %490 : vector<8x128xf32>
    %492 = vector.extract_strided_slice %474 {offsets = [0, 256], sizes = [8, 128], strides = [1, 1]} : vector<8x384xf32> to vector<8x128xf32>
    %493 = vector.extract_strided_slice %473 {offsets = [0, 256], sizes = [8, 128], strides = [1, 1]} : vector<8x384xf32> to vector<8x128xf32>
    %494 = vector.broadcast %14 : vector<1x128xf32> to vector<8x128xf32>
    %495 = arith.addf %493, %494 : vector<8x128xf32>
    %496 = arith.mulf %483, %495 : vector<8x128xf32>
    %497 = arith.addf %492, %496 : vector<8x128xf32>
    %498 = math.tanh %497 : vector<8x128xf32>
    %cst_154 = arith.constant 1.000000e+00 : f32
    %499 = vector.broadcast %cst_154 : f32 to vector<8x128xf32>
    %500 = arith.subf %499, %491 : vector<8x128xf32>
    %501 = arith.mulf %500, %498 : vector<8x128xf32>
    %502 = arith.mulf %491, %436 : vector<8x128xf32>
    %503 = arith.addf %501, %502 : vector<8x128xf32>
    %504 = arith.subf %503, %436 : vector<8x128xf32>
    %505 = arith.mulf %475, %504 : vector<8x128xf32>
    %506 = arith.addf %436, %505 : vector<8x128xf32>
    %c0_155 = arith.constant 0 : index
    %c0_156 = arith.constant 0 : index
    %507 = vector.load %arg5[%c0_155, %c0_156] : memref<128x384xf32, #tpu.memory_space<vmem>>, vector<128x384xf32>
    %cst_157 = arith.constant dense<0.000000e+00> : vector<8x384xf32>
    %508 = tpu.matmul %471, %507, %cst_157 {dimension_numbers = #tpu.dot_dimension_numbers<[1], [0], [0], [1], [0, 0, 1, 1], [], []>} : vector<8x128xf32>, vector<128x384xf32>, vector<8x384xf32> -> vector<8x384xf32>
    %c56_158 = arith.constant 56 : index
    %c0_159 = arith.constant 0 : index
    %509 = vector.load %arg13[%c56_158, %c0_159] : memref<64x384xf32, #tpu.memory_space<vmem>>, vector<8x384xf32>
    %c56_160 = arith.constant 56 : index
    %c0_161 = arith.constant 0 : index
    %510 = vector.load %arg1[%c56_160, %c0_161] : memref<64x128xf32, #tpu.memory_space<vmem>>, vector<8x128xf32>
    %511 = vector.extract_strided_slice %509 {offsets = [0, 0], sizes = [8, 128], strides = [1, 1]} : vector<8x384xf32> to vector<8x128xf32>
    %512 = vector.extract_strided_slice %508 {offsets = [0, 0], sizes = [8, 128], strides = [1, 1]} : vector<8x384xf32> to vector<8x128xf32>
    %513 = arith.addf %511, %512 : vector<8x128xf32>
    %514 = arith.negf %513 : vector<8x128xf32>
    %515 = math.exp %514 : vector<8x128xf32>
    %cst_162 = arith.constant 1.000000e+00 : f32
    %516 = vector.broadcast %cst_162 : f32 to vector<8x128xf32>
    %517 = arith.addf %516, %515 : vector<8x128xf32>
    %518 = arith.divf %516, %517 : vector<8x128xf32>
    %519 = vector.extract_strided_slice %509 {offsets = [0, 128], sizes = [8, 128], strides = [1, 1]} : vector<8x384xf32> to vector<8x128xf32>
    %520 = vector.extract_strided_slice %508 {offsets = [0, 128], sizes = [8, 128], strides = [1, 1]} : vector<8x384xf32> to vector<8x128xf32>
    %521 = arith.addf %519, %520 : vector<8x128xf32>
    %522 = arith.negf %521 : vector<8x128xf32>
    %523 = math.exp %522 : vector<8x128xf32>
    %cst_163 = arith.constant 1.000000e+00 : f32
    %524 = vector.broadcast %cst_163 : f32 to vector<8x128xf32>
    %525 = arith.addf %524, %523 : vector<8x128xf32>
    %526 = arith.divf %524, %525 : vector<8x128xf32>
    %527 = vector.extract_strided_slice %509 {offsets = [0, 256], sizes = [8, 128], strides = [1, 1]} : vector<8x384xf32> to vector<8x128xf32>
    %528 = vector.extract_strided_slice %508 {offsets = [0, 256], sizes = [8, 128], strides = [1, 1]} : vector<8x384xf32> to vector<8x128xf32>
    %529 = vector.broadcast %13 : vector<1x128xf32> to vector<8x128xf32>
    %530 = arith.addf %528, %529 : vector<8x128xf32>
    %531 = arith.mulf %518, %530 : vector<8x128xf32>
    %532 = arith.addf %527, %531 : vector<8x128xf32>
    %533 = math.tanh %532 : vector<8x128xf32>
    %cst_164 = arith.constant 1.000000e+00 : f32
    %534 = vector.broadcast %cst_164 : f32 to vector<8x128xf32>
    %535 = arith.subf %534, %526 : vector<8x128xf32>
    %536 = arith.mulf %535, %533 : vector<8x128xf32>
    %537 = arith.mulf %526, %471 : vector<8x128xf32>
    %538 = arith.addf %536, %537 : vector<8x128xf32>
    %539 = arith.subf %538, %471 : vector<8x128xf32>
    %540 = arith.mulf %510, %539 : vector<8x128xf32>
    %541 = arith.addf %471, %540 : vector<8x128xf32>
    %c0_165 = arith.constant 0 : index
    %c0_166 = arith.constant 0 : index
    %542 = vector.load %arg9[%c0_165, %c0_166] : memref<128x384xf32, #tpu.memory_space<vmem>>, vector<128x384xf32>
    %cst_167 = arith.constant dense<0.000000e+00> : vector<8x384xf32>
    %543 = tpu.matmul %506, %542, %cst_167 {dimension_numbers = #tpu.dot_dimension_numbers<[1], [0], [0], [1], [0, 0, 1, 1], [], []>} : vector<8x128xf32>, vector<128x384xf32>, vector<8x384xf32> -> vector<8x384xf32>
    %c0_168 = arith.constant 0 : index
    %c0_169 = arith.constant 0 : index
    %544 = vector.load %arg14[%c0_168, %c0_169] : memref<64x384xf32, #tpu.memory_space<vmem>>, vector<8x384xf32>
    %c0_170 = arith.constant 0 : index
    %c0_171 = arith.constant 0 : index
    %545 = vector.load %arg1[%c0_170, %c0_171] : memref<64x128xf32, #tpu.memory_space<vmem>>, vector<8x128xf32>
    %546 = vector.extract_strided_slice %544 {offsets = [0, 0], sizes = [8, 128], strides = [1, 1]} : vector<8x384xf32> to vector<8x128xf32>
    %547 = vector.extract_strided_slice %543 {offsets = [0, 0], sizes = [8, 128], strides = [1, 1]} : vector<8x384xf32> to vector<8x128xf32>
    %548 = arith.addf %546, %547 : vector<8x128xf32>
    %549 = arith.negf %548 : vector<8x128xf32>
    %550 = math.exp %549 : vector<8x128xf32>
    %cst_172 = arith.constant 1.000000e+00 : f32
    %551 = vector.broadcast %cst_172 : f32 to vector<8x128xf32>
    %552 = arith.addf %551, %550 : vector<8x128xf32>
    %553 = arith.divf %551, %552 : vector<8x128xf32>
    %554 = vector.extract_strided_slice %544 {offsets = [0, 128], sizes = [8, 128], strides = [1, 1]} : vector<8x384xf32> to vector<8x128xf32>
    %555 = vector.extract_strided_slice %543 {offsets = [0, 128], sizes = [8, 128], strides = [1, 1]} : vector<8x384xf32> to vector<8x128xf32>
    %556 = arith.addf %554, %555 : vector<8x128xf32>
    %557 = arith.negf %556 : vector<8x128xf32>
    %558 = math.exp %557 : vector<8x128xf32>
    %cst_173 = arith.constant 1.000000e+00 : f32
    %559 = vector.broadcast %cst_173 : f32 to vector<8x128xf32>
    %560 = arith.addf %559, %558 : vector<8x128xf32>
    %561 = arith.divf %559, %560 : vector<8x128xf32>
    %562 = vector.extract_strided_slice %544 {offsets = [0, 256], sizes = [8, 128], strides = [1, 1]} : vector<8x384xf32> to vector<8x128xf32>
    %563 = vector.extract_strided_slice %543 {offsets = [0, 256], sizes = [8, 128], strides = [1, 1]} : vector<8x384xf32> to vector<8x128xf32>
    %564 = vector.broadcast %14 : vector<1x128xf32> to vector<8x128xf32>
    %565 = arith.addf %563, %564 : vector<8x128xf32>
    %566 = arith.mulf %553, %565 : vector<8x128xf32>
    %567 = arith.addf %562, %566 : vector<8x128xf32>
    %568 = math.tanh %567 : vector<8x128xf32>
    %cst_174 = arith.constant 1.000000e+00 : f32
    %569 = vector.broadcast %cst_174 : f32 to vector<8x128xf32>
    %570 = arith.subf %569, %561 : vector<8x128xf32>
    %571 = arith.mulf %570, %568 : vector<8x128xf32>
    %572 = arith.mulf %561, %506 : vector<8x128xf32>
    %573 = arith.addf %571, %572 : vector<8x128xf32>
    %574 = arith.subf %573, %506 : vector<8x128xf32>
    %575 = arith.mulf %545, %574 : vector<8x128xf32>
    %576 = arith.addf %506, %575 : vector<8x128xf32>
    %c0_175 = arith.constant 0 : index
    %c0_176 = arith.constant 0 : index
    %c0_177 = arith.constant 0 : index
    %577 = vector.load %arg12[%c0_175, %c0_176, %c0_177] : memref<2x8x128xf32, #tpu.memory_space<vmem>>, vector<1x8x128xf32>
    %578 = vector.shape_cast %577 : vector<1x8x128xf32> to vector<8x128xf32>
    %579 = vector.shape_cast %541 : vector<8x128xf32> to vector<1x8x128xf32>
    tpu.vector_store %arg12[%c0_175, %c0_176, %c0_177], %579 {strides = array<i32>} : memref<2x8x128xf32, #tpu.memory_space<vmem>>, vector<1x8x128xf32>,
    %c1 = arith.constant 1 : index
    %c0_178 = arith.constant 0 : index
    %c0_179 = arith.constant 0 : index
    %580 = vector.load %arg12[%c1, %c0_178, %c0_179] : memref<2x8x128xf32, #tpu.memory_space<vmem>>, vector<1x8x128xf32>
    %581 = vector.shape_cast %580 : vector<1x8x128xf32> to vector<8x128xf32>
    %582 = vector.shape_cast %576 : vector<8x128xf32> to vector<1x8x128xf32>
    tpu.vector_store %arg12[%c1, %c0_178, %c0_179], %582 {strides = array<i32>} : memref<2x8x128xf32, #tpu.memory_space<vmem>>, vector<1x8x128xf32>,
    return
  }
}

</mosaic_0001>

<bundles_post_ra>
// kernel: tpu_custom_call.1
= control target key start
LH: loop header
LB: loop body
LE: loop exit
PB: predicated region body
PF: predicated region fallthrough
CT: control target
= control target key end

     0   :  { %17 = vsyncpa [#allocation5], 0  ;;  %s5119_s0 = inlined_call_operand.vmem [shape: f32[64,16], index: 0, kind: input, shape index: {}]   ;;  %s5120_s1 = inlined_call_operand.vmem [shape: f32[64,128], index: 1, kind: input, shape index: {}]   ;;  %s5121_s2 = inlined_call_operand.vmem [shape: f32[8,128], index: 2, kind: input, shape index: {}]   ;;  %s5122_s3 = inlined_call_operand.vmem [shape: f32[8,128], index: 3, kind: input, shape index: {}]   ;;  %s5123_s4 = inlined_call_operand.hbm [shape: f32[16,384], index: 4, kind: input, shape index: {}]   ;;  %s5124_s5 = inlined_call_operand.hbm [shape: f32[128,384], index: 5, kind: input, shape index: {}]   ;;  %s5125_s6 = inlined_call_operand.vmem [shape: f32[1,384], index: 6, kind: input, shape index: {}]   ;;  %s5126_s7 = inlined_call_operand.hbm [shape: f32[1,128], index: 7, kind: input, shape index: {}]   ;;  %s5127_s8 = inlined_call_operand.hbm [shape: f32[16,384], index: 8, kind: input, shape index: {}]   ;;  %s5128_s9 = inlined_call_operand.hbm [shape: f32[128,384], index: 9, kind: input, shape index: {}]   ;;  %s5129_s10 = inlined_call_operand.vmem [shape: f32[1,384], index: 10, kind: input, shape index: {}]   ;;  %s5130_s11 = inlined_call_operand.vmem [shape: f32[1,128], index: 11, kind: input, shape index: {}]   ;;  %s5131_s12 = inlined_call_operand.hbm [shape: f32[2,8,128], index: 12, kind: output, shape index: {}]  }
   0x1   :  { %18 = vsyncpa [#allocation8], 0 }
   0x2   :  { %19 = vsyncpa [#allocation11], 0 }
   0x3   :  { %20 = vsyncpa [#allocation6], 0  ;;  %s46_s23 = sshll.u32 %s5124_s5, 4  ;;  %s3041_s24 = smov [#allocation7]   ;;  %s47_s23 = int_to_ptr.hbm [resolvable:$true] %s46_s23 }
   0x4   :  { %s48_s25 = sshll.u32 %s3041_s24, 4  ;;  %s72_s28 = sshll.u32 %s5127_s8, 4  ;;  %s49_s25 = int_to_ptr.vmem [resolvable:$true] %s48_s25  ;;  %s73_s28 = int_to_ptr.hbm [resolvable:$true] %s72_s28 }
   0x5   :  { %s3042_s29 = smov 384   ;;  %s3043_s30 = smov 24  }
   0x6   :  { %54 = dma.hbm_to_vmem [thread:$0]  %s47_s23, 6144, %s49_s25, [#allocation8], %s3042_s29, %s3042_s29, %s3043_s30  }
   0x7   :  { %s3044_s13 = smov [#allocation10]   ;;  %s33_s17 = sshll.u32 %s5123_s4, 4  ;;  %s34_s17 = int_to_ptr.hbm [resolvable:$true] %s33_s17 }
   0x8   :  { %s74_s14 = sshll.u32 %s3044_s13, 4  ;;  %s62_s19 = sshll.u32 %s5126_s7, 4  ;;  %s75_s14 = int_to_ptr.vmem [resolvable:$true] %s74_s14  ;;  %s63_s19 = int_to_ptr.hbm [resolvable:$true] %s62_s19 }
   0x9   :  { %80 = dma.hbm_to_vmem [thread:$0]  %s73_s28, 768, %s75_s14, [#allocation11], %s3042_s29, %s3042_s29, %s3043_s30  }
   0xa   :  { %s3045_s20 = smov [#allocation4]   ;;  %s3046_s8 = smov [#allocation9]  }
   0xb   :  { %s35_s21 = sshll.u32 %s3045_s20, 4  ;;  %s64_s22 = sshll.u32 %s3046_s8, 4  ;;  %s36_s21 = int_to_ptr.vmem [resolvable:$true] %s35_s21  ;;  %s65_s22 = int_to_ptr.vmem [resolvable:$true] %s64_s22 }
   0xc   :  { %41 = dma.hbm_to_vmem [thread:$0]  %s34_s17, 768, %s36_s21, [#allocation5], %s3042_s29, %s3042_s29, %s3043_s30  }
   0xd   :  { %s85_s25 = sshll.u32 %s5128_s9, 4  ;;  %s3047_s4 = smov [#allocation12]   ;;  %s86_s25 = int_to_ptr.hbm [resolvable:$true] %s85_s25 }
   0xe   :  { %67 = dma.hbm_to_vmem [thread:$0]  %s63_s19, 16, %s65_s22, [#allocation8]  }
   0xf   :  { %s87_s26 = sshll.u32 %s3047_s4, 4  ;;  %s88_s26 = int_to_ptr.vmem [resolvable:$true] %s87_s26 }
  0x10   :  { %93 = dma.hbm_to_vmem [thread:$0]  %s86_s25, 6144, %s88_s26, [#allocation11], %s3042_s29, %s3042_s29, %s3043_s30  }
  0x11   :  { %3033 = dma.done.wait [#allocation5], 768  }
  0x12   :  { %3034 = vsyncadd [#allocation5], 4294966528 }
  0x13   :  { %3035 = dma.done.wait [#allocation8], 6160  }
  0x14   :  { %3036 = vsyncadd [#allocation8], 4294961136 }
  0x15   :  { %3037 = dma.done.wait [#allocation11], 6912  }
  0x16   :  { %3038 = vsyncadd [#allocation11], 4294960384  ;;  %v129_v0 = vld [vmem:[#allocation4 + $0x18] sm:$0xff]  ;;  %v130_v1 = vld [vmem:[#allocation4 + $0x20] sm:$0xff]  ;;  %vm140_vm0 = vcmask 130048   ;;  %s3048_s26 = smov [#allocation13]  }
  0x17   :  { %v131_v2 = vld [vmem:[#allocation4 + $0x28] sm:$0xff]  ;;  %179 = vmatpush.msra.mxu0 %v129_v0  ;;  %220 = vmatpush.msra.mxu1 %v130_v1  ;;  %v126_v4 = vld [vmem:[#allocation4] sm:$0xff]  ;;  %v128_v6 = vld [vmem:[#allocation4 + $0x10] sm:$0xff]  ;;  %s2418_s7 = sshll.u32 %s3048_s26, 4  ;;  %s2420_s28 = sshll.u32 %s5131_s12, 4  ;;  %s2419_s7 = int_to_ptr.vmem [resolvable:$true] %s2418_s7  ;;  %s2421_s28 = int_to_ptr.hbm [resolvable:$true] %s2420_s28 }
  0x18   :  { %v315_v3 = vld [vmem:[#allocation10 + $0x18] sm:$0xff]  ;;  %261 = vmatpush.msra.mxu2 %v131_v2  ;;  %v312_v7 = vld [vmem:[#allocation10] sm:$0xff]  ;;  %v3134_v8 = vld [vmem:[%s5119_s0] sm:$0xff]  ;;  %s3049_s13 = smov 128   ;;  %s3050_s14 = smov 8  }
  0x19   :  { %v127_v5 = vld [vmem:[#allocation4 + $0x8] sm:$0xff]  ;;  %340 = vmatpush.msra.mxu3 %v315_v3  ;;  %180 = vmatpush.msra.mxu0 %v126_v4  ;;  %v316_v9 = vld [vmem:[#allocation10 + $0x20] sm:$0xff]  ;;  %v317_v10 = vld [vmem:[#allocation10 + $0x28] sm:$0xff] }
  0x1a   :  { %221 = vmatpush.msra.mxu1 %v127_v5  ;;  %262 = vmatpush.msra.mxu2 %v128_v6  ;;  %v3140_v11 = vld [vmem:[#allocation7 + $0x170] sm:$0xff]  ;;  %v3142_v12 = vld [vmem:[#allocation7 + $0x168] sm:$0xff]  ;;  %v3148_v14 = vld [vmem:[#allocation7 + $0x158] sm:$0xff] }
  0x1b   :  { %341 = vmatpush.msra.mxu3 %v312_v7  ;;  %2435 = vmatmul.msk.f32.vlgmr.msra.gmra.mxu0 %vm140_vm0, %v3134_v8  ;;  %v313_v13 = vld [vmem:[#allocation10 + $0x8] sm:$0xff]  ;;  %v3154_v16 = vld [vmem:[#allocation7 + $0x140] sm:$0xff]  ;;  %v3156_v17 = vld [vmem:[#allocation7 + $0x138] sm:$0xff] }
  0x1c   :  { %2443 = vmatmul.msk.f32.vlgmr.msra.gmra.mxu1 %vm140_vm0, %v3134_v8  ;;  %2451 = vmatmul.msk.f32.vlgmr.msra.gmra.mxu2 %vm140_vm0, %v3134_v8  ;;  %v3150_v15 = vld [vmem:[#allocation7 + $0x150] sm:$0xff]  ;;  %v3161_v18 = vld [vmem:[%s5119_s0 + $0x8] sm:$0xff]  ;;  %v3166_v19 = vld [vmem:[#allocation7 + $0x128] sm:$0xff] }
  0x1d   :  { %2459 = vmatmul.msk.f32.vlgmr.msra.gmra.mxu3 %vm140_vm0, %v3134_v8  ;;  %381 = vmatpush.msrb.mxu0 %v316_v9  ;;  %v3169_v20 = vld [vmem:[#allocation7 + $0x120] sm:$0xff]  ;;  %v3179_v21 = vld [vmem:[#allocation7 + $0x110] sm:$0xff]  ;;  %v3181_v22 = vld [vmem:[#allocation7 + $0x108] sm:$0xff] }
  0x1e   :  { %422 = vmatpush.msrb.mxu1 %v317_v10  ;;  %545 = vmatpush.msrb.mxu3 %v3140_v11  ;;  %v3185_v23 = vld [vmem:[#allocation7 + $0xf8] sm:$0xff]  ;;  %v3187_v24 = vld [vmem:[#allocation7 + $0xf0] sm:$0xff]  ;;  %v3194_v25 = vld [vmem:[%s5119_s0 + $0x10] sm:$0xff] }
  0x1f   :  { %525 = vmatpush.msrb.mxu2 %v3142_v12  ;;  %382 = vmatpush.msrb.mxu0 %v313_v13  ;;  %v3198_v26 = vld [vmem:[#allocation7 + $0xe0] sm:$0xff]  ;;  %v3200_v27 = vld [vmem:[#allocation7 + $0xd8] sm:$0xff]  ;;  %v3210_v28 = vld [vmem:[#allocation7 + $0xc8] sm:$0xff] }
  0x20   :  { %546 = vmatpush.msrb.mxu3 %v3148_v14  ;;  %v3212_v29 = vld [vmem:[#allocation7 + $0xc0] sm:$0xff]  ;;  %v314_v30 = vld [vmem:[#allocation10 + $0x10] sm:$0xff]  ;;  %v3218_v32 = vld [vmem:[#allocation7 + $0xa8] sm:$0xff] }
  0x21   :  { %526 = vmatpush.msrb.mxu2 %v3150_v15  ;;  %v3216_v31 = vld [vmem:[#allocation7 + $0xb0] sm:$0xff]  ;;  %423 = vmatpush.msrb.mxu1 %v314_v30  ;;  %v3225_v33 = vld [vmem:[%s5119_s0 + $0x18] sm:$0xff]  ;;  %v3229_v34 = vld [vmem:[#allocation7 + $0x98] sm:$0xff] }
  0x22   :  { %547 = vmatpush.msrb.mxu3 %v3154_v16  ;;  %v3231_v35 = vld [vmem:[#allocation7 + $0x90] sm:$0xff]  ;;  %v3241_v36 = vld [vmem:[#allocation7 + $0x80] sm:$0xff]  ;;  %v3243_v37 = vld [vmem:[#allocation7 + $0x78] sm:$0xff] }
  0x23   :  { %527 = vmatpush.msrb.mxu2 %v3156_v17  ;;  %2436 = vmatmul.msk.f32.gmra.mxu0 %vm140_vm0, %v3161_v18  ;;  %v3247_v38 = vld [vmem:[#allocation7 + $0x68] sm:$0xff]  ;;  %v3249_v39 = vld [vmem:[#allocation7 + $0x60] sm:$0xff]  ;;  %v3256_v40 = vld [vmem:[%s5119_s0 + $0x20] sm:$0xff] }
  0x24   :  { %2444 = vmatmul.msk.f32.gmra.mxu1 %vm140_vm0, %v3161_v18  ;;  %2452 = vmatmul.msk.f32.gmra.mxu2 %vm140_vm0, %v3161_v18  ;;  %v3260_v41 = vld [vmem:[#allocation7 + $0x50] sm:$0xff]  ;;  %v3262_v42 = vld [vmem:[#allocation7 + $0x48] sm:$0xff]  ;;  %v3272_v43 = vld [vmem:[#allocation7 + $0x38] sm:$0xff] }
  0x25   :  { %2460 = vmatmul.msk.f32.gmra.mxu3 %vm140_vm0, %v3161_v18  ;;  %528 = vmatpush.msrb.mxu2 %v3169_v20  ;;  %v3274_v44 = vld [vmem:[#allocation7 + $0x30] sm:$0xff]  ;;  %v3276_v45 = vld [vmem:[#allocation12 + $0x170] sm:$0xff]  ;;  %v3284_v48 = vld [vmem:[#allocation7 + $0x18] sm:$0xff] }
  0x26   :  { %548 = vmatpush.msrb.mxu3 %v3166_v19  ;;  %5363 = vst [vmem:[#allocation18_spill] sm:$0xff] %v3276_v45  ;;  %v3280_v46 = vld [vmem:[#allocation12 + $0x158] sm:$0xff]  ;;  %v3282_v47 = vld [vmem:[#allocation7 + $0x20] sm:$0xff]  ;;  %711 = vmatpush.msra.mxu0 %v3276_v45  ;;  %v3292_v49 = vld [vmem:[%s5119_s0 + $0x28] sm:$0xff] }
  0x27   :  { %529 = vmatpush.msrb.mxu2 %v3181_v22  ;;  %5364 = vst [vmem:[#allocation19_spill] sm:$0xff] %v3280_v46  ;;  %v3297_v50 = vld [vmem:[#allocation7 + $0x8] sm:$0xff]  ;;  %v3299_v51 = vld [vmem:[#allocation7] sm:$0xff]  ;;  %v3307_v53 = vld [vmem:[#allocation7 + $0x178] sm:$0xff] }
  0x28   :  { %549 = vmatpush.msrb.mxu3 %v3179_v21  ;;  %5365 = vst [vmem:[#allocation20_spill] sm:$0xff] %v3282_v47  ;;  %712 = vmatpush.msra.mxu0 %v3280_v46  ;;  %v3305_v52 = vld [vmem:[#allocation12 + $0x168] sm:$0xff]  ;;  %v3313_v54 = vld [vmem:[#allocation12 + $0x140] sm:$0xff]  ;;  %v3316_v55 = vld [vmem:[#allocation12 + $0x150] sm:$0xff] }
  0x29   :  { %530 = vmatpush.msrb.mxu2 %v3187_v24  ;;  %5366 = vst [vmem:[#allocation21_spill] sm:$0xff] %v3284_v48  ;;  %v3319_v56 = vld [vmem:[#allocation7 + $0x160] sm:$0xff]  ;;  %v3325_v58 = vld [vmem:[#allocation12 + $0x138] sm:$0xff]  ;;  %v3339_v61 = vld [vmem:[#allocation12 + $0x120] sm:$0xff] }
  0x2a   :  { %550 = vmatpush.msrb.mxu3 %v3185_v23  ;;  %5367 = vst [vmem:[#allocation22_spill] sm:$0xff] %v3297_v50  ;;  %v3323_v57 = vld [vmem:[#allocation12 + $0x128] sm:$0xff]  ;;  %v3327_v59 = vld [vmem:[#allocation7 + $0x148] sm:$0xff]  ;;  %713 = vmatpush.msra.mxu0 %v3313_v54  ;;  %v3342_v62 = vld [vmem:[#allocation7 + $0x130] sm:$0xff] }
  0x2b   :  { %2437 = vmatmul.msk.f32.gmra.mxu0 %vm140_vm0, %v3194_v25  ;;  %531 = vmatpush.msrb.mxu2 %v3200_v27  ;;  %5368 = vst [vmem:[#allocation23_spill] sm:$0xff] %v3299_v51  ;;  %v3333_v60 = vld [vmem:[%s5119_s0 + $0x30] sm:$0xff]  ;;  %v3356_v1 = vld [vmem:[#allocation7 + $0x118] sm:$0xff]  ;;  %v3358_v2 = vld [vmem:[#allocation12 + $0x178] sm:$0xff] }
  0x2c   :  { %2445 = vmatmul.msk.f32.gmra.mxu1 %vm140_vm0, %v3194_v25  ;;  %2453 = vmatmul.msk.f32.gmra.mxu2 %vm140_vm0, %v3194_v25  ;;  %5369 = vst [vmem:[#allocation24_spill] sm:$0xff] %v3313_v54  ;;  %v3348_v63 = vld [vmem:[#allocation12 + $0x110] sm:$0xff]  ;;  %v3354_v0 = vld [vmem:[#allocation12 + $0x108] sm:$0xff]  ;;  %v3362_v3 = vld [vmem:[#allocation12 + $0xf8] sm:$0xff] }
  0x2d   :  { %2461 = vmatmul.msk.f32.gmra.mxu3 %vm140_vm0, %v3194_v25  ;;  %532 = vmatpush.msrb.mxu2 %v3212_v29  ;;  %5370 = vst [vmem:[#allocation25_spill] sm:$0xff] %v3323_v57  ;;  %v3364_v4 = vld [vmem:[#allocation12 + $0xf0] sm:$0xff]  ;;  %v3370_v6 = vld [vmem:[#allocation12 + $0x160] sm:$0xff]  ;;  %v3383_v9 = vld [vmem:[#allocation12 + $0xd8] sm:$0xff] }
  0x2e   :  { %551 = vmatpush.msrb.mxu3 %v3198_v26  ;;  %714 = vmatpush.msra.mxu0 %v3323_v57  ;;  %5371 = vst [vmem:[#allocation26_spill] sm:$0xff] %v3348_v63  ;;  %v3366_v5 = vld [vmem:[#allocation7 + $0x100] sm:$0xff]  ;;  %v3377_v7 = vld [vmem:[%s5119_s0 + $0x38] sm:$0xff]  ;;  %v3391_v13 = vld [vmem:[#allocation12 + $0xe0] sm:$0xff] }
  0x2f   :  { %533 = vmatpush.msrb.mxu2 %v3218_v32  ;;  %5372 = vst [vmem:[#allocation27_spill] sm:$0xff] %v3354_v0  ;;  %731 = vmatpush.msra.mxu1 %v3358_v2  ;;  %v3385_v10 = vld [vmem:[#allocation7 + $0xe8] sm:$0xff]  ;;  %v3397_v30 = vld [vmem:[#allocation12 + $0xc0] sm:$0xff]  ;;  %v3405_v57 = vld [vmem:[#allocation12 + $0xc8] sm:$0xff] }
  0x30   :  { %552 = vmatpush.msrb.mxu3 %v3210_v28  ;;  %5373 = vst [vmem:[#allocation28_spill] sm:$0xff] %v3356_v1  ;;  %715 = vmatpush.msra.mxu0 %v3348_v63  ;;  %v3401_v63 = vld [vmem:[#allocation12 + $0x148] sm:$0xff]  ;;  %v3407_v54 = vld [vmem:[#allocation12 + $0x130] sm:$0xff]  ;;  %v3440_v45 = vld [vmem:[#allocation12 + $0x78] sm:$0xff] }
  0x31   :  { %534 = vmatpush.msrb.mxu2 %v3231_v35  ;;  %5374 = vst [vmem:[#allocation29_spill] sm:$0xff] %v3358_v2  ;;  %732 = vmatpush.msra.mxu1 %v3370_v6  ;;  %v3411_v46 = vld [vmem:[#allocation7 + $0xb8] sm:$0xff]  ;;  %v3422_v2 = vld [vmem:[%s5121_s2] sm:$0xff] }
  0x32   :  { %553 = vmatpush.msrb.mxu3 %v3216_v31  ;;  %5375 = vst [vmem:[#allocation30_spill] sm:$0xff] %v3362_v3  ;;  %716 = vmatpush.msra.mxu0 %v3362_v3  ;;  %v3399_v3 = vld [vmem:[#allocation7 + $0xd0] sm:$0xff] }
  0x33   :  { %2438 = vmatmul.msk.f32.gmra.mxu0 %vm140_vm0, %v3225_v33  ;;  %535 = vmatpush.msrb.mxu2 %v3243_v37  ;;  %5376 = vst [vmem:[#allocation31_spill] sm:$0xff] %v3364_v4 }
  0x34   :  { %2446 = vmatmul.msk.f32.gmra.mxu1 %vm140_vm0, %v3225_v33  ;;  %2454 = vmatmul.msk.f32.gmra.mxu2 %vm140_vm0, %v3225_v33  ;;  %5377 = vst [vmem:[#allocation32_spill] sm:$0xff] %v3366_v5 }
  0x35   :  { %2462 = vmatmul.msk.f32.gmra.mxu3 %vm140_vm0, %v3225_v33  ;;  %536 = vmatpush.msrb.mxu2 %v3249_v39  ;;  %5378 = vst [vmem:[#allocation33_spill] sm:$0xff] %v3370_v6  ;;  %v3409_v6 = vld [vmem:[#allocation12 + $0xa8] sm:$0xff] }
  0x36   :  { %554 = vmatpush.msrb.mxu3 %v3229_v34  ;;  %5379 = vst [vmem:[#allocation34_spill] sm:$0xff] %v3377_v7  ;;  %717 = vmatpush.msra.mxu0 %v3391_v13 }
  0x37   :  { %537 = vmatpush.msrb.mxu2 %v3262_v42  ;;  %5380 = vst [vmem:[#allocation35_spill] sm:$0xff] %v3383_v9  ;;  %733 = vmatpush.msra.mxu1 %v3401_v63 }
  0x38   :  { %555 = vmatpush.msrb.mxu3 %v3241_v36  ;;  %5381 = vst [vmem:[#allocation36_spill] sm:$0xff] %v3385_v10  ;;  %718 = vmatpush.msra.mxu0 %v3405_v57 }
  0x39   :  { %538 = vmatpush.msrb.mxu2 %v3274_v44  ;;  %5382 = vst [vmem:[#allocation37_spill] sm:$0xff] %v3391_v13  ;;  %734 = vmatpush.msra.mxu1 %v3407_v54  ;;  %v3426_v13 = vld [vmem:[#allocation12 + $0x90] sm:$0xff] }
  0x3a   :  { %556 = vmatpush.msrb.mxu3 %v3247_v38  ;;  %5383 = vst [vmem:[#allocation38_spill] sm:$0xff] %v3397_v30 }
  0x3b   :  { %2439 = vmatmul.msk.f32.gmra.mxu0 %vm140_vm0, %v3256_v40  ;;  %539 = vmatpush.msrb.mxu2 %v3284_v48  ;;  %5384 = vst [vmem:[#allocation39_spill] sm:$0xff] %v3399_v3  ;;  %v3486_v48 = vld [vmem:[#allocation7 + $0x28] sm:$0xff] }
  0x3c   :  { %2447 = vmatmul.msk.f32.gmra.mxu1 %vm140_vm0, %v3256_v40  ;;  %2455 = vmatmul.msk.f32.gmra.mxu2 %vm140_vm0, %v3256_v40  ;;  %5385 = vst [vmem:[#allocation40_spill] sm:$0xff] %v3401_v63  ;;  %v3428_v63 = vld [vmem:[#allocation7 + $0xa0] sm:$0xff] }
  0x3d   :  { %2463 = vmatmul.msk.f32.gmra.mxu3 %vm140_vm0, %v3256_v40  ;;  %540 = vmatpush.msrb.mxu2 %v3299_v51  ;;  %5386 = vst [vmem:[#allocation41_spill] sm:$0xff] %v3405_v57  ;;  %v3434_v57 = vld [vmem:[#allocation12 + $0xb0] sm:$0xff]  ;;  %v3452_v51 = vld [vmem:[#allocation7 + $0x70] sm:$0xff] }
  0x3e   :  { %557 = vmatpush.msrb.mxu3 %v3260_v41  ;;  %5387 = vst [vmem:[#allocation42_spill] sm:$0xff] %v3407_v54  ;;  %v3436_v54 = vld [vmem:[#allocation12 + $0x118] sm:$0xff]  ;;  %719 = vmatpush.msra.mxu0 %v3434_v57 }
  0x3f   :  { %565 = vmatpush.msra.mxu2 %v3307_v53  ;;  %5388 = vst [vmem:[#allocation43_spill] sm:$0xff] %v3409_v6  ;;  %735 = vmatpush.msra.mxu1 %v3436_v54 }
  0x40   :  { %558 = vmatpush.msrb.mxu3 %v3272_v43  ;;  %5389 = vst [vmem:[#allocation44_spill] sm:$0xff] %v3411_v46 }
  0x41   :  { %566 = vmatpush.msra.mxu2 %v3319_v56  ;;  %5390 = vst [vmem:[#allocation45_spill] sm:$0xff] %v3422_v2 }
  0x42   :  { %559 = vmatpush.msrb.mxu3 %v3282_v47  ;;  %5391 = vst [vmem:[#allocation46_spill] sm:$0xff] %v3426_v13  ;;  %v3464_v47 = vld [vmem:[#allocation7 + $0x58] sm:$0xff] }
  0x43   :  { %2440 = vmatmul.msk.f32.gmra.mxu0 %vm140_vm0, %v3292_v49  ;;  %567 = vmatpush.msra.mxu2 %v3327_v59  ;;  %5392 = vst [vmem:[#allocation47_spill] sm:$0xff] %v3428_v63 }
  0x44   :  { %2448 = vmatmul.msk.f32.gmra.mxu1 %vm140_vm0, %v3292_v49  ;;  %2456 = vmatmul.msk.f32.gmra.mxu2 %vm140_vm0, %v3292_v49  ;;  %5393 = vst [vmem:[#allocation48_spill] sm:$0xff] %v3434_v57  ;;  %v3472_v57 = vld [vmem:[#allocation7 + $0x40] sm:$0xff] }
  0x45   :  { %2464 = vmatmul.msk.f32.gmra.mxu3 %vm140_vm0, %v3292_v49  ;;  %568 = vmatpush.msra.mxu2 %v3342_v62  ;;  %5394 = vst [vmem:[#allocation49_spill] sm:$0xff] %v3436_v54  ;;  %v3480_v54 = vld [vmem:[#allocation12 + $0x68] sm:$0xff] }
  0x46   :  { %560 = vmatpush.msrb.mxu3 %v3297_v50  ;;  %5395 = vst [vmem:[#allocation50_spill] sm:$0xff] %v3440_v45  ;;  %v3446_v50 = vld [vmem:[#allocation12 + $0x98] sm:$0xff] }
  0x47   :  { %569 = vmatpush.msra.mxu2 %v3356_v1  ;;  %5397 = vst [vmem:[#allocation52_spill] sm:$0xff] %v3446_v50  ;;  %720 = vmatpush.msra.mxu0 %v3446_v50  ;;  %v3474_v50 = vld [vmem:[#allocation12 + $0x80] sm:$0xff] }
  0x48   :  { %691 = vmatpush.msra.mxu3 %v3305_v52  ;;  %5400 = vst [vmem:[#allocation55_spill] sm:$0xff] %v3452_v51 }
  0x49   :  { %570 = vmatpush.msra.mxu2 %v3366_v5  ;;  %5402 = vst [vmem:[#allocation57_spill] sm:$0xff] %v3464_v47  ;;  %721 = vmatpush.msra.mxu0 %v3474_v50 }
  0x4a   :  { %692 = vmatpush.msra.mxu3 %v3316_v55  ;;  %5404 = vst [vmem:[#allocation59_spill] sm:$0xff] %v3472_v57 }
  0x4b   :  { %2441 = vmatmul.msk.f32.gmra.mxu0 %vm140_vm0, %v3333_v60  ;;  %571 = vmatpush.msra.mxu2 %v3385_v10  ;;  %5405 = vst [vmem:[#allocation60_spill] sm:$0xff] %v3474_v50  ;;  %v3503_v50 = vld [vmem:[%s5122_s3] sm:$0xff] }
  0x4c   :  { %693 = vmatpush.msra.mxu3 %v3325_v58  ;;  %2449 = vmatmul.msk.f32.gmra.mxu1 %vm140_vm0, %v3333_v60  ;;  %5407 = vst [vmem:[#allocation62_spill] sm:$0xff] %v3480_v54 }
  0x4d   :  { %2457 = vmatmul.msk.f32.gmra.mxu2 %vm140_vm0, %v3333_v60  ;;  %2465 = vmatmul.msk.f32.gmra.mxu3 %vm140_vm0, %v3333_v60  ;;  %5410 = vst [vmem:[#allocation65_spill] sm:$0xff] %v3486_v48 }
  0x4e   :  { %694 = vmatpush.msra.mxu3 %v3339_v61  ;;  %572 = vmatpush.msra.mxu2 %v3399_v3  ;;  %5413 = vst [vmem:[#allocation68_spill] sm:$0xff] %v3503_v50 }
  0x4f   :  { %722 = vmatpush.msra.mxu0 %v3480_v54  ;;  %v3511_v54 = vld [vmem:[#allocation12 + $0x50] sm:$0xff] }
  0x50   :  { %695 = vmatpush.msra.mxu3 %v3354_v0  ;;  %573 = vmatpush.msra.mxu2 %v3411_v46  ;;  %5414 = vst [vmem:[#allocation69_spill] sm:$0xff] %v3511_v54 }
  0x51   :  { %723 = vmatpush.msra.mxu0 %v3511_v54  ;;  %v3546_v54 = vld [vmem:[#allocation12 + $0x8] sm:$0xff] }
  0x52   :  { %696 = vmatpush.msra.mxu3 %v3364_v4  ;;  %574 = vmatpush.msra.mxu2 %v3428_v63 }
  0x53   :  { %2442 = vmatmul.msk.f32.gmra.mxu0 %vm140_vm0, %v3377_v7 }
  0x54   :  { %2450 = vmatmul.msk.f32.gmra.mxu1 %vm140_vm0, %v3377_v7  ;;  %697 = vmatpush.msra.mxu3 %v3383_v9 }
  0x55   :  { %2458 = vmatmul.msk.f32.gmra.mxu2 %vm140_vm0, %v3377_v7  ;;  %2466 = vmatmul.msk.f32.gmra.mxu3 %vm140_vm0, %v3377_v7  ;;  %v3442_v7 = vld [vmem:[#allocation7 + $0x88] sm:$0xff] }
  0x56   :  { %698 = vmatpush.msra.mxu3 %v3397_v30  ;;  %5396 = vst [vmem:[#allocation51_spill] sm:$0xff] %v3442_v7  ;;  %575 = vmatpush.msra.mxu2 %v3442_v7  ;;  %v3466_v30 = vld [vmem:[#allocation12 + $0x30] sm:$0xff] }
  0x57   :  { %5403 = vst [vmem:[#allocation58_spill] sm:$0xff] %v3466_v30 }
  0x58   :  { %699 = vmatpush.msra.mxu3 %v3409_v6  ;;  %v3448_v6 = vld [vmem:[#allocation12 + $0x100] sm:$0xff]  ;;  %576 = vmatpush.msra.mxu2 %v3452_v51 }
  0x59   :  { %5398 = vst [vmem:[#allocation53_spill] sm:$0xff] %v3448_v6  ;;  %736 = vmatpush.msra.mxu1 %v3448_v6  ;;  %v3476_v6 = vld [vmem:[#allocation12 + $0xe8] sm:$0xff] }
  0x5a   :  { %700 = vmatpush.msra.mxu3 %v3426_v13  ;;  %v3461_v13 = vld [vmem:[#allocation12 + $0x48] sm:$0xff]  ;;  %5406 = vst [vmem:[#allocation61_spill] sm:$0xff] %v3476_v6  ;;  %577 = vmatpush.msra.mxu2 %v3464_v47 }
  0x5b   :  { %2467 = vmatmul.msk.f32.vlgmr.msrb.gmra.mxu0 %vm140_vm0, %v3134_v8  ;;  %5401 = vst [vmem:[#allocation56_spill] sm:$0xff] %v3461_v13  ;;  %737 = vmatpush.msra.mxu1 %v3476_v6  ;;  %v3517_v6 = vld [vmem:[#allocation12 + $0xa0] sm:$0xff] }
  0x5c   :  { %2475 = vmatmul.msk.f32.vlgmr.msrb.gmra.mxu1 %vm140_vm0, %v3134_v8  ;;  %v3450_v8 = vld [vmem:[#allocation12 + $0x60] sm:$0xff]  ;;  %701 = vmatpush.msra.mxu3 %v3440_v45  ;;  %v3484_v45 = vld [vmem:[#allocation12 + $0x18] sm:$0xff] }
  0x5d   :  { %541 = vmatmul.f32.vlgmr.msrb.gmra.mxu2 %v3422_v2  ;;  %561 = vmatmul.f32.vlgmr.msrb.gmra.mxu3 %v3422_v2  ;;  %5399 = vst [vmem:[#allocation54_spill] sm:$0xff] %v3450_v8 }
  0x5e   :  { %702 = vmatpush.msra.mxu3 %v3450_v8  ;;  %v3482_v8 = vld [vmem:[#allocation12 + $0xd0] sm:$0xff]  ;;  %5409 = vst [vmem:[#allocation64_spill] sm:$0xff] %v3484_v45  ;;  %578 = vmatpush.msra.mxu2 %v3472_v57 }
  0x5f   :  { %5408 = vst [vmem:[#allocation63_spill] sm:$0xff] %v3482_v8  ;;  %738 = vmatpush.msra.mxu1 %v3482_v8  ;;  %v3513_v8 = vld [vmem:[#allocation12 + $0xb8] sm:$0xff] }
  0x60   :  { %703 = vmatpush.msra.mxu3 %v3461_v13  ;;  %v3494_v13 = vld [vmem:[#allocation7 + $0x10] sm:$0xff]  ;;  %579 = vmatpush.msra.mxu2 %v3486_v48  ;;  %5415 = vst [vmem:[#allocation70_spill] sm:$0xff] %v3513_v8 }
  0x61   :  { %5412 = vst [vmem:[#allocation67_spill] sm:$0xff] %v3494_v13  ;;  %739 = vmatpush.msra.mxu1 %v3513_v8 }
  0x62   :  { %704 = vmatpush.msra.mxu3 %v3466_v30  ;;  %580 = vmatpush.msra.mxu2 %v3494_v13 }
  0x63   :  { %2468 = vmatmul.msk.f32.gmra.mxu0 %vm140_vm0, %v3161_v18  ;;  %740 = vmatpush.msra.mxu1 %v3517_v6 }
  0x64   :  { %2476 = vmatmul.msk.f32.gmra.mxu1 %vm140_vm0, %v3161_v18  ;;  %v3492_v18 = vld [vmem:[#allocation12] sm:$0xff]  ;;  %705 = vmatpush.msra.mxu3 %v3484_v45  ;;  %v3519_v45 = vld [vmem:[#allocation12 + $0x38] sm:$0xff] }
  0x65   :  { %5411 = vst [vmem:[#allocation66_spill] sm:$0xff] %v3492_v18  ;;  %581 = vmatmul.f32.vlgmr.msra.gmra.mxu2 %v3422_v2  ;;  %724 = vmatpush.msra.mxu0 %v3519_v45  ;;  %v3540_v2 = vld [vmem:[#allocation12 + $0x20] sm:$0xff] }
  0x66   :  { %706 = vmatpush.msra.mxu3 %v3492_v18  ;;  %5416 = vst [vmem:[#allocation71_spill] sm:$0xff] %v3519_v45  ;;  %v3523_v18 = vld [vmem:[#allocation12 + $0x88] sm:$0xff]  ;;  %809 = vmatpush.msrb.mxu2 %v3142_v12  ;;  %v3542_v45 = vld [vmem:[#allocation12 + $0x58] sm:$0xff] }
  0x67   :  { %707 = vmatmul.f32.vlgmr.msra.gmra.mxu3 %v3503_v50  ;;  %5417 = vst [vmem:[#allocation72_spill] sm:$0xff] %v3523_v18  ;;  %741 = vmatpush.msra.mxu1 %v3523_v18  ;;  %v3548_v18 = vld [vmem:[#allocation12 + $0x40] sm:$0xff] }
  0x68   :  { %829 = vmatpush.msrb.mxu3 %v3140_v11  ;;  %810 = vmatpush.msrb.mxu2 %v3150_v15  ;;  %5418 = vst [vmem:[#allocation73_spill] sm:$0xff] %v3540_v2 }
  0x69   :  { %725 = vmatpush.msra.mxu0 %v3540_v2  ;;  %v3560_v2 = vld [vmem:[#allocation12 + $0x10] sm:$0xff] }
  0x6a   :  { %830 = vmatpush.msrb.mxu3 %v3148_v14  ;;  %811 = vmatpush.msrb.mxu2 %v3156_v17 }
  0x6b   :  { %2469 = vmatmul.msk.f32.gmra.mxu0 %vm140_vm0, %v3194_v25 }
  0x6c   :  { %2477 = vmatmul.msk.f32.gmra.mxu1 %vm140_vm0, %v3194_v25  ;;  %v3532_v25 = vld [vmem:[#allocation12 + $0x70] sm:$0xff]  ;;  %831 = vmatpush.msrb.mxu3 %v3154_v16 }
  0x6d   :  { %742 = vmatpush.msra.mxu1 %v3532_v25  ;;  %812 = vmatpush.msrb.mxu2 %v3169_v20 }
  0x6e   :  { %832 = vmatpush.msrb.mxu3 %v3166_v19  ;;  %726 = vmatpush.msra.mxu0 %v3546_v54 }
  0x6f   :  { %743 = vmatpush.msra.mxu1 %v3542_v45  ;;  %813 = vmatpush.msrb.mxu2 %v3181_v22 }
  0x70   :  { %849 = vmatpush.msrb.mxu0 %v3307_v53  ;;  %833 = vmatpush.msrb.mxu3 %v3179_v21 }
  0x71   :  { %744 = vmatpush.msra.mxu1 %v3548_v18  ;;  %814 = vmatpush.msrb.mxu2 %v3187_v24 }
  0x72   :  { %850 = vmatpush.msrb.mxu0 %v3319_v56  ;;  %834 = vmatpush.msrb.mxu3 %v3185_v23 }
  0x73   :  { %2470 = vmatmul.msk.f32.gmra.mxu0 %vm140_vm0, %v3225_v33  ;;  %815 = vmatpush.msrb.mxu2 %v3200_v27 }
  0x74   :  { %2478 = vmatmul.msk.f32.gmra.mxu1 %vm140_vm0, %v3225_v33  ;;  %v3557_v33 = vld [vmem:[#allocation12 + $0x28] sm:$0xff]  ;;  %851 = vmatpush.msrb.mxu0 %v3327_v59 }
  0x75   :  { %745 = vmatpush.msra.mxu1 %v3557_v33  ;;  %835 = vmatpush.msrb.mxu3 %v3198_v26 }
  0x76   :  { %852 = vmatpush.msrb.mxu0 %v3342_v62  ;;  %816 = vmatpush.msrb.mxu2 %v3212_v29 }
  0x77   :  { %746 = vmatpush.msra.mxu1 %v3560_v2  ;;  %836 = vmatpush.msrb.mxu3 %v3210_v28 }
  0x78   :  { %853 = vmatpush.msrb.mxu0 %v3356_v1  ;;  %817 = vmatpush.msrb.mxu2 %v3218_v32 }
  0x79   :  { %924 = vmatpush.msrb.mxu1 %v3305_v52  ;;  %837 = vmatpush.msrb.mxu3 %v3216_v31 }
  0x7a   :  { %854 = vmatpush.msrb.mxu0 %v3366_v5  ;;  %818 = vmatpush.msrb.mxu2 %v3231_v35  ;;  %v5437_v5 = vld [vmem:[#allocation26_spill] sm:$0xff] }
  0x7b   :  { %2471 = vmatmul.msk.f32.gmra.mxu0 %vm140_vm0, %v3256_v40  ;;  %925 = vmatpush.msrb.mxu1 %v3316_v55 }
  0x7c   :  { %2479 = vmatmul.msk.f32.gmra.mxu1 %vm140_vm0, %v3256_v40  ;;  %855 = vmatpush.msrb.mxu0 %v3385_v10  ;;  %v5419_v40 = vld [vmem:[#allocation21_spill] sm:$0xff] }
  0x7d   :  { %926 = vmatpush.msrb.mxu1 %v3325_v58  ;;  %838 = vmatpush.msrb.mxu3 %v3229_v34 }
  0x7e   :  { %856 = vmatpush.msrb.mxu0 %v3399_v3  ;;  %819 = vmatpush.msrb.mxu2 %v3243_v37  ;;  %v5425_v3 = vld [vmem:[#allocation34_spill] sm:$0xff] }
  0x7f   :  { %927 = vmatpush.msrb.mxu1 %v3339_v61  ;;  %839 = vmatpush.msrb.mxu3 %v3241_v36 }
  0x80   :  { %857 = vmatpush.msrb.mxu0 %v3411_v46  ;;  %820 = vmatpush.msrb.mxu2 %v3249_v39  ;;  %v5424_v46 = vld [vmem:[#allocation22_spill] sm:$0xff] }
  0x81   :  { %928 = vmatpush.msrb.mxu1 %v3354_v0  ;;  %840 = vmatpush.msrb.mxu3 %v3247_v38  ;;  %v5438_v0 = vld [vmem:[#allocation56_spill] sm:$0xff] }
  0x82   :  { %858 = vmatpush.msrb.mxu0 %v3428_v63  ;;  %821 = vmatpush.msrb.mxu2 %v3262_v42  ;;  %v5421_v63 = vld [vmem:[#allocation20_spill] sm:$0xff] }
  0x83   :  { %2472 = vmatmul.msk.f32.gmra.mxu0 %vm140_vm0, %v3292_v49  ;;  %929 = vmatpush.msrb.mxu1 %v3364_v4 }
  0x84   :  { %2480 = vmatmul.msk.f32.gmra.mxu1 %vm140_vm0, %v3292_v49  ;;  %859 = vmatpush.msrb.mxu0 %v3442_v7  ;;  %v5420_v49 = vld [vmem:[#allocation38_spill] sm:$0xff]  ;;  %v5423_v7 = vld [vmem:[#allocation43_spill] sm:$0xff] }
  0x85   :  { %841 = vmatpush.msrb.mxu3 %v3260_v41  ;;  %822 = vmatpush.msrb.mxu2 %v3274_v44 }
  0x86   :  { %930 = vmatpush.msrb.mxu1 %v3383_v9  ;;  %860 = vmatpush.msrb.mxu0 %v3452_v51  ;;  %v5426_v51 = vld [vmem:[#allocation18_spill] sm:$0xff] }
  0x87   :  { %842 = vmatpush.msrb.mxu3 %v3272_v43  ;;  %823 = vmatpush.msrb.mxu2 %v5419_v40  ;;  %v5431_v9 = vld [vmem:[#allocation50_spill] sm:$0xff] }
  0x88   :  { %931 = vmatpush.msrb.mxu1 %v5420_v49  ;;  %861 = vmatpush.msrb.mxu0 %v3464_v47  ;;  %v5427_v47 = vld [vmem:[#allocation29_spill] sm:$0xff]  ;;  %v5428_v49 = vld [vmem:[#allocation46_spill] sm:$0xff] }
  0x89   :  { %843 = vmatpush.msrb.mxu3 %v5421_v63 }
  0x8a   :  { %932 = vmatpush.msrb.mxu1 %v5423_v7  ;;  %862 = vmatpush.msrb.mxu0 %v3472_v57  ;;  %v5429_v7 = vld [vmem:[#allocation19_spill] sm:$0xff]  ;;  %v5430_v57 = vld [vmem:[#allocation33_spill] sm:$0xff] }
  0x8b   :  { %2473 = vmatmul.msk.f32.gmra.mxu0 %vm140_vm0, %v3333_v60  ;;  %844 = vmatpush.msrb.mxu3 %v5424_v46 }
  0x8c   :  { %2481 = vmatmul.msk.f32.gmra.mxu1 %vm140_vm0, %v3333_v60  ;;  %v5422_v60 = vld [vmem:[#allocation23_spill] sm:$0xff]  ;;  %863 = vmatpush.msrb.mxu0 %v3486_v48  ;;  %v5433_v48 = vld [vmem:[#allocation40_spill] sm:$0xff] }
  0x8d   :  { %824 = vmatpush.msrb.mxu2 %v5422_v60  ;;  %964 = vmatpush.msra.mxu3 %v5427_v47  ;;  %v3640_v47 = vld [vmem:[%s5129_s10] sm:$0x7] }
  0x8e   :  { %933 = vmatpush.msrb.mxu1 %v5428_v49  ;;  %864 = vmatpush.msrb.mxu0 %v3494_v13  ;;  %v5434_v13 = vld [vmem:[#allocation54_spill] sm:$0xff]  ;;  %v5435_v49 = vld [vmem:[#allocation25_spill] sm:$0xff] }
  0x8f   :  { %944 = vmatpush.msra.mxu2 %v5426_v51  ;;  %965 = vmatpush.msra.mxu3 %v5430_v57  ;;  %v3648_v57 = vperm.slane %v3640_v47, 0 }
  0x90   :  { %934 = vmatpush.msrb.mxu1 %v5431_v9  ;;  %v5436_v9 = vld [vmem:[#allocation42_spill] sm:$0xff] }
  0x91   :  { %945 = vmatpush.msra.mxu2 %v5429_v7  ;;  %966 = vmatpush.msra.mxu3 %v5433_v48  ;;  %v5439_v48 = vld [vmem:[#allocation49_spill] sm:$0xff] }
  0x92   :  { %935 = vmatpush.msrb.mxu1 %v5434_v13  ;;  %v5440_v13 = vld [vmem:[#allocation30_spill] sm:$0xff] }
  0x93   :  { %2474 = vmatmul.msk.f32.gmra.mxu0 %vm140_vm0, %v5425_v3  ;;  %967 = vmatpush.msra.mxu3 %v5436_v9 }
  0x94   :  { %2482 = vmatmul.msk.f32.gmra.mxu1 %vm140_vm0, %v5425_v3  ;;  %v5432_v3 = vld [vmem:[#allocation24_spill] sm:$0xff] }
  0x95   :  { %946 = vmatpush.msra.mxu2 %v5432_v3  ;;  %936 = vmatpush.msrb.mxu1 %v5438_v0  ;;  %v5444_v0 = vld [vmem:[#allocation53_spill] sm:$0xff] }
  0x96   :  { %968 = vmatpush.msra.mxu3 %v5439_v48  ;;  %v5446_v48 = vld [vmem:[#allocation64_spill] sm:$0xff] }
  0x97   :  { %947 = vmatpush.msra.mxu2 %v5435_v49  ;;  %937 = vmatpush.msrb.mxu1 %v3466_v30  ;;  %v5448_v30 = vld [vmem:[#allocation41_spill] sm:$0xff] }
  0x98   :  { %v3632_v10 = vpop.f32.mrf.mxu0  ;;  %969 = vmatpush.msra.mxu3 %v5444_v0 }
  0x99   :  { %v3634_v4 = vpop.f32.mrf.mxu1  ;;  %948 = vmatpush.msra.mxu2 %v5437_v5  ;;  %938 = vmatpush.msrb.mxu1 %v5446_v48 }
  0x9b   :  { %727 = vmatmul.f32.vlgmr.msra.gmra.mxu0 %v3503_v50  ;;  %949 = vmatpush.msra.mxu2 %v5440_v13  ;;  %v5447_v13 = vld [vmem:[#allocation61_spill] sm:$0xff] }
  0x9c   :  { %747 = vmatmul.f32.vlgmr.msra.gmra.mxu1 %v3503_v50  ;;  %1039 = vmatpush.msra.mxu0 %v3142_v12  ;;  %v5445_v12 = vld [vmem:[#allocation37_spill] sm:$0xff] }
  0x9d   :  { %950 = vmatpush.msra.mxu2 %v5445_v12  ;;  %970 = vmatpush.msra.mxu3 %v5447_v13 }
  0x9e   :  { %1040 = vmatpush.msra.mxu0 %v3150_v15  ;;  %v5449_v15 = vld [vmem:[#allocation66_spill] sm:$0xff] }
  0x9f   :  { %v3656_v1 = vpop.f32.mrf.mxu2  ;;  %951 = vmatpush.msra.mxu2 %v5448_v30  ;;  %939 = vmatpush.msrb.mxu1 %v5449_v15 }
  0xa0   :  { %v343_v49 = vpop.f32.mrf.mxu3  ;;  %v3663_v9 = vpop.f32.mrf.mxu0  ;;  %1041 = vmatpush.msra.mxu0 %v3156_v17 }
  0xa1   :  { %v3661_v50 = vadd.f32 %v343_v49, %v3648_v57  ;;  %5442 = vst [vmem:[#allocation20_spill] sm:$0xff] %v3663_v9  ;;  %v3665_v5 = vpop.f32.mrf.mxu1  ;;  %v5450_v49 = vld [vmem:[#allocation63_spill] sm:$0xff]  ;;  %1059 = vmatpush.msra.mxu1 %v3140_v11  ;;  %v5452_v9 = vld [vmem:[#allocation52_spill] sm:$0xff] }
  0xa2   :  { %5443 = vst [vmem:[#allocation23_spill] sm:$0xff] %v3665_v5  ;;  %1042 = vmatpush.msra.mxu0 %v3169_v20  ;;  %971 = vmatpush.msra.mxu3 %v5450_v49  ;;  %v132_v5 = vld [vmem:[%s5125_s6] sm:$0x7] }
  0xa3   :  { %5441 = vst [vmem:[#allocation21_spill] sm:$0xff] %v3661_v50  ;;  %v5451_v50 = vld [vmem:[#allocation48_spill] sm:$0xff]  ;;  %v3682_v17 = vperm.slane %v132_v5, 2  ;;  %1060 = vmatpush.msra.mxu1 %v3148_v14 }
  0xa4   :  { %952 = vmatpush.msra.mxu2 %v5451_v50  ;;  %1043 = vmatpush.msra.mxu0 %v3181_v22  ;;  %v5458_v14 = vld [vmem:[#allocation72_spill] sm:$0xff] }
  0xa5   :  { %972 = vmatpush.msra.mxu3 %v3513_v8  ;;  %v5457_v8 = vld [vmem:[#allocation60_spill] sm:$0xff]  ;;  %1061 = vmatpush.msra.mxu1 %v3154_v16  ;;  %v5461_v16 = vld [vmem:[#allocation71_spill] sm:$0xff] }
  0xa6   :  { %953 = vmatpush.msra.mxu2 %v5452_v9  ;;  %1044 = vmatpush.msra.mxu0 %v3187_v24  ;;  %v5459_v24 = vld [vmem:[#allocation62_spill] sm:$0xff] }
  0xa7   :  { %v267_v13 = vpop.f32.mrf.mxu2  ;;  %973 = vmatpush.msra.mxu3 %v3517_v6  ;;  %1062 = vmatpush.msra.mxu1 %v3166_v19 }
  0xa8   :  { %v346_v20 = vpop.f32.mrf.mxu3  ;;  %v3689_v49 = vadd.f32 %v267_v13, %v3682_v17  ;;  %v3694_v11 = vpop.f32.mrf.mxu0  ;;  %954 = vmatpush.msra.mxu2 %v5457_v8  ;;  %1045 = vmatpush.msra.mxu0 %v3200_v27  ;;  %v5460_v13 = vld [vmem:[#allocation69_spill] sm:$0xff]  ;;  %v3712_v27 = vperm.slane %v132_v5, 0 }
  0xa9   :  { %v3692_v0 = vadd.f32 %v346_v20, %v3648_v57  ;;  %5455 = vst [vmem:[#allocation18_spill] sm:$0xff] %v3694_v11  ;;  %v3696_v22 = vpop.f32.mrf.mxu1  ;;  %974 = vmatpush.msra.mxu3 %v5458_v14  ;;  %1063 = vmatpush.msra.mxu1 %v3179_v21  ;;  %v3714_v20 = vperm.slane %v132_v5, 1  ;;  %v5465_v11 = vld [vmem:[#allocation73_spill] sm:$0xff] }
  0xaa   :  { %5453 = vst [vmem:[#allocation22_spill] sm:$0xff] %v3689_v49  ;;  %955 = vmatpush.msra.mxu2 %v5459_v24  ;;  %1046 = vmatpush.msra.mxu0 %v3212_v29 }
  0xab   :  { %5454 = vst [vmem:[#allocation34_spill] sm:$0xff] %v3692_v0  ;;  %975 = vmatpush.msra.mxu3 %v3532_v25  ;;  %1064 = vmatpush.msra.mxu1 %v3185_v23 }
  0xac   :  { %5456 = vst [vmem:[#allocation29_spill] sm:$0xff] %v3696_v22  ;;  %956 = vmatpush.msra.mxu2 %v5460_v13  ;;  %1047 = vmatpush.msra.mxu0 %v3218_v32 }
  0xad   :  { %976 = vmatpush.msra.mxu3 %v3542_v45  ;;  %5462 = vst [vmem:[#allocation19_spill] sm:$0xff] %v3714_v20  ;;  %1065 = vmatpush.msra.mxu1 %v3198_v26 }
  0xae   :  { %957 = vmatpush.msra.mxu2 %v5461_v16  ;;  %1048 = vmatpush.msra.mxu0 %v3231_v35 }
  0xaf   :  { %v270_v0 = vpop.f32.mrf.mxu2  ;;  %977 = vmatpush.msra.mxu3 %v3548_v18  ;;  %1066 = vmatpush.msra.mxu1 %v3210_v28 }
  0xb0   :  { %v349_v19 = vpop.f32.mrf.mxu3  ;;  %v3719_v29 = vadd.f32 %v270_v0, %v3682_v17  ;;  %v191_v32 = vpop.f32.mrf.mxu0  ;;  %958 = vmatpush.msra.mxu2 %v5465_v11  ;;  %1049 = vmatpush.msra.mxu0 %v3243_v37 }
  0xb1   :  { %v3722_v21 = vadd.f32 %v349_v19, %v3648_v57  ;;  %v232_v22 = vpop.f32.mrf.mxu1  ;;  %v3727_v5 = vadd.f32 %v191_v32, %v3712_v27  ;;  %978 = vmatpush.msra.mxu3 %v3557_v33  ;;  %1067 = vmatpush.msra.mxu1 %v3216_v31 }
  0xb2   :  { %5463 = vst [vmem:[#allocation33_spill] sm:$0xff] %v3719_v29  ;;  %v3730_v49 = vadd.f32 %v232_v22, %v3714_v20  ;;  %959 = vmatpush.msra.mxu2 %v3546_v54  ;;  %1050 = vmatpush.msra.mxu0 %v3249_v39 }
  0xb3   :  { %5464 = vst [vmem:[#allocation24_spill] sm:$0xff] %v3722_v21  ;;  %979 = vmatpush.msra.mxu3 %v3560_v2  ;;  %1068 = vmatpush.msra.mxu1 %v3229_v34 }
  0xb4   :  { %5466 = vst [vmem:[#allocation37_spill] sm:$0xff] %v3727_v5  ;;  %1051 = vmatpush.msra.mxu0 %v3262_v42 }
  0xb5   :  { %5467 = vst [vmem:[#allocation64_spill] sm:$0xff] %v3730_v49  ;;  %1069 = vmatpush.msra.mxu1 %v3241_v36 }
  0xb6   :  { %1052 = vmatpush.msra.mxu0 %v3274_v44 }
  0xb7   :  { %v273_v23 = vpop.f32.mrf.mxu2  ;;  %1070 = vmatpush.msra.mxu1 %v3247_v38 }
  0xb8   :  { %v352_v35 = vpop.f32.mrf.mxu3  ;;  %v3744_v26 = vadd.f32 %v273_v23, %v3682_v17  ;;  %v194_v28 = vpop.f32.mrf.mxu0  ;;  %1053 = vmatpush.msra.mxu0 %v5419_v40 }
  0xb9   :  { %v3747_v37 = vadd.f32 %v352_v35, %v3648_v57  ;;  %v235_v39 = vpop.f32.mrf.mxu1  ;;  %v3750_v0 = vadd.f32 %v194_v28, %v3712_v27  ;;  %1071 = vmatpush.msra.mxu1 %v3260_v41 }
  0xba   :  { %5468 = vst [vmem:[#allocation41_spill] sm:$0xff] %v3744_v26  ;;  %v3753_v31 = vadd.f32 %v235_v39, %v3714_v20  ;;  %1054 = vmatpush.msra.mxu0 %v5422_v60 }
  0xbb   :  { %5469 = vst [vmem:[#allocation66_spill] sm:$0xff] %v3747_v37  ;;  %1072 = vmatpush.msra.mxu1 %v3272_v43 }
  0xbc   :  { %5470 = vst [vmem:[#allocation48_spill] sm:$0xff] %v3750_v0 }
  0xbd   :  { %5471 = vst [vmem:[#allocation52_spill] sm:$0xff] %v3753_v31  ;;  %1073 = vmatpush.msra.mxu1 %v5421_v63 }
  0xbf   :  { %v276_v34 = vpop.f32.mrf.mxu2  ;;  %1074 = vmatpush.msra.mxu1 %v5424_v46 }
  0xc0   :  { %v355_v42 = vpop.f32.mrf.mxu3  ;;  %v3762_v44 = vadd.f32 %v276_v34, %v3682_v17  ;;  %v197_v19 = vpop.f32.mrf.mxu0 }
  0xc1   :  { %v3765_v22 = vadd.f32 %v355_v42, %v3648_v57  ;;  %v238_v36 = vpop.f32.mrf.mxu1  ;;  %v3768_v40 = vadd.f32 %v197_v19, %v3712_v27 }
  0xc2   :  { %5472 = vst [vmem:[#allocation60_spill] sm:$0xff] %v3762_v44  ;;  %v3771_v38 = vadd.f32 %v238_v36, %v3714_v20 }
  0xc3   :  { %5473 = vst [vmem:[#allocation72_spill] sm:$0xff] %v3765_v22 }
  0xc4   :  { %5474 = vst [vmem:[#allocation62_spill] sm:$0xff] %v3768_v40 }
  0xc5   :  { %5475 = vst [vmem:[#allocation69_spill] sm:$0xff] %v3771_v38 }
  0xc7   :  { %v279_v41 = vpop.f32.mrf.mxu2 }
  0xc8   :  { %v358_v43 = vpop.f32.mrf.mxu3  ;;  %v3776_v60 = vadd.f32 %v279_v41, %v3682_v17  ;;  %v200_v23 = vpop.f32.mrf.mxu0 }
  0xc9   :  { %v3779_v32 = vadd.f32 %v358_v43, %v3648_v57  ;;  %v241_v35 = vpop.f32.mrf.mxu1  ;;  %v3782_v28 = vadd.f32 %v200_v23, %v3712_v27  ;;  %v3800_v23 = vperm.slane %v3640_v47, 1 }
  0xca   :  { %5476 = vst [vmem:[#allocation71_spill] sm:$0xff] %v3776_v60  ;;  %v3785_v39 = vadd.f32 %v241_v35, %v3714_v20  ;;  %v3803_v35 = vperm.slane %v3640_v47, 2  ;;  %v224_v47 = vadd.f32 %v3634_v4, %v3714_v20 }
  0xcb   :  { %5477 = vst [vmem:[#allocation73_spill] sm:$0xff] %v3779_v32 }
  0xcc   :  { %5478 = vst [vmem:[#allocation74_spill] sm:$0xff] %v3782_v28 }
  0xcd   :  { %5479 = vst [vmem:[#allocation75_spill] sm:$0xff] %v3785_v39 }
  0xd0   :  { %v282_v34 = vpop.f32.mrf.mxu2  ;;  %v361_v63 = vpop.f32.mrf.mxu3 }
  0xd1   :  { %v3788_v46 = vadd.f32 %v282_v34, %v3682_v17  ;;  %v3791_v42 = vadd.f32 %v361_v63, %v3648_v57  ;;  %v203_v19 = vpop.f32.mrf.mxu0  ;;  %v244_v36 = vpop.f32.mrf.mxu1 }
  0xd2   :  { %v3794_v41 = vadd.f32 %v203_v19, %v3712_v27  ;;  %v3797_v43 = vadd.f32 %v244_v36, %v3714_v20  ;;  %v183_v36 = vadd.f32 %v3632_v10, %v3712_v27 }
  0xd3   :  { %5480 = vst [vmem:[#allocation76_spill] sm:$0xff] %v3788_v46 }
  0xd4   :  { %5481 = vst [vmem:[#allocation77_spill] sm:$0xff] %v3794_v41 }
  0xd5   :  { %5482 = vst [vmem:[#allocation78_spill] sm:$0xff] %v3797_v43 }
  0xd8   :  { %v285_v39 = vpop.f32.mrf.mxu2  ;;  %v364_v34 = vpop.f32.mrf.mxu3 }
  0xd9   :  { %v3806_v46 = vadd.f32 %v285_v39, %v3682_v17  ;;  %v384_v63 = vpop.f32.mrf.mxu0  ;;  %v425_v28 = vpop.f32.mrf.mxu1 }
  0xda   :  { %v3809_v21 = vadd.f32 %v384_v63, %v3800_v23  ;;  %v3812_v19 = vadd.f32 %v425_v28, %v3803_v35 }
  0xdb   :  { %5483 = vst [vmem:[#allocation79_spill] sm:$0xff] %v3806_v46 }
  0xdc   :  { %5484 = vst [vmem:[#allocation80_spill] sm:$0xff] %v3809_v21 }
  0xdd   :  { %5485 = vst [vmem:[#allocation81_spill] sm:$0xff] %v3812_v19 }
  0xe0   :  { %v542_v43 = vpop.f32.mrf.mxu2  ;;  %v562_v41 = vpop.f32.mrf.mxu3 }
  0xe1   :  { %v589_v60 = vadd.f32 %v542_v43, %v183_v36  ;;  %v609_v38 = vadd.f32 %v562_v41, %v224_v47  ;;  %v387_v39 = vpop.f32.mrf.mxu0  ;;  %v428_v46 = vpop.f32.mrf.mxu1 }
  0xe2   :  { %v3819_v40 = vadd.f32 %v387_v39, %v3800_v23  ;;  %v3822_v63 = vadd.f32 %v428_v46, %v3803_v35 }
  0xe3   :  { %v2483_v28 = vmul.f32 -1.442695, %v589_v60  ;;  %v2484_v19 = vmul.f32 -1.442695, %v609_v38 }
  0xe4   :  { %5486 = vst [vmem:[#allocation82_spill] sm:$0xff] %v3819_v40 }
  0xe5   :  { %5487 = vst [vmem:[#allocation83_spill] sm:$0xff] %v3822_v63  ;;  %2527 = vpow2.f32 %v2483_v28  ;;  %v365_v28 = vadd.f32 %v364_v34, %v3648_v57 }
  0xe6   :  { %2529 = vpow2.f32 %v2484_v19 }
  0xe8   :  { %v582_v44 = vpop.f32.mrf.mxu2 }
  0xe9   :  { %v390_v10 = vpop.f32.mrf.mxu0  ;;  %v431_v21 = vpop.f32.mrf.mxu1 }
  0xea   :  { %v3825_v4 = vadd.f32 %v390_v10, %v3800_v23  ;;  %v3828_v43 = vadd.f32 %v431_v21, %v3803_v35  ;;  %v708_v21 = vpop.f32.mrf.mxu3 }
  0xeb   :  { %v2528_v41 = vpop.eup %2527  ;;  %v755_v37 = vadd.f32 %v708_v21, %v365_v28 }
  0xec   :  { %5488 = vst [vmem:[#allocation84_spill] sm:$0xff] %v3825_v4  ;;  %v2530_v36 = vpop.eup %2529  ;;  %v593_v47 = vadd.f32 1.0, %v2528_v41  ;;  %v3837_v41 = vld [vmem:[#allocation9] ss:$0 sm:$0xff] }
  0xed   :  { %5489 = vst [vmem:[#allocation85_spill] sm:$0xff] %v3828_v43  ;;  %v613_v39 = vadd.f32 1.0, %v2530_v36 }
  0xee   :  { %2531 = vrcp.f32 %v593_v47  ;;  %v605_v31 = vand.u32 2147483648, %v593_v47  ;;  %vm599_vm2 = vweird.f32 %v593_v47 }
  0xef   :  { %2533 = vrcp.f32 %v613_v39  ;;  %vm619_vm6 = vweird.f32 %v613_v39 }
  0xf0   :  { %v606_v28 = vor.u32 1.1754944e-38, %v605_v31 }
  0xf1   :  { %v393_v46 = vpop.f32.mrf.mxu0  ;;  %v434_v63 = vpop.f32.mrf.mxu1 }
  0xf2   :  { %v3831_v38 = vadd.f32 %v393_v46, %v3800_v23  ;;  %v3834_v60 = vadd.f32 %v434_v63, %v3803_v35  ;;  %v603_v63 = vand.u32 2147483647, %v593_v47 }
  0xf4   :  { %5490 = vst [vmem:[#allocation86_spill] sm:$0xff] %v3831_v38  ;;  %v2532_v19 = vpop.eup %2531  ;;  %vm604_vm4 = vcmp.eq.f32.partialorder %v603_v63, 8.507059e+37 }
  0xf5   :  { %5491 = vst [vmem:[#allocation87_spill] sm:$0xff] %v3834_v60  ;;  %v2534_v10 = vpop.eup %2533  ;;  %v595_v40 = vmul.f32 %v2532_v19, %v593_v47  ;;  %vm600_vm1 = vweird.f32 %v2532_v19 }
  0xf6   :  { %v615_v43 = vmul.f32 %v2534_v10, %v613_v39  ;;  %vm601_vm3 = vmor %vm599_vm2, %vm600_vm1  ;;  %vm620_vm5 = vweird.f32 %v2534_v10 }
  0xf7   :  { %v596_v4 = vsub.f32 1.0, %v595_v40  ;;  %v632_v40 = vadd.f32 %v3837_v41, %v582_v44  ;;  %vm621_vm7 = vmor %vm619_vm6, %vm620_vm5 }
  0xf8   :  { %v616_v36 = vsub.f32 1.0, %v615_v43  ;;  %v2485_v43 = vmul.f32 -1.442695, %v755_v37 }
  0xf9   :  { %v396_v0 = vpop.f32.mrf.mxu0  ;;  %v437_v46 = vpop.f32.mrf.mxu1  ;;  %v597_v38 = vmul.f32 %v2532_v19, %v596_v4 }
  0xfa   :  { %v617_v60 = vmul.f32 %v2534_v10, %v616_v36  ;;  %v3840_v22 = vadd.f32 %v396_v0, %v3800_v23  ;;  %v3843_v57 = vadd.f32 %v437_v46, %v3803_v35  ;;  %v265_v36 = vadd.f32 %v3656_v1, %v3682_v17 }
  0xfb   :  { %v598_v34 = vadd.f32 %v2532_v19, %v597_v38  ;;  %v625_v0 = vand.u32 2147483648, %v613_v39  ;;  %v623_v46 = vand.u32 2147483647, %v613_v39  ;;  %2535 = vpow2.f32 %v2485_v43 }
  0xfc   :  { %5492 = vst [vmem:[#allocation88_spill] sm:$0xff] %v3840_v22  ;;  %v618_v26 = vadd.f32 %v2534_v10, %v617_v60 }
  0xfd   :  { %5493 = vst [vmem:[#allocation89_spill] sm:$0xff] %v3843_v57  ;;  %v602_v21 = vsel %vm601_vm3, %v2532_v19, %v598_v34  ;;  %v626_v19 = vor.u32 1.1754944e-38, %v625_v0  ;;  %vm624_vm8 = vcmp.eq.f32.partialorder %v623_v46, 8.507059e+37 }
  0xfe   :  { %v607_v4 = vsel %vm604_vm4, %v606_v28, %v602_v21  ;;  %v622_v37 = vsel %vm621_vm7, %v2534_v10, %v618_v26  ;;  %v5496_v28 = vld [vmem:[#allocation45_spill] sm:$0xff] }
  0xff   :  { %v633_v22 = vmul.f32 %v632_v40, %v607_v4  ;;  %v627_v1 = vsel %vm624_vm8, %v626_v19, %v622_v37 }
 0x100   :  { %v636_v63 = vsub.f32 1.0, %v627_v1  ;;  %v638_v26 = vmul.f32 %v627_v1, %v5496_v28 }
 0x101   :  { %v634_v47 = vadd.f32 %v633_v22, %v265_v36  ;;  %v399_v38 = vpop.f32.mrf.mxu0  ;;  %v440_v44 = vpop.f32.mrf.mxu1  ;;  %v588_v36 = vld [vmem:[%s5120_s1] sm:$0xff] }
 0x102   :  { %v3849_v31 = vadd.f32 %v399_v38, %v3800_v23  ;;  %v3852_v60 = vadd.f32 %v440_v44, %v3803_v35  ;;  %v2536_v17 = vpop.eup %2535 }
 0x103   :  { %2537 = vtanh.f32 %v634_v47  ;;  %v3854_v39 = vadd.f32 1.0, %v2536_v17 }
 0x104   :  { %5494 = vst [vmem:[#allocation90_spill] sm:$0xff] %v3849_v31 }
 0x105   :  { %5495 = vst [vmem:[#allocation91_spill] sm:$0xff] %v3852_v60  ;;  %2539 = vrcp.f32 %v3854_v39  ;;  %vm765_vm9 = vweird.f32 %v3854_v39 }
 0x109   :  { %v2538_v34 = vpop.eup %2537  ;;  %v402_v40 = vpop.f32.mrf.mxu0 }
 0x10a   :  { %v443_v22 = vpop.f32.mrf.mxu1  ;;  %v637_v43 = vmul.f32 %v2538_v34, %v636_v63  ;;  %v3858_v10 = vadd.f32 %v402_v40, %v3800_v23  ;;  %v5505_v34 = vld [vmem:[#allocation35_spill] sm:$0xff] }
 0x10b   :  { %v3861_v21 = vadd.f32 %v443_v22, %v3803_v35  ;;  %v2540_v44 = vpop.eup %2539  ;;  %v769_v22 = vand.u32 2147483647, %v3854_v39 }
 0x10c   :  { %v639_v4 = vadd.f32 %v638_v26, %v637_v43  ;;  %v761_v37 = vmul.f32 %v2540_v44, %v3854_v39  ;;  %vm766_vm10 = vweird.f32 %v2540_v44  ;;  %v3903_v43 = vld [vmem:[%s5130_s11] ss:$0 sm:$0xff] }
 0x10d   :  { %5506 = vst [vmem:[#allocation45_spill] sm:$0xff] %v3903_v43  ;;  %vm3906_vm11 = vmor %vm765_vm9, %vm766_vm10  ;;  %vm770_vm12 = vcmp.eq.f32.partialorder %v769_v22, 8.507059e+37 }
 0x10e   :  { %v640_v0 = vsub.f32 %v639_v4, %v5496_v28 }
 0x110   :  { %v641_v46 = vmul.f32 %v640_v0, %v588_v36  ;;  %v5510_v0 = vld [vmem:[#allocation38_spill] sm:$0xff] }
 0x111   :  { %v405_v47 = vpop.f32.mrf.mxu0  ;;  %v754_v36 = vld [vmem:[%s5120_s1 + $0x38] sm:$0xff] }
 0x112   :  { %v3869_v38 = vadd.f32 %v641_v46, %v5496_v28  ;;  %v406_v19 = vadd.f32 %v405_v47, %v3800_v23  ;;  %v446_v17 = vpop.f32.mrf.mxu1  ;;  %v5501_v23 = vld [vmem:[#allocation32_spill] sm:$0xff]  ;;  %v5507_v28 = vld [vmem:[#allocation39_spill] sm:$0xff] }
 0x113   :  { %v5511_v46 = vld [vmem:[#allocation44_spill] sm:$0xff]  ;;  %v5512_v47 = vld [vmem:[#allocation43_spill] sm:$0xff] }
 0x114   :  { %825 = vmatmul.f32.vlgmr.msrb.gmra.mxu2 %v3869_v38  ;;  %845 = vmatmul.f32.vlgmr.msrb.gmra.mxu3 %v3869_v38 }
 0x115   :  { %865 = vmatmul.f32.vlgmr.msrb.gmra.mxu0 %v3869_v38  ;;  %1079 = vmatpush.msrb.mxu2 %v3307_v53  ;;  %v5497_v53 = vld [vmem:[#allocation25_spill] sm:$0xff] }
 0x116   :  { %1154 = vmatpush.msrb.mxu3 %v3305_v52  ;;  %1174 = vmatpush.msrb.mxu0 %v5426_v51  ;;  %v762_v51 = vsub.f32 1.0, %v761_v37 }
 0x117   :  { %1080 = vmatpush.msrb.mxu2 %v3319_v56  ;;  %v5499_v56 = vld [vmem:[#allocation27_spill] sm:$0xff] }
 0x118   :  { %1155 = vmatpush.msrb.mxu3 %v3316_v55  ;;  %1175 = vmatpush.msrb.mxu0 %v5429_v7  ;;  %v5498_v55 = vld [vmem:[#allocation28_spill] sm:$0xff]  ;;  %v763_v7 = vmul.f32 %v2540_v44, %v762_v51 }
 0x119   :  { %v728_v1 = vpop.f32.mrf.mxu0  ;;  %1081 = vmatpush.msrb.mxu2 %v3327_v59  ;;  %v5500_v59 = vld [vmem:[#allocation26_spill] sm:$0xff] }
 0x11a   :  { %v775_v63 = vadd.f32 %v728_v1, %v406_v19  ;;  %1156 = vmatpush.msrb.mxu3 %v3325_v58  ;;  %1176 = vmatpush.msrb.mxu0 %v5432_v3  ;;  %v5502_v58 = vld [vmem:[#allocation31_spill] sm:$0xff]  ;;  %v5503_v3 = vld [vmem:[#allocation30_spill] sm:$0xff]  ;;  %v764_v40 = vadd.f32 %v2540_v44, %v763_v7  ;;  %v748_v4 = vpop.f32.mrf.mxu1  ;;  %v5520_v7 = vld [vmem:[#allocation56_spill] sm:$0xff] }
 0x11b   :  { %1082 = vmatpush.msrb.mxu2 %v3342_v62  ;;  %v771_v62 = vand.u32 2147483648, %v3854_v39  ;;  %v798_v19 = vadd.f32 %v3903_v43, %v748_v4  ;;  %v5513_v1 = vld [vmem:[#allocation47_spill] sm:$0xff] }
 0x11c   :  { %v2486_v52 = vmul.f32 -1.442695, %v775_v63  ;;  %1157 = vmatpush.msrb.mxu3 %v3339_v61  ;;  %1177 = vmatpush.msrb.mxu0 %v5497_v53  ;;  %v5504_v61 = vld [vmem:[#allocation36_spill] sm:$0xff]  ;;  %v768_v37 = vsel %vm3906_vm11, %v2540_v44, %v764_v40  ;;  %v5514_v63 = vld [vmem:[#allocation46_spill] sm:$0xff]  ;;  %v5517_v44 = vld [vmem:[#allocation55_spill] sm:$0xff] }
 0x11d   :  { %1083 = vmatpush.msrb.mxu2 %v5498_v55  ;;  %v772_v39 = vor.u32 1.1754944e-38, %v771_v62  ;;  %v5518_v55 = vld [vmem:[#allocation54_spill] sm:$0xff] }
 0x11e   :  { %2541 = vpow2.f32 %v2486_v52  ;;  %1158 = vmatpush.msrb.mxu3 %v5499_v56  ;;  %1178 = vmatpush.msrb.mxu0 %v5500_v59  ;;  %v5516_v52 = vld [vmem:[#allocation50_spill] sm:$0xff]  ;;  %v5519_v59 = vld [vmem:[#allocation57_spill] sm:$0xff] }
 0x11f   :  { %1084 = vmatpush.msrb.mxu2 %v5501_v23  ;;  %v773_v51 = vsel %vm770_vm12, %v772_v39, %v768_v37  ;;  %v3957_v39 = vld [vmem:[#allocation7 + $0x170] sm:$0xff] }
 0x120   :  { %1159 = vmatpush.msrb.mxu3 %v5502_v58  ;;  %1179 = vmatpush.msrb.mxu0 %v5503_v3  ;;  %v799_v53 = vmul.f32 %v798_v19, %v773_v51  ;;  %v5521_v58 = vld [vmem:[#allocation59_spill] sm:$0xff]  ;;  %v5523_v3 = vld [vmem:[#allocation65_spill] sm:$0xff]  ;;  %v5527_v51 = vld [vmem:[#allocation42_spill] sm:$0xff] }
 0x121   :  { %1085 = vmatpush.msrb.mxu2 %v5504_v61  ;;  %v3963_v37 = vld [vmem:[#allocation7 + $0x150] sm:$0xff]  ;;  %v3966_v19 = vld [vmem:[#allocation7 + $0x158] sm:$0xff] }
 0x122   :  { %1160 = vmatpush.msrb.mxu3 %v5505_v34  ;;  %1180 = vmatpush.msrb.mxu0 %v5445_v12 }
 0x123   :  { %1086 = vmatpush.msrb.mxu2 %v5507_v28 }
 0x124   :  { %v2542_v26 = vpop.eup %2541  ;;  %1161 = vmatpush.msrb.mxu3 %v5510_v0  ;;  %1181 = vmatpush.msrb.mxu0 %v5448_v30  ;;  %v5515_v30 = vld [vmem:[#allocation51_spill] sm:$0xff] }
 0x125   :  { %v779_v12 = vadd.f32 1.0, %v2542_v26  ;;  %1087 = vmatpush.msrb.mxu2 %v5511_v46  ;;  %v3954_v46 = vld [vmem:[#allocation7 + $0x168] sm:$0xff] }
 0x126   :  { %1162 = vmatpush.msrb.mxu3 %v5512_v47  ;;  %1182 = vmatpush.msrb.mxu0 %v5451_v50  ;;  %v447_v50 = vadd.f32 %v446_v17, %v3803_v35  ;;  %v5522_v35 = vld [vmem:[#allocation58_spill] sm:$0xff]  ;;  %v3960_v47 = vld [vmem:[#allocation12 + $0x160] sm:$0xff] }
 0x127   :  { %2543 = vrcp.f32 %v779_v12  ;;  %1088 = vmatpush.msrb.mxu2 %v5513_v1  ;;  %v791_v17 = vand.u32 2147483648, %v779_v12  ;;  %v789_v61 = vand.u32 2147483647, %v779_v12  ;;  %vm785_vm14 = vweird.f32 %v779_v12  ;;  %v5526_v1 = vld [vmem:[#allocation40_spill] sm:$0xff] }
 0x128   :  { %1163 = vmatpush.msrb.mxu3 %v5514_v63  ;;  %1183 = vmatpush.msrb.mxu0 %v5452_v9  ;;  %v800_v23 = vadd.f32 %v799_v53, %v447_v50  ;;  %v3970_v63 = vld [vmem:[#allocation7 + $0x138] sm:$0xff]  ;;  %v3980_v50 = vld [vmem:[#allocation7 + $0x128] sm:$0xff] }
 0x129   :  { %1089 = vmatpush.msrb.mxu2 %v5515_v30  ;;  %vm790_vm0 = vcmp.eq.f32.partialorder %v789_v61, 8.507059e+37  ;;  %v3973_v30 = vld [vmem:[#allocation7 + $0x140] sm:$0xff]  ;;  %v4015_v61 = vld [vmem:[#allocation7 + $0xb0] sm:$0xff] }
 0x12a   :  { %1164 = vmatpush.msrb.mxu3 %v5516_v52  ;;  %1184 = vmatpush.msrb.mxu0 %v5457_v8  ;;  %2545 = vtanh.f32 %v800_v23  ;;  %v3977_v52 = vld [vmem:[#allocation7 + $0x120] sm:$0xff]  ;;  %v3998_v23 = vld [vmem:[#allocation7 + $0xd8] sm:$0xff]  ;;  %5536 = vst [vmem:[#allocation26_spill] sm:$0xff] %v4015_v61 }
 0x12b   :  { %1090 = vmatpush.msrb.mxu2 %v5517_v44  ;;  %v5528_v53 = vld [vmem:[#allocation49_spill] sm:$0xff]  ;;  %v3984_v44 = vld [vmem:[#allocation7 + $0x108] sm:$0xff] }
 0x12c   :  { %1165 = vmatpush.msrb.mxu3 %v5518_v55  ;;  %1185 = vmatpush.msrb.mxu0 %v5459_v24  ;;  %v3987_v55 = vld [vmem:[#allocation7 + $0x110] sm:$0xff] }
 0x12d   :  { %v2544_v56 = vpop.eup %2543  ;;  %1091 = vmatpush.msrb.mxu2 %v5519_v59  ;;  %v3991_v59 = vld [vmem:[#allocation7 + $0xf0] sm:$0xff] }
 0x12e   :  { %v781_v9 = vmul.f32 %v2544_v56, %v779_v12  ;;  %1166 = vmatpush.msrb.mxu3 %v5520_v7  ;;  %1186 = vmatpush.msrb.mxu0 %v5460_v13  ;;  %vm786_vm13 = vweird.f32 %v2544_v56  ;;  %v5524_v13 = vld [vmem:[#allocation67_spill] sm:$0xff]  ;;  %v5530_v7 = vld [vmem:[#allocation61_spill] sm:$0xff] }
 0x12f   :  { %1092 = vmatpush.msrb.mxu2 %v5521_v58  ;;  %vm787_vm15 = vmor %vm785_vm14, %vm786_vm13  ;;  %v3951_v12 = vld [vmem:[#allocation12 + $0x178] sm:$0xff]  ;;  %v4001_v58 = vld [vmem:[#allocation7 + $0xe0] sm:$0xff] }
 0x130   :  { %v782_v8 = vsub.f32 1.0, %v781_v9  ;;  %1167 = vmatpush.msrb.mxu3 %v5522_v35  ;;  %1187 = vmatpush.msrb.mxu0 %v5461_v16  ;;  %v792_v16 = vor.u32 1.1754944e-38, %v791_v17  ;;  %v2546_v28 = vpop.eup %2545  ;;  %v3994_v9 = vld [vmem:[#allocation7 + $0xf8] sm:$0xff]  ;;  %v4005_v35 = vld [vmem:[#allocation7 + $0xc0] sm:$0xff]  ;;  %v4008_v17 = vld [vmem:[#allocation7 + $0xc8] sm:$0xff] }
 0x131   :  { %1093 = vmatpush.msrb.mxu2 %v5523_v3  ;;  %5532 = vst [vmem:[#allocation25_spill] sm:$0xff] %v4005_v35  ;;  %v5534_v3 = vld [vmem:[#allocation70_spill] sm:$0xff] }
 0x132   :  { %v783_v24 = vmul.f32 %v2544_v56, %v782_v8  ;;  %1168 = vmatpush.msrb.mxu3 %v5446_v48  ;;  %1188 = vmatpush.msrb.mxu0 %v5465_v11  ;;  %v5525_v48 = vld [vmem:[#allocation68_spill] sm:$0xff]  ;;  %v5531_v8 = vld [vmem:[#allocation63_spill] sm:$0xff]  ;;  %5533 = vst [vmem:[#allocation28_spill] sm:$0xff] %v4008_v17 }
 0x133   :  { %1094 = vmatpush.msrb.mxu2 %v5524_v13  ;;  %v4019_v13 = vld [vmem:[#allocation7 + $0x90] sm:$0xff] }
 0x134   :  { %v784_v62 = vadd.f32 %v2544_v56, %v783_v24  ;;  %1169 = vmatpush.msrb.mxu3 %v5449_v15  ;;  %1189 = vmatpush.msrb.mxu0 %v3546_v54  ;;  %v4012_v24 = vld [vmem:[#allocation7 + $0xa8] sm:$0xff]  ;;  %5537 = vst [vmem:[#allocation32_spill] sm:$0xff] %v4019_v13 }
 0x135   :  { %5535 = vst [vmem:[#allocation27_spill] sm:$0xff] %v4012_v24 }
 0x136   :  { %v788_v34 = vsel %vm787_vm15, %v2544_v56, %v784_v62  ;;  %v5529_v56 = vld [vmem:[#allocation53_spill] sm:$0xff] }
 0x137   :  { %v793_v40 = vsel %vm790_vm0, %v792_v16, %v788_v34  ;;  %v4022_v62 = vld [vmem:[#allocation7 + $0x98] sm:$0xff]  ;;  %v4029_v34 = vld [vmem:[#allocation7 + $0x80] sm:$0xff] }
 0x138   :  { %v802_v22 = vsub.f32 1.0, %v793_v40  ;;  %v804_v4 = vmul.f32 %v793_v40, %v5525_v48  ;;  %5538 = vst [vmem:[#allocation31_spill] sm:$0xff] %v4022_v62  ;;  %v4026_v16 = vld [vmem:[#allocation7 + $0x78] sm:$0xff]  ;;  %v4036_v40 = vld [vmem:[#allocation7 + $0x68] sm:$0xff] }
 0x139   :  { %5539 = vst [vmem:[#allocation30_spill] sm:$0xff] %v4026_v16 }
 0x13a   :  { %v803_v26 = vmul.f32 %v2546_v28, %v802_v22  ;;  %5540 = vst [vmem:[#allocation36_spill] sm:$0xff] %v4029_v34  ;;  %v4043_v22 = vld [vmem:[#allocation7 + $0x50] sm:$0xff]  ;;  %v4050_v28 = vld [vmem:[#allocation7 + $0x38] sm:$0xff] }
 0x13b   :  { %5542 = vst [vmem:[#allocation39_spill] sm:$0xff] %v4036_v40 }
 0x13c   :  { %v805_v11 = vadd.f32 %v804_v4, %v803_v26  ;;  %5544 = vst [vmem:[#allocation44_spill] sm:$0xff] %v4043_v22  ;;  %v4057_v26 = vld [vmem:[#allocation7 + $0x20] sm:$0xff] }
 0x13d   :  { %5546 = vst [vmem:[#allocation47_spill] sm:$0xff] %v4050_v28 }
 0x13e   :  { %v806_v0 = vsub.f32 %v805_v11, %v5525_v48  ;;  %5548 = vst [vmem:[#allocation51_spill] sm:$0xff] %v4057_v26  ;;  %v5552_v11 = vld [vmem:[#allocation23_spill] sm:$0xff] }
 0x140   :  { %v807_v15 = vmul.f32 %v806_v0, %v754_v36  ;;  %v227_v36 = vadd.f32 %v5552_v11, %v3714_v20 }
 0x142   :  { %v3946_v54 = vadd.f32 %v807_v15, %v5525_v48  ;;  %v4064_v48 = vld [vmem:[#allocation7 + $0x8] sm:$0xff] }
 0x143   :  { %5550 = vst [vmem:[#allocation55_spill] sm:$0xff] %v4064_v48 }
 0x144   :  { %940 = vmatmul.f32.vlgmr.msrb.gmra.mxu1 %v3946_v54  ;;  %960 = vmatmul.f32.vlgmr.msra.gmra.mxu2 %v3946_v54 }
 0x145   :  { %980 = vmatmul.f32.vlgmr.msra.gmra.mxu3 %v3946_v54  ;;  %1194 = vmatpush.msrb.mxu1 %v3951_v12 }
 0x146   :  { %1269 = vmatpush.msra.mxu2 %v3954_v46  ;;  %1289 = vmatpush.msra.mxu3 %v3957_v39 }
 0x147   :  { %1195 = vmatpush.msrb.mxu1 %v3960_v47 }
 0x148   :  { %1270 = vmatpush.msra.mxu2 %v3963_v37  ;;  %1290 = vmatpush.msra.mxu3 %v3966_v19 }
 0x149   :  { %1196 = vmatpush.msrb.mxu1 %v5526_v1 }
 0x14a   :  { %1271 = vmatpush.msra.mxu2 %v3970_v63  ;;  %1291 = vmatpush.msra.mxu3 %v3973_v30 }
 0x14b   :  { %1197 = vmatpush.msrb.mxu1 %v5527_v51 }
 0x14c   :  { %1272 = vmatpush.msra.mxu2 %v3977_v52  ;;  %1292 = vmatpush.msra.mxu3 %v3980_v50 }
 0x14d   :  { %1198 = vmatpush.msrb.mxu1 %v5528_v53 }
 0x14e   :  { %1273 = vmatpush.msra.mxu2 %v3984_v44  ;;  %1293 = vmatpush.msra.mxu3 %v3987_v55 }
 0x14f   :  { %1199 = vmatpush.msrb.mxu1 %v5529_v56 }
 0x150   :  { %1274 = vmatpush.msra.mxu2 %v3991_v59  ;;  %1294 = vmatpush.msra.mxu3 %v3994_v9 }
 0x151   :  { %1200 = vmatpush.msrb.mxu1 %v5530_v7 }
 0x152   :  { %1275 = vmatpush.msra.mxu2 %v3998_v23  ;;  %1295 = vmatpush.msra.mxu3 %v4001_v58 }
 0x153   :  { %1201 = vmatpush.msrb.mxu1 %v5531_v8 }
 0x154   :  { %1276 = vmatpush.msra.mxu2 %v4005_v35  ;;  %1296 = vmatpush.msra.mxu3 %v4008_v17 }
 0x155   :  { %1202 = vmatpush.msrb.mxu1 %v5534_v3 }
 0x156   :  { %1277 = vmatpush.msra.mxu2 %v4012_v24  ;;  %1297 = vmatpush.msra.mxu3 %v4015_v61 }
 0x157   :  { %1203 = vmatpush.msrb.mxu1 %v3517_v6  ;;  %v4033_v6 = vld [vmem:[#allocation7 + $0x60] sm:$0xff] }
 0x158   :  { %1278 = vmatpush.msra.mxu2 %v4019_v13  ;;  %1298 = vmatpush.msra.mxu3 %v4022_v62  ;;  %5541 = vst [vmem:[#allocation35_spill] sm:$0xff] %v4033_v6 }
 0x159   :  { %1204 = vmatpush.msrb.mxu1 %v5458_v14  ;;  %v4040_v14 = vld [vmem:[#allocation7 + $0x48] sm:$0xff] }
 0x15a   :  { %1279 = vmatpush.msra.mxu2 %v4026_v16  ;;  %1299 = vmatpush.msra.mxu3 %v4029_v34  ;;  %5543 = vst [vmem:[#allocation38_spill] sm:$0xff] %v4040_v14 }
 0x15b   :  { %1205 = vmatpush.msrb.mxu1 %v3532_v25  ;;  %v4047_v25 = vld [vmem:[#allocation7 + $0x30] sm:$0xff] }
 0x15c   :  { %1280 = vmatpush.msra.mxu2 %v4033_v6  ;;  %1300 = vmatpush.msra.mxu3 %v4036_v40  ;;  %5545 = vst [vmem:[#allocation43_spill] sm:$0xff] %v4047_v25 }
 0x15d   :  { %1206 = vmatpush.msrb.mxu1 %v3542_v45  ;;  %v4054_v45 = vld [vmem:[#allocation7 + $0x18] sm:$0xff] }
 0x15e   :  { %1281 = vmatpush.msra.mxu2 %v4040_v14  ;;  %1301 = vmatpush.msra.mxu3 %v4043_v22  ;;  %5547 = vst [vmem:[#allocation46_spill] sm:$0xff] %v4054_v45 }
 0x15f   :  { %1207 = vmatpush.msrb.mxu1 %v3548_v18  ;;  %v4061_v18 = vld [vmem:[#allocation7] sm:$0xff] }
 0x160   :  { %1282 = vmatpush.msra.mxu2 %v4047_v25  ;;  %1302 = vmatpush.msra.mxu3 %v4050_v28  ;;  %5549 = vst [vmem:[#allocation50_spill] sm:$0xff] %v4061_v18 }
 0x161   :  { %1208 = vmatpush.msrb.mxu1 %v3557_v33  ;;  %v5551_v33 = vld [vmem:[#allocation20_spill] sm:$0xff] }
 0x162   :  { %1283 = vmatpush.msra.mxu2 %v4054_v45  ;;  %1303 = vmatpush.msra.mxu3 %v4057_v26  ;;  %v186_v4 = vadd.f32 %v5551_v33, %v3712_v27 }
 0x163   :  { %1209 = vmatpush.msrb.mxu1 %v3560_v2 }
 0x164   :  { %1284 = vmatpush.msra.mxu2 %v4061_v18  ;;  %1304 = vmatpush.msra.mxu3 %v4064_v48 }
 0x197   :  { %v826_v0 = vpop.f32.mrf.mxu2  ;;  %v846_v15 = vpop.f32.mrf.mxu3 }
 0x198   :  { %v873_v1 = vadd.f32 %v826_v0, %v186_v4  ;;  %v893_v51 = vadd.f32 %v846_v15, %v227_v36  ;;  %v866_v36 = vpop.f32.mrf.mxu0 }
 0x19a   :  { %v2487_v53 = vmul.f32 -1.442695, %v873_v1  ;;  %v2488_v2 = vmul.f32 -1.442695, %v893_v51  ;;  %v913_v51 = vadd.f32 %v3837_v41, %v866_v36 }
 0x19c   :  { %2547 = vpow2.f32 %v2487_v53 }
 0x19d   :  { %2549 = vpow2.f32 %v2488_v2 }
 0x1a2   :  { %v2548_v56 = vpop.eup %2547 }
 0x1a3   :  { %v2550_v7 = vpop.eup %2549  ;;  %v877_v8 = vadd.f32 1.0, %v2548_v56 }
 0x1a4   :  { %v897_v3 = vadd.f32 1.0, %v2550_v7 }
 0x1a5   :  { %2551 = vrcp.f32 %v877_v8  ;;  %v889_v11 = vand.u32 2147483648, %v877_v8  ;;  %v887_v4 = vand.u32 2147483647, %v877_v8  ;;  %vm883_vm2 = vweird.f32 %v877_v8 }
 0x1a6   :  { %2553 = vrcp.f32 %v897_v3  ;;  %vm903_vm6 = vweird.f32 %v897_v3 }
 0x1a7   :  { %v890_v1 = vor.u32 1.1754944e-38, %v889_v11  ;;  %vm888_vm4 = vcmp.eq.f32.partialorder %v887_v4, 8.507059e+37 }
 0x1ab   :  { %v2552_v57 = vpop.eup %2551 }
 0x1ac   :  { %v2554_v49 = vpop.eup %2553  ;;  %v879_v33 = vmul.f32 %v2552_v57, %v877_v8  ;;  %vm884_vm1 = vweird.f32 %v2552_v57 }
 0x1ad   :  { %v899_v5 = vmul.f32 %v2554_v49, %v897_v3  ;;  %vm885_vm3 = vmor %vm883_vm2, %vm884_vm1  ;;  %vm904_vm5 = vweird.f32 %v2554_v49 }
 0x1ae   :  { %v880_v60 = vsub.f32 1.0, %v879_v33  ;;  %v909_v33 = vand.u32 2147483648, %v897_v3  ;;  %vm905_vm7 = vmor %vm903_vm6, %vm904_vm5 }
 0x1af   :  { %v900_v32 = vsub.f32 1.0, %v899_v5  ;;  %v907_v5 = vand.u32 2147483647, %v897_v3  ;;  %v872_v3 = vld [vmem:[%s5120_s1 + $0x8] sm:$0xff] }
 0x1b0   :  { %v881_v31 = vmul.f32 %v2552_v57, %v880_v60  ;;  %v5553_v60 = vld [vmem:[#allocation22_spill] sm:$0xff] }
 0x1b1   :  { %v901_v0 = vmul.f32 %v2554_v49, %v900_v32  ;;  %v910_v32 = vor.u32 1.1754944e-38, %v909_v33  ;;  %vm908_vm8 = vcmp.eq.f32.partialorder %v907_v5, 8.507059e+37  ;;  %v4091_v33 = vld [vmem:[#allocation12 + $0x168] sm:$0xff]  ;;  %v4101_v5 = vld [vmem:[#allocation12 + $0x150] sm:$0xff] }
 0x1b2   :  { %v882_v15 = vadd.f32 %v2552_v57, %v881_v31 }
 0x1b3   :  { %v902_v56 = vadd.f32 %v2554_v49, %v901_v0 }
 0x1b4   :  { %v886_v53 = vsel %vm885_vm3, %v2552_v57, %v882_v15 }
 0x1b5   :  { %v891_v2 = vsel %vm888_vm4, %v890_v1, %v886_v53  ;;  %v906_v20 = vsel %vm905_vm7, %v2554_v49, %v902_v56  ;;  %v4086_v56 = vld [vmem:[#allocation7 + $0x178] sm:$0xff] }
 0x1b6   :  { %v914_v7 = vmul.f32 %v913_v51, %v891_v2  ;;  %v911_v31 = vsel %vm908_vm8, %v910_v32, %v906_v20  ;;  %v4107_v32 = vld [vmem:[#allocation7 + $0x148] sm:$0xff] }
 0x1b7   :  { %v917_v8 = vsub.f32 1.0, %v911_v31  ;;  %v919_v57 = vmul.f32 %v911_v31, %v3869_v38  ;;  %v4110_v31 = vld [vmem:[#allocation12 + $0x138] sm:$0xff] }
 0x1b8   :  { %v915_v29 = vadd.f32 %v914_v7, %v5553_v60  ;;  %v4104_v60 = vld [vmem:[#allocation12 + $0x158] sm:$0xff]  ;;  %5554 = vst [vmem:[#allocation54_spill] sm:$0xff] %v4110_v31 }
 0x1ba   :  { %2555 = vtanh.f32 %v915_v29 }
 0x1c0   :  { %v2556_v11 = vpop.eup %2555 }
 0x1c1   :  { %v918_v36 = vmul.f32 %v2556_v11, %v917_v8  ;;  %v941_v4 = vpop.f32.mrf.mxu1  ;;  %v4113_v8 = vld [vmem:[#allocation12 + $0x140] sm:$0xff] }
 0x1c2   :  { %v988_v0 = vadd.f32 %v941_v4, %v3791_v42  ;;  %5555 = vst [vmem:[#allocation57_spill] sm:$0xff] %v4113_v8  ;;  %v4121_v4 = vld [vmem:[#allocation12 + $0x120] sm:$0xff] }
 0x1c3   :  { %v920_v15 = vadd.f32 %v919_v57, %v918_v36  ;;  %v4116_v36 = vld [vmem:[#allocation7 + $0x130] sm:$0xff]  ;;  %5557 = vst [vmem:[#allocation59_spill] sm:$0xff] %v4121_v4 }
 0x1c4   :  { %v2489_v1 = vmul.f32 -1.442695, %v988_v0  ;;  %5556 = vst [vmem:[#allocation56_spill] sm:$0xff] %v4116_v36  ;;  %v4124_v0 = vld [vmem:[#allocation12 + $0x128] sm:$0xff] }
 0x1c5   :  { %v921_v49 = vsub.f32 %v920_v15, %v3869_v38  ;;  %5558 = vst [vmem:[#allocation58_spill] sm:$0xff] %v4124_v0  ;;  %v4127_v15 = vld [vmem:[#allocation7 + $0x118] sm:$0xff] }
 0x1c6   :  { %2557 = vpow2.f32 %v2489_v1  ;;  %5559 = vst [vmem:[#allocation65_spill] sm:$0xff] %v4127_v15 }
 0x1c7   :  { %v961_v29 = vpop.f32.mrf.mxu2  ;;  %v922_v51 = vmul.f32 %v921_v49, %v872_v3  ;;  %v4131_v3 = vld [vmem:[#allocation12 + $0x108] sm:$0xff]  ;;  %v4134_v49 = vld [vmem:[#allocation12 + $0x110] sm:$0xff] }
 0x1c8   :  { %v1008_v20 = vadd.f32 %v961_v29, %v3858_v10  ;;  %v4094_v10 = vld [vmem:[#allocation12 + $0x170] sm:$0xff]  ;;  %5560 = vst [vmem:[#allocation67_spill] sm:$0xff] %v4131_v3 }
 0x1c9   :  { %v4081_v53 = vadd.f32 %v922_v51, %v3869_v38  ;;  %v4097_v38 = vld [vmem:[#allocation7 + $0x160] sm:$0xff]  ;;  %5561 = vst [vmem:[#allocation68_spill] sm:$0xff] %v4134_v49 }
 0x1ca   :  { %v2490_v2 = vmul.f32 -1.442695, %v1008_v20  ;;  %v4138_v51 = vld [vmem:[#allocation7 + $0x100] sm:$0xff] }
 0x1cb   :  { %1055 = vmatmul.f32.vlgmr.msra.gmra.mxu0 %v4081_v53  ;;  %1075 = vmatmul.f32.vlgmr.msra.gmra.mxu1 %v4081_v53  ;;  %5562 = vst [vmem:[#allocation40_spill] sm:$0xff] %v4138_v51  ;;  %v4141_v20 = vld [vmem:[#allocation12 + $0xf0] sm:$0xff] }
 0x1cc   :  { %v2558_v42 = vpop.eup %2557  ;;  %2559 = vpow2.f32 %v2490_v2  ;;  %1095 = vmatmul.f32.vlgmr.msrb.gmra.mxu2 %v4081_v53  ;;  %1309 = vmatpush.msra.mxu0 %v4086_v56  ;;  %5563 = vst [vmem:[#allocation42_spill] sm:$0xff] %v4141_v20  ;;  %v4144_v2 = vld [vmem:[#allocation12 + $0xf8] sm:$0xff] }
 0x1cd   :  { %v4089_v7 = vadd.f32 1.0, %v2558_v42  ;;  %1384 = vmatpush.msra.mxu1 %v4091_v33  ;;  %1404 = vmatpush.msrb.mxu2 %v4094_v10  ;;  %5564 = vst [vmem:[#allocation49_spill] sm:$0xff] %v4144_v2 }
 0x1ce   :  { %1310 = vmatpush.msra.mxu0 %v4097_v38 }
 0x1cf   :  { %2561 = vrcp.f32 %v4089_v7  ;;  %1385 = vmatpush.msra.mxu1 %v4101_v5  ;;  %1405 = vmatpush.msrb.mxu2 %v4104_v60  ;;  %vm998_vm10 = vweird.f32 %v4089_v7 }
 0x1d0   :  { %1311 = vmatpush.msra.mxu0 %v4107_v32 }
 0x1d1   :  { %1386 = vmatpush.msra.mxu1 %v4110_v31  ;;  %1406 = vmatpush.msrb.mxu2 %v4113_v8  ;;  %v4183_v31 = vld [vmem:[#allocation12 + $0x90] sm:$0xff] }
 0x1d2   :  { %v2560_v11 = vpop.eup %2559  ;;  %1312 = vmatpush.msra.mxu0 %v4116_v36  ;;  %v4173_v36 = vld [vmem:[#allocation12 + $0xa8] sm:$0xff]  ;;  %5575 = vst [vmem:[#allocation95_spill] sm:$0xff] %v4183_v31 }
 0x1d3   :  { %v4119_v57 = vadd.f32 1.0, %v2560_v11  ;;  %1387 = vmatpush.msra.mxu1 %v4121_v4  ;;  %1407 = vmatpush.msrb.mxu2 %v4124_v0  ;;  %v4147_v11 = vld [vmem:[#allocation7 + $0xe8] sm:$0xff]  ;;  %v4161_v0 = vld [vmem:[#allocation12 + $0xc0] sm:$0xff]  ;;  %v4164_v4 = vld [vmem:[#allocation12 + $0xc8] sm:$0xff]  ;;  %5572 = vst [vmem:[#allocation92_spill] sm:$0xff] %v4173_v36 }
 0x1d4   :  { %1313 = vmatpush.msra.mxu0 %v4127_v15  ;;  %5565 = vst [vmem:[#allocation53_spill] sm:$0xff] %v4147_v11  ;;  %v1002_v15 = vand.u32 2147483647, %v4089_v7 }
 0x1d5   :  { %v2562_v1 = vpop.eup %2561  ;;  %2563 = vrcp.f32 %v4119_v57  ;;  %1388 = vmatpush.msra.mxu1 %v4131_v3  ;;  %1408 = vmatpush.msrb.mxu2 %v4134_v49  ;;  %v1004_v49 = vand.u32 2147483648, %v4089_v7  ;;  %v4151_v3 = vld [vmem:[#allocation12 + $0xd8] sm:$0xff]  ;;  %5569 = vst [vmem:[#allocation20_spill] sm:$0xff] %v4161_v0  ;;  %vm1018_vm14 = vweird.f32 %v4119_v57 }
 0x1d6   :  { %v994_v29 = vmul.f32 %v2562_v1, %v4089_v7  ;;  %1314 = vmatpush.msra.mxu0 %v4138_v51  ;;  %5566 = vst [vmem:[#allocation61_spill] sm:$0xff] %v4151_v3  ;;  %v4154_v51 = vld [vmem:[#allocation12 + $0xe0] sm:$0xff]  ;;  %vm999_vm9 = vweird.f32 %v2562_v1  ;;  %vm1003_vm12 = vcmp.eq.f32.partialorder %v1002_v15, 8.507059e+37 }
 0x1d7   :  { %1389 = vmatpush.msra.mxu1 %v4141_v20  ;;  %1409 = vmatpush.msrb.mxu2 %v4144_v2  ;;  %5567 = vst [vmem:[#allocation63_spill] sm:$0xff] %v4154_v51  ;;  %v4158_v2 = vld [vmem:[#allocation7 + $0xd0] sm:$0xff]  ;;  %vm1000_vm11 = vmor %vm998_vm10, %vm999_vm9 }
 0x1d8   :  { %v995_v42 = vsub.f32 1.0, %v994_v29  ;;  %1315 = vmatpush.msra.mxu0 %v4147_v11  ;;  %5568 = vst [vmem:[#allocation70_spill] sm:$0xff] %v4158_v2  ;;  %v981_v11 = vpop.f32.mrf.mxu3 }
 0x1d9   :  { %1390 = vmatpush.msra.mxu1 %v4151_v3  ;;  %1410 = vmatpush.msrb.mxu2 %v4154_v51  ;;  %5570 = vst [vmem:[#allocation23_spill] sm:$0xff] %v4164_v4  ;;  %v4169_v3 = vld [vmem:[#allocation7 + $0xb8] sm:$0xff]  ;;  %v1028_v7 = vadd.f32 %v3903_v43, %v981_v11  ;;  %v1022_v11 = vand.u32 2147483647, %v4119_v57 }
 0x1da   :  { %v996_v20 = vmul.f32 %v2562_v1, %v995_v42  ;;  %1316 = vmatpush.msra.mxu0 %v4158_v2  ;;  %5571 = vst [vmem:[#allocation22_spill] sm:$0xff] %v4169_v3  ;;  %v1005_v2 = vor.u32 1.1754944e-38, %v1004_v49  ;;  %v4186_v49 = vld [vmem:[#allocation12 + $0x98] sm:$0xff]  ;;  %v4210_v43 = vld [vmem:[#allocation12 + $0x60] sm:$0xff] }
 0x1db   :  { %v2564_v29 = vpop.eup %2563  ;;  %1391 = vmatpush.msra.mxu1 %v4161_v0  ;;  %1411 = vmatpush.msrb.mxu2 %v4164_v4  ;;  %v4176_v0 = vld [vmem:[#allocation12 + $0xb0] sm:$0xff]  ;;  %5576 = vst [vmem:[#allocation96_spill] sm:$0xff] %v4186_v49  ;;  %vm1023_vm0 = vcmp.eq.f32.partialorder %v1022_v11, 8.507059e+37 }
 0x1dc   :  { %v1014_v51 = vmul.f32 %v2564_v29, %v4119_v57  ;;  %v997_v42 = vadd.f32 %v2562_v1, %v996_v20  ;;  %1317 = vmatpush.msra.mxu0 %v4169_v3  ;;  %5573 = vst [vmem:[#allocation93_spill] sm:$0xff] %v4176_v0  ;;  %v4180_v20 = vld [vmem:[#allocation7 + $0xa0] sm:$0xff]  ;;  %vm1019_vm13 = vweird.f32 %v2564_v29  ;;  %v4236_v11 = vld [vmem:[#allocation7 + $0x28] sm:$0xff] }
 0x1dd   :  { %1392 = vmatpush.msra.mxu1 %v4173_v36  ;;  %1412 = vmatpush.msrb.mxu2 %v4176_v0  ;;  %5574 = vst [vmem:[#allocation94_spill] sm:$0xff] %v4180_v20  ;;  %vm4206_vm15 = vmor %vm1018_vm14, %vm1019_vm13 }
 0x1de   :  { %v1015_v4 = vsub.f32 1.0, %v1014_v51  ;;  %v1001_v8 = vsel %vm1000_vm11, %v2562_v1, %v997_v42  ;;  %1318 = vmatpush.msra.mxu0 %v4180_v20  ;;  %v1024_v1 = vand.u32 2147483648, %v4119_v57  ;;  %v4190_v51 = vld [vmem:[#allocation7 + $0x88] sm:$0xff]  ;;  %5583 = vst [vmem:[#allocation101_spill] sm:$0xff] %v4210_v43  ;;  %v4218_v57 = vld [vmem:[#allocation7 + $0x58] sm:$0xff] }
 0x1df   :  { %v1006_v3 = vsel %vm1003_vm12, %v1005_v2, %v1001_v8  ;;  %1393 = vmatpush.msra.mxu1 %v4183_v31  ;;  %1413 = vmatpush.msrb.mxu2 %v4186_v49  ;;  %5577 = vst [vmem:[#allocation97_spill] sm:$0xff] %v4190_v51  ;;  %v4194_v8 = vld [vmem:[#allocation12 + $0x78] sm:$0xff]  ;;  %v4197_v2 = vld [vmem:[#allocation12 + $0x80] sm:$0xff] }
 0x1e0   :  { %v1016_v36 = vmul.f32 %v2564_v29, %v1015_v4  ;;  %v1029_v15 = vmul.f32 %v1028_v7, %v1006_v3  ;;  %1319 = vmatpush.msra.mxu0 %v4190_v51  ;;  %5578 = vst [vmem:[#allocation98_spill] sm:$0xff] %v4194_v8  ;;  %v4202_v3 = vld [vmem:[#allocation7 + $0x70] sm:$0xff] }
 0x1e1   :  { %1394 = vmatpush.msra.mxu1 %v4194_v8  ;;  %5579 = vst [vmem:[#allocation99_spill] sm:$0xff] %v4197_v2  ;;  %1414 = vmatpush.msrb.mxu2 %v4197_v2  ;;  %v4213_v8 = vld [vmem:[#allocation12 + $0x68] sm:$0xff]  ;;  %v4242_v7 = vld [vmem:[#allocation12 + $0x20] sm:$0xff] }
 0x1e2   :  { %v1017_v42 = vadd.f32 %v2564_v29, %v1016_v36  ;;  %v1030_v4 = vadd.f32 %v1029_v15, %v3861_v21  ;;  %5580 = vst [vmem:[#allocation100_spill] sm:$0xff] %v4202_v3  ;;  %1320 = vmatpush.msra.mxu0 %v4202_v3  ;;  %v1025_v36 = vor.u32 1.1754944e-38, %v1024_v1  ;;  %v4221_v15 = vld [vmem:[#allocation12 + $0x48] sm:$0xff]  ;;  %v4224_v3 = vld [vmem:[#allocation12 + $0x50] sm:$0xff]  ;;  %v4233_v1 = vld [vmem:[#allocation12 + $0x38] sm:$0xff] }
 0x1e3   :  { %1395 = vmatpush.msra.mxu1 %v4210_v43  ;;  %5584 = vst [vmem:[#allocation102_spill] sm:$0xff] %v4213_v8  ;;  %1415 = vmatpush.msrb.mxu2 %v4213_v8  ;;  %v4227_v8 = vld [vmem:[#allocation7 + $0x40] sm:$0xff] }
 0x1e4   :  { %v1021_v21 = vsel %vm4206_vm15, %v2564_v29, %v1017_v42  ;;  %2565 = vtanh.f32 %v1030_v4  ;;  %1321 = vmatpush.msra.mxu0 %v4218_v57  ;;  %5585 = vst [vmem:[#allocation103_spill] sm:$0xff] %v4221_v15  ;;  %v4230_v29 = vld [vmem:[#allocation12 + $0x30] sm:$0xff]  ;;  %v4239_v4 = vld [vmem:[#allocation12 + $0x18] sm:$0xff] }
 0x1e5   :  { %1396 = vmatpush.msra.mxu1 %v4221_v15  ;;  %5586 = vst [vmem:[#allocation104_spill] sm:$0xff] %v4224_v3  ;;  %1416 = vmatpush.msrb.mxu2 %v4224_v3  ;;  %v1026_v43 = vsel %vm1023_vm0, %v1025_v36, %v1021_v21  ;;  %v4245_v21 = vld [vmem:[#allocation7 + $0x10] sm:$0xff] }
 0x1e6   :  { %5587 = vst [vmem:[#allocation105_spill] sm:$0xff] %v4227_v8  ;;  %1322 = vmatpush.msra.mxu0 %v4227_v8  ;;  %v1032_v42 = vsub.f32 1.0, %v1026_v43  ;;  %v4249_v8 = vld [vmem:[#allocation12] sm:$0xff] }
 0x1e7   :  { %5588 = vst [vmem:[#allocation106_spill] sm:$0xff] %v4230_v29  ;;  %1397 = vmatpush.msra.mxu1 %v4230_v29  ;;  %1417 = vmatpush.msrb.mxu2 %v4233_v1 }
 0x1e8   :  { %5589 = vst [vmem:[#allocation107_spill] sm:$0xff] %v4233_v1  ;;  %1323 = vmatpush.msra.mxu0 %v4236_v11  ;;  %v1034_v1 = vmul.f32 %v1026_v43, %v3946_v54  ;;  %v4271_v43 = vld [vmem:[#allocation12 + $0x148] sm:$0xff] }
 0x1e9   :  { %5590 = vst [vmem:[#allocation108_spill] sm:$0xff] %v4236_v11  ;;  %1398 = vmatpush.msra.mxu1 %v4239_v4  ;;  %1418 = vmatpush.msrb.mxu2 %v4242_v7  ;;  %v4252_v11 = vld [vmem:[#allocation12 + $0x8] sm:$0xff] }
 0x1ea   :  { %5591 = vst [vmem:[#allocation109_spill] sm:$0xff] %v4239_v4  ;;  %v2566_v36 = vpop.eup %2565  ;;  %1324 = vmatpush.msra.mxu0 %v4245_v21 }
 0x1eb   :  { %5592 = vst [vmem:[#allocation110_spill] sm:$0xff] %v4242_v7  ;;  %v1033_v29 = vmul.f32 %v2566_v36, %v1032_v42  ;;  %1399 = vmatpush.msra.mxu1 %v4249_v8  ;;  %1419 = vmatpush.msrb.mxu2 %v4252_v11  ;;  %v987_v7 = vld [vmem:[%s5120_s1 + $0x30] sm:$0xff] }
 0x1ec   :  { %v4311_v36 = vld [vmem:[#allocation12 + $0x88] sm:$0xff] }
 0x1ed   :  { %v1035_v4 = vadd.f32 %v1034_v1, %v1033_v29  ;;  %v4291_v29 = vld [vmem:[#allocation12 + $0xe8] sm:$0xff]  ;;  %v4296_v1 = vld [vmem:[#allocation12 + $0xd0] sm:$0xff]  ;;  %5595 = vst [vmem:[#allocation113_spill] sm:$0xff] %v4311_v36 }
 0x1ef   :  { %v1036_v3 = vsub.f32 %v1035_v4, %v3946_v54  ;;  %v4301_v4 = vld [vmem:[#allocation12 + $0xb8] sm:$0xff] }
 0x1f0   :  { %5593 = vst [vmem:[#allocation111_spill] sm:$0xff] %v4301_v4 }
 0x1f1   :  { %v1037_v15 = vmul.f32 %v1036_v3, %v987_v7  ;;  %v4281_v3 = vld [vmem:[#allocation12 + $0x118] sm:$0xff]  ;;  %v4306_v7 = vld [vmem:[#allocation12 + $0xa0] sm:$0xff] }
 0x1f2   :  { %5594 = vst [vmem:[#allocation112_spill] sm:$0xff] %v4306_v7 }
 0x1f3   :  { %v4260_v42 = vadd.f32 %v1037_v15, %v3946_v54  ;;  %v4276_v54 = vld [vmem:[#allocation12 + $0x130] sm:$0xff]  ;;  %v4286_v15 = vld [vmem:[#allocation12 + $0x100] sm:$0xff] }
 0x1f5   :  { %1170 = vmatmul.f32.vlgmr.msrb.gmra.mxu3 %v4260_v42  ;;  %1190 = vmatmul.f32.vlgmr.msrb.gmra.mxu0 %v4260_v42 }
 0x1f6   :  { %1210 = vmatmul.f32.vlgmr.msrb.gmra.mxu1 %v4260_v42  ;;  %1424 = vmatpush.msrb.mxu3 %v3951_v12 }
 0x1f7   :  { %1499 = vmatpush.msrb.mxu0 %v3954_v46  ;;  %1519 = vmatpush.msrb.mxu1 %v3957_v39 }
 0x1f8   :  { %1425 = vmatpush.msrb.mxu3 %v3960_v47 }
 0x1f9   :  { %1500 = vmatpush.msrb.mxu0 %v3963_v37  ;;  %1520 = vmatpush.msrb.mxu1 %v3966_v19 }
 0x1fa   :  { %1426 = vmatpush.msrb.mxu3 %v4271_v43 }
 0x1fb   :  { %1501 = vmatpush.msrb.mxu0 %v3970_v63  ;;  %1521 = vmatpush.msrb.mxu1 %v3973_v30 }
 0x1fc   :  { %1427 = vmatpush.msrb.mxu3 %v4276_v54 }
 0x1fd   :  { %1502 = vmatpush.msrb.mxu0 %v3977_v52  ;;  %1522 = vmatpush.msrb.mxu1 %v3980_v50 }
 0x1fe   :  { %1428 = vmatpush.msrb.mxu3 %v4281_v3 }
 0x1ff   :  { %1503 = vmatpush.msrb.mxu0 %v3984_v44  ;;  %1523 = vmatpush.msrb.mxu1 %v3987_v55 }
 0x200   :  { %1429 = vmatpush.msrb.mxu3 %v4286_v15 }
 0x201   :  { %1504 = vmatpush.msrb.mxu0 %v3991_v59  ;;  %1524 = vmatpush.msrb.mxu1 %v3994_v9 }
 0x202   :  { %1430 = vmatpush.msrb.mxu3 %v4291_v29 }
 0x203   :  { %1505 = vmatpush.msrb.mxu0 %v3998_v23  ;;  %1525 = vmatpush.msrb.mxu1 %v4001_v58 }
 0x204   :  { %1431 = vmatpush.msrb.mxu3 %v4296_v1 }
 0x205   :  { %1506 = vmatpush.msrb.mxu0 %v4005_v35  ;;  %1526 = vmatpush.msrb.mxu1 %v4008_v17 }
 0x206   :  { %1432 = vmatpush.msrb.mxu3 %v4301_v4  ;;  %v4316_v4 = vld [vmem:[#allocation12 + $0x70] sm:$0xff] }
 0x207   :  { %1507 = vmatpush.msrb.mxu0 %v4012_v24  ;;  %1527 = vmatpush.msrb.mxu1 %v4015_v61  ;;  %5596 = vst [vmem:[#allocation114_spill] sm:$0xff] %v4316_v4 }
 0x208   :  { %1433 = vmatpush.msrb.mxu3 %v4306_v7  ;;  %v4321_v7 = vld [vmem:[#allocation12 + $0x58] sm:$0xff] }
 0x209   :  { %1508 = vmatpush.msrb.mxu0 %v4019_v13  ;;  %1528 = vmatpush.msrb.mxu1 %v4022_v62  ;;  %5597 = vst [vmem:[#allocation115_spill] sm:$0xff] %v4321_v7 }
 0x20a   :  { %1434 = vmatpush.msrb.mxu3 %v4311_v36  ;;  %v4326_v36 = vld [vmem:[#allocation12 + $0x40] sm:$0xff] }
 0x20b   :  { %1509 = vmatpush.msrb.mxu0 %v4026_v16  ;;  %1529 = vmatpush.msrb.mxu1 %v4029_v34  ;;  %5598 = vst [vmem:[#allocation116_spill] sm:$0xff] %v4326_v36 }
 0x20c   :  { %1435 = vmatpush.msrb.mxu3 %v4316_v4  ;;  %v4331_v4 = vld [vmem:[#allocation12 + $0x28] sm:$0xff] }
 0x20d   :  { %1510 = vmatpush.msrb.mxu0 %v4033_v6  ;;  %1530 = vmatpush.msrb.mxu1 %v4036_v40  ;;  %5599 = vst [vmem:[#allocation117_spill] sm:$0xff] %v4331_v4 }
 0x20e   :  { %1436 = vmatpush.msrb.mxu3 %v4321_v7  ;;  %v4336_v7 = vld [vmem:[#allocation12 + $0x10] sm:$0xff] }
 0x20f   :  { %1511 = vmatpush.msrb.mxu0 %v4040_v14  ;;  %1531 = vmatpush.msrb.mxu1 %v4043_v22  ;;  %5600 = vst [vmem:[#allocation118_spill] sm:$0xff] %v4336_v7  ;;  %v5603_v22 = vld [vmem:[#allocation29_spill] sm:$0xff] }
 0x210   :  { %1437 = vmatpush.msrb.mxu3 %v4326_v36 }
 0x211   :  { %1512 = vmatpush.msrb.mxu0 %v4047_v25  ;;  %1532 = vmatpush.msrb.mxu1 %v4050_v28  ;;  %v5601_v25 = vld [vmem:[#allocation18_spill] sm:$0xff]  ;;  %v5602_v28 = vld [vmem:[#allocation19_spill] sm:$0xff] }
 0x212   :  { %1438 = vmatpush.msrb.mxu3 %v4331_v4  ;;  %v189_v36 = vadd.f32 %v5601_v25, %v3712_v27  ;;  %v230_v14 = vadd.f32 %v5603_v22, %v5602_v28 }
 0x213   :  { %1513 = vmatpush.msrb.mxu0 %v4054_v45  ;;  %1533 = vmatpush.msrb.mxu1 %v4057_v26 }
 0x214   :  { %1439 = vmatpush.msrb.mxu3 %v4336_v7 }
 0x215   :  { %1514 = vmatpush.msrb.mxu0 %v4061_v18  ;;  %1534 = vmatpush.msrb.mxu1 %v4064_v48 }
 0x248   :  { %v1056_v40 = vpop.f32.mrf.mxu0  ;;  %v1076_v4 = vpop.f32.mrf.mxu1 }
 0x249   :  { %v1103_v6 = vadd.f32 %v1056_v40, %v189_v36  ;;  %v1123_v45 = vadd.f32 %v1076_v4, %v230_v14 }
 0x24b   :  { %v2491_v34 = vmul.f32 -1.442695, %v1103_v6  ;;  %v2492_v26 = vmul.f32 -1.442695, %v1123_v45 }
 0x24d   :  { %2567 = vpow2.f32 %v2491_v34 }
 0x24e   :  { %2569 = vpow2.f32 %v2492_v26 }
 0x24f   :  { %v1096_v14 = vpop.f32.mrf.mxu2 }
 0x250   :  { %v1143_v26 = vadd.f32 %v3837_v41, %v1096_v14 }
 0x253   :  { %v2568_v16 = vpop.eup %2567 }
 0x254   :  { %v2570_v7 = vpop.eup %2569  ;;  %v1107_v62 = vadd.f32 1.0, %v2568_v16 }
 0x255   :  { %v1127_v18 = vadd.f32 1.0, %v2570_v7 }
 0x256   :  { %2571 = vrcp.f32 %v1107_v62  ;;  %v1119_v28 = vand.u32 2147483648, %v1107_v62  ;;  %v1117_v40 = vand.u32 2147483647, %v1107_v62  ;;  %vm1113_vm2 = vweird.f32 %v1107_v62 }
 0x257   :  { %2573 = vrcp.f32 %v1127_v18  ;;  %v1139_v36 = vand.u32 2147483648, %v1127_v18  ;;  %vm1133_vm6 = vweird.f32 %v1127_v18 }
 0x258   :  { %v1120_v45 = vor.u32 1.1754944e-38, %v1119_v28  ;;  %vm1118_vm4 = vcmp.eq.f32.partialorder %v1117_v40, 8.507059e+37 }
 0x259   :  { %v1140_v35 = vor.u32 1.1754944e-38, %v1139_v36 }
 0x25c   :  { %v2572_v48 = vpop.eup %2571 }
 0x25d   :  { %v2574_v13 = vpop.eup %2573  ;;  %v1109_v27 = vmul.f32 %v2572_v48, %v1107_v62  ;;  %vm1114_vm1 = vweird.f32 %v2572_v48 }
 0x25e   :  { %v1129_v25 = vmul.f32 %v2574_v13, %v1127_v18  ;;  %vm1115_vm3 = vmor %vm1113_vm2, %vm1114_vm1  ;;  %vm1134_vm5 = vweird.f32 %v2574_v13 }
 0x25f   :  { %v1110_v61 = vsub.f32 1.0, %v1109_v27  ;;  %vm1135_vm7 = vmor %vm1133_vm6, %vm1134_vm5 }
 0x260   :  { %v1130_v22 = vsub.f32 1.0, %v1129_v25  ;;  %v1137_v25 = vand.u32 2147483647, %v1127_v18  ;;  %v1102_v18 = vld [vmem:[%s5120_s1 + $0x10] sm:$0xff] }
 0x261   :  { %v1111_v24 = vmul.f32 %v2572_v48, %v1110_v61  ;;  %v5604_v61 = vld [vmem:[#allocation33_spill] sm:$0xff] }
 0x262   :  { %v1131_v6 = vmul.f32 %v2574_v13, %v1130_v22  ;;  %vm1138_vm8 = vcmp.eq.f32.partialorder %v1137_v25, 8.507059e+37  ;;  %v5608_v25 = vld [vmem:[#allocation57_spill] sm:$0xff] }
 0x263   :  { %v1112_v34 = vadd.f32 %v2572_v48, %v1111_v24 }
 0x264   :  { %v1132_v4 = vadd.f32 %v2574_v13, %v1131_v6  ;;  %v5605_v6 = vld [vmem:[#allocation90_spill] sm:$0xff] }
 0x265   :  { %v1116_v16 = vsel %vm1115_vm3, %v2572_v48, %v1112_v34 }
 0x266   :  { %v1121_v7 = vsel %vm1118_vm4, %v1120_v45, %v1116_v16  ;;  %v1136_v22 = vsel %vm1135_vm7, %v2574_v13, %v1132_v4 }
 0x267   :  { %v1144_v27 = vmul.f32 %v1143_v26, %v1121_v7  ;;  %v1141_v24 = vsel %vm1138_vm8, %v1140_v35, %v1136_v22  ;;  %v5606_v35 = vld [vmem:[#allocation73_spill] sm:$0xff]  ;;  %v5609_v22 = vld [vmem:[#allocation56_spill] sm:$0xff] }
 0x268   :  { %v1147_v62 = vsub.f32 1.0, %v1141_v24  ;;  %v1149_v41 = vmul.f32 %v1141_v24, %v4081_v53 }
 0x269   :  { %v1145_v17 = vadd.f32 %v1144_v27, %v5604_v61 }
 0x26b   :  { %2575 = vtanh.f32 %v1145_v17 }
 0x271   :  { %v2576_v48 = vpop.eup %2575 }
 0x272   :  { %v1148_v28 = vmul.f32 %v2576_v48, %v1147_v62  ;;  %v1191_v40 = vpop.f32.mrf.mxu0  ;;  %v5610_v62 = vld [vmem:[#allocation59_spill] sm:$0xff]  ;;  %v5611_v48 = vld [vmem:[#allocation58_spill] sm:$0xff] }
 0x273   :  { %v1238_v14 = vadd.f32 %v1191_v40, %v5605_v6  ;;  %v5614_v40 = vld [vmem:[#allocation68_spill] sm:$0xff] }
 0x274   :  { %v1150_v34 = vadd.f32 %v1149_v41, %v1148_v28  ;;  %v5612_v28 = vld [vmem:[#allocation65_spill] sm:$0xff]  ;;  %v5613_v41 = vld [vmem:[#allocation67_spill] sm:$0xff] }
 0x275   :  { %v2494_v45 = vmul.f32 -1.442695, %v1238_v14  ;;  %v5615_v14 = vld [vmem:[#allocation40_spill] sm:$0xff] }
 0x276   :  { %v1151_v13 = vsub.f32 %v1150_v34, %v4081_v53  ;;  %v5616_v34 = vld [vmem:[#allocation42_spill] sm:$0xff] }
 0x277   :  { %2577 = vpow2.f32 %v2494_v45  ;;  %v5618_v45 = vld [vmem:[#allocation53_spill] sm:$0xff] }
 0x278   :  { %v1152_v17 = vmul.f32 %v1151_v13, %v1102_v18  ;;  %v1171_v16 = vpop.f32.mrf.mxu3  ;;  %v5617_v18 = vld [vmem:[#allocation49_spill] sm:$0xff] }
 0x279   :  { %v1218_v26 = vadd.f32 %v1171_v16, %v5606_v35  ;;  %v5620_v16 = vld [vmem:[#allocation63_spill] sm:$0xff]  ;;  %v5621_v35 = vld [vmem:[#allocation70_spill] sm:$0xff] }
 0x27a   :  { %v4355_v4 = vadd.f32 %v1152_v17, %v4081_v53  ;;  %v5607_v53 = vld [vmem:[#allocation54_spill] sm:$0xff]  ;;  %v5619_v17 = vld [vmem:[#allocation61_spill] sm:$0xff] }
 0x27b   :  { %v2493_v7 = vmul.f32 -1.442695, %v1218_v26 }
 0x27c   :  { %1285 = vmatmul.f32.vlgmr.msra.gmra.mxu2 %v4355_v4  ;;  %1305 = vmatmul.f32.vlgmr.msra.gmra.mxu3 %v4355_v4 }
 0x27d   :  { %v2578_v36 = vpop.eup %2577  ;;  %2579 = vpow2.f32 %v2493_v7  ;;  %1325 = vmatmul.f32.vlgmr.msra.gmra.mxu0 %v4355_v4  ;;  %1539 = vmatpush.msra.mxu2 %v4086_v56  ;;  %v5622_v7 = vld [vmem:[#allocation20_spill] sm:$0xff] }
 0x27e   :  { %v4361_v27 = vadd.f32 1.0, %v2578_v36  ;;  %1613 = vmatpush.msra.mxu3 %v4091_v33  ;;  %1633 = vmatpush.msra.mxu0 %v4094_v10  ;;  %v5623_v36 = vld [vmem:[#allocation23_spill] sm:$0xff] }
 0x27f   :  { %1540 = vmatpush.msra.mxu2 %v4097_v38 }
 0x280   :  { %1614 = vmatpush.msra.mxu3 %v4101_v5  ;;  %1634 = vmatpush.msra.mxu0 %v4104_v60  ;;  %2581 = vrcp.f32 %v4361_v27  ;;  %vm1248_vm14 = vweird.f32 %v4361_v27 }
 0x281   :  { %1541 = vmatpush.msra.mxu2 %v4107_v32 }
 0x282   :  { %1615 = vmatpush.msra.mxu3 %v5607_v53  ;;  %1635 = vmatpush.msra.mxu0 %v5608_v25 }
 0x283   :  { %v2580_v61 = vpop.eup %2579  ;;  %1542 = vmatpush.msra.mxu2 %v5609_v22 }
 0x284   :  { %v1222_v24 = vadd.f32 1.0, %v2580_v61  ;;  %1616 = vmatpush.msra.mxu3 %v5610_v62  ;;  %1636 = vmatpush.msra.mxu0 %v5611_v48 }
 0x285   :  { %1543 = vmatpush.msra.mxu2 %v5612_v28 }
 0x286   :  { %2583 = vrcp.f32 %v1222_v24  ;;  %1617 = vmatpush.msra.mxu3 %v5613_v41  ;;  %1637 = vmatpush.msra.mxu0 %v5614_v40  ;;  %v4378_v6 = vpop.eup %2581  ;;  %vm1228_vm10 = vweird.f32 %v1222_v24 }
 0x287   :  { %1544 = vmatpush.msra.mxu2 %v5615_v14  ;;  %v1244_v13 = vmul.f32 %v4378_v6, %v4361_v27  ;;  %v5625_v14 = vld [vmem:[#allocation92_spill] sm:$0xff]  ;;  %vm1249_vm13 = vweird.f32 %v4378_v6 }
 0x288   :  { %1618 = vmatpush.msra.mxu3 %v5616_v34  ;;  %1638 = vmatpush.msra.mxu0 %v5617_v18  ;;  %v5624_v34 = vld [vmem:[#allocation22_spill] sm:$0xff]  ;;  %vm1250_vm15 = vmor %vm1248_vm14, %vm1249_vm13 }
 0x289   :  { %1545 = vmatpush.msra.mxu2 %v5618_v45  ;;  %v1245_v18 = vsub.f32 1.0, %v1244_v13  ;;  %v1211_v13 = vpop.f32.mrf.mxu1 }
 0x28a   :  { %1619 = vmatpush.msra.mxu3 %v5619_v17  ;;  %1639 = vmatpush.msra.mxu0 %v5620_v16  ;;  %v1234_v17 = vand.u32 2147483648, %v1222_v24 }
 0x28b   :  { %1546 = vmatpush.msra.mxu2 %v5621_v35 }
 0x28c   :  { %v2584_v26 = vpop.eup %2583  ;;  %1620 = vmatpush.msra.mxu3 %v5622_v7  ;;  %1640 = vmatpush.msra.mxu0 %v5623_v36  ;;  %v1232_v7 = vand.u32 2147483647, %v1222_v24  ;;  %v5626_v36 = vld [vmem:[#allocation98_spill] sm:$0xff] }
 0x28d   :  { %v1224_v61 = vmul.f32 %v2584_v26, %v1222_v24  ;;  %1547 = vmatpush.msra.mxu2 %v5624_v34  ;;  %vm1229_vm9 = vweird.f32 %v2584_v26  ;;  %v1246_v34 = vmul.f32 %v4378_v6, %v1245_v18  ;;  %v5631_v24 = vld [vmem:[#allocation103_spill] sm:$0xff] }
 0x28e   :  { %1621 = vmatpush.msra.mxu3 %v5625_v14  ;;  %1641 = vmatpush.msra.mxu0 %v4176_v0  ;;  %vm1230_vm11 = vmor %vm1228_vm10, %vm1229_vm9  ;;  %v5628_v0 = vld [vmem:[#allocation101_spill] sm:$0xff]  ;;  %vm1233_vm12 = vcmp.eq.f32.partialorder %v1232_v7, 8.507059e+37  ;;  %v5635_v7 = vld [vmem:[#allocation107_spill] sm:$0xff] }
 0x28f   :  { %v1225_v45 = vsub.f32 1.0, %v1224_v61  ;;  %1548 = vmatpush.msra.mxu2 %v4180_v20  ;;  %v5627_v20 = vld [vmem:[#allocation100_spill] sm:$0xff]  ;;  %v1247_v18 = vadd.f32 %v4378_v6, %v1246_v34  ;;  %v5636_v34 = vld [vmem:[#allocation91_spill] sm:$0xff] }
 0x290   :  { %1622 = vmatpush.msra.mxu3 %v4183_v31  ;;  %1642 = vmatpush.msra.mxu0 %v4186_v49  ;;  %v1235_v31 = vor.u32 1.1754944e-38, %v1234_v17  ;;  %v5630_v49 = vld [vmem:[#allocation45_spill] sm:$0xff]  ;;  %v1254_v17 = vand.u32 2147483648, %v4361_v27 }
 0x291   :  { %v1226_v35 = vmul.f32 %v2584_v26, %v1225_v45  ;;  %1549 = vmatpush.msra.mxu2 %v4190_v51  ;;  %v5629_v45 = vld [vmem:[#allocation102_spill] sm:$0xff]  ;;  %v1258_v14 = vadd.f32 %v5630_v49, %v1211_v13  ;;  %v1252_v49 = vand.u32 2147483647, %v4361_v27  ;;  %v1251_v13 = vsel %vm1250_vm15, %v4378_v6, %v1247_v18  ;;  %v1217_v18 = vld [vmem:[%s5120_s1 + $0x28] sm:$0xff] }
 0x292   :  { %1623 = vmatpush.msra.mxu3 %v5626_v36  ;;  %1643 = vmatpush.msra.mxu0 %v4197_v2  ;;  %v5633_v2 = vld [vmem:[#allocation105_spill] sm:$0xff] }
 0x293   :  { %v1227_v61 = vadd.f32 %v2584_v26, %v1226_v35  ;;  %1550 = vmatpush.msra.mxu2 %v5627_v20  ;;  %v5632_v20 = vld [vmem:[#allocation104_spill] sm:$0xff]  ;;  %vm1253_vm0 = vcmp.eq.f32.partialorder %v1252_v49, 8.507059e+37 }
 0x294   :  { %1624 = vmatpush.msra.mxu3 %v5628_v0  ;;  %1644 = vmatpush.msra.mxu0 %v5629_v45 }
 0x295   :  { %v1231_v51 = vsel %vm1230_vm11, %v2584_v26, %v1227_v61  ;;  %1551 = vmatpush.msra.mxu2 %v4218_v57  ;;  %v5634_v26 = vld [vmem:[#allocation106_spill] sm:$0xff]  ;;  %v5638_v61 = vld [vmem:[#allocation109_spill] sm:$0xff] }
 0x296   :  { %v1236_v35 = vsel %vm1233_vm12, %v1235_v31, %v1231_v51  ;;  %1625 = vmatpush.msra.mxu3 %v5631_v24  ;;  %1645 = vmatpush.msra.mxu0 %v5632_v20  ;;  %v5637_v51 = vld [vmem:[#allocation108_spill] sm:$0xff] }
 0x297   :  { %v1259_v0 = vmul.f32 %v1258_v14, %v1236_v35  ;;  %1552 = vmatpush.msra.mxu2 %v5633_v2  ;;  %v5639_v14 = vld [vmem:[#allocation110_spill] sm:$0xff]  ;;  %v1255_v35 = vor.u32 1.1754944e-38, %v1254_v17 }
 0x298   :  { %1626 = vmatpush.msra.mxu3 %v5634_v26  ;;  %1646 = vmatpush.msra.mxu0 %v5635_v7 }
 0x299   :  { %v1260_v31 = vadd.f32 %v1259_v0, %v5636_v34  ;;  %1553 = vmatpush.msra.mxu2 %v5637_v51  ;;  %v1256_v27 = vsel %vm1253_vm0, %v1255_v35, %v1251_v13  ;;  %v5659_v13 = vld [vmem:[#allocation47_spill] sm:$0xff]  ;;  %v5660_v35 = vld [vmem:[#allocation117_spill] sm:$0xff] }
 0x29a   :  { %1627 = vmatpush.msra.mxu3 %v5638_v61  ;;  %1647 = vmatpush.msra.mxu0 %v5639_v14  ;;  %v1262_v7 = vsub.f32 1.0, %v1256_v27  ;;  %v1264_v34 = vmul.f32 %v1256_v27, %v4260_v42  ;;  %v5661_v27 = vld [vmem:[#allocation46_spill] sm:$0xff] }
 0x29b   :  { %2585 = vtanh.f32 %v1260_v31  ;;  %1554 = vmatpush.msra.mxu2 %v4245_v21 }
 0x29c   :  { %1628 = vmatpush.msra.mxu3 %v4249_v8  ;;  %1648 = vmatpush.msra.mxu0 %v4252_v11 }
 0x2a1   :  { %v2586_v0 = vpop.eup %2585 }
 0x2a2   :  { %v1263_v51 = vmul.f32 %v2586_v0, %v1262_v7  ;;  %v5657_v7 = vld [vmem:[#allocation116_spill] sm:$0xff]  ;;  %v5662_v0 = vld [vmem:[#allocation51_spill] sm:$0xff] }
 0x2a4   :  { %v1265_v6 = vadd.f32 %v1264_v34, %v1263_v51  ;;  %v5658_v51 = vld [vmem:[#allocation43_spill] sm:$0xff]  ;;  %v5663_v34 = vld [vmem:[#allocation118_spill] sm:$0xff] }
 0x2a6   :  { %v1266_v17 = vsub.f32 %v1265_v6, %v4260_v42  ;;  %v5664_v6 = vld [vmem:[#allocation50_spill] sm:$0xff] }
 0x2a8   :  { %v1267_v31 = vmul.f32 %v1266_v17, %v1217_v18  ;;  %v5665_v18 = vld [vmem:[#allocation55_spill] sm:$0xff] }
 0x2aa   :  { %v4430_v49 = vadd.f32 %v1267_v31, %v4260_v42  ;;  %v5656_v42 = vld [vmem:[#allocation44_spill] sm:$0xff] }
 0x2ac   :  { %1400 = vmatmul.f32.vlgmr.msra.gmra.mxu1 %v4430_v49  ;;  %1420 = vmatmul.f32.vlgmr.msrb.gmra.mxu2 %v4430_v49 }
 0x2ad   :  { %1440 = vmatmul.f32.vlgmr.msrb.gmra.mxu3 %v4430_v49  ;;  %1653 = vmatpush.msra.mxu1 %v3951_v12  ;;  %v5640_v12 = vld [vmem:[#allocation25_spill] sm:$0xff] }
 0x2ae   :  { %1727 = vmatpush.msrb.mxu2 %v3954_v46  ;;  %1747 = vmatpush.msrb.mxu3 %v3957_v39  ;;  %v5641_v46 = vld [vmem:[#allocation28_spill] sm:$0xff]  ;;  %v5642_v39 = vld [vmem:[#allocation111_spill] sm:$0xff] }
 0x2af   :  { %1654 = vmatpush.msra.mxu1 %v3960_v47  ;;  %v5643_v47 = vld [vmem:[#allocation27_spill] sm:$0xff] }
 0x2b0   :  { %1728 = vmatpush.msrb.mxu2 %v3963_v37  ;;  %1748 = vmatpush.msrb.mxu3 %v3966_v19  ;;  %v5644_v37 = vld [vmem:[#allocation26_spill] sm:$0xff]  ;;  %v5645_v19 = vld [vmem:[#allocation112_spill] sm:$0xff] }
 0x2b1   :  { %1655 = vmatpush.msra.mxu1 %v4271_v43 }
 0x2b2   :  { %1729 = vmatpush.msrb.mxu2 %v3970_v63  ;;  %1749 = vmatpush.msrb.mxu3 %v3973_v30  ;;  %v5646_v63 = vld [vmem:[#allocation32_spill] sm:$0xff]  ;;  %v5647_v30 = vld [vmem:[#allocation31_spill] sm:$0xff] }
 0x2b3   :  { %1656 = vmatpush.msra.mxu1 %v4276_v54 }
 0x2b4   :  { %1730 = vmatpush.msrb.mxu2 %v3977_v52  ;;  %1750 = vmatpush.msrb.mxu3 %v3980_v50  ;;  %v5648_v52 = vld [vmem:[#allocation113_spill] sm:$0xff]  ;;  %v5649_v50 = vld [vmem:[#allocation30_spill] sm:$0xff] }
 0x2b5   :  { %1657 = vmatpush.msra.mxu1 %v4281_v3 }
 0x2b6   :  { %1731 = vmatpush.msrb.mxu2 %v3984_v44  ;;  %1751 = vmatpush.msrb.mxu3 %v3987_v55  ;;  %v5650_v44 = vld [vmem:[#allocation36_spill] sm:$0xff]  ;;  %v5651_v55 = vld [vmem:[#allocation114_spill] sm:$0xff] }
 0x2b7   :  { %1658 = vmatpush.msra.mxu1 %v4286_v15 }
 0x2b8   :  { %1732 = vmatpush.msrb.mxu2 %v3991_v59  ;;  %1752 = vmatpush.msrb.mxu3 %v3994_v9  ;;  %v5652_v59 = vld [vmem:[#allocation35_spill] sm:$0xff] }
 0x2b9   :  { %1659 = vmatpush.msra.mxu1 %v4291_v29  ;;  %v5653_v9 = vld [vmem:[#allocation39_spill] sm:$0xff] }
 0x2ba   :  { %1733 = vmatpush.msrb.mxu2 %v3998_v23  ;;  %1753 = vmatpush.msrb.mxu3 %v4001_v58  ;;  %v5654_v23 = vld [vmem:[#allocation115_spill] sm:$0xff]  ;;  %v5655_v58 = vld [vmem:[#allocation38_spill] sm:$0xff] }
 0x2bb   :  { %1660 = vmatpush.msra.mxu1 %v4296_v1 }
 0x2bc   :  { %1734 = vmatpush.msrb.mxu2 %v5640_v12  ;;  %1754 = vmatpush.msrb.mxu3 %v5641_v46  ;;  %v5666_v12 = vld [vmem:[#allocation37_spill] sm:$0xff] }
 0x2bd   :  { %1661 = vmatpush.msra.mxu1 %v5642_v39 }
 0x2be   :  { %1735 = vmatpush.msrb.mxu2 %v5643_v47  ;;  %1755 = vmatpush.msrb.mxu3 %v5644_v37  ;;  %v5667_v47 = vld [vmem:[#allocation64_spill] sm:$0xff] }
 0x2bf   :  { %1662 = vmatpush.msra.mxu1 %v5645_v19 }
 0x2c0   :  { %1736 = vmatpush.msrb.mxu2 %v5646_v63  ;;  %1756 = vmatpush.msrb.mxu3 %v5647_v30 }
 0x2c1   :  { %1663 = vmatpush.msra.mxu1 %v5648_v52 }
 0x2c2   :  { %1737 = vmatpush.msrb.mxu2 %v5649_v50  ;;  %1757 = vmatpush.msrb.mxu3 %v5650_v44 }
 0x2c3   :  { %1664 = vmatpush.msra.mxu1 %v5651_v55 }
 0x2c4   :  { %1738 = vmatpush.msrb.mxu2 %v5652_v59  ;;  %1758 = vmatpush.msrb.mxu3 %v5653_v9 }
 0x2c5   :  { %1665 = vmatpush.msra.mxu1 %v5654_v23 }
 0x2c6   :  { %1739 = vmatpush.msrb.mxu2 %v5655_v58  ;;  %1759 = vmatpush.msrb.mxu3 %v5656_v42 }
 0x2c7   :  { %1666 = vmatpush.msra.mxu1 %v5657_v7 }
 0x2c8   :  { %1740 = vmatpush.msrb.mxu2 %v5658_v51  ;;  %1760 = vmatpush.msrb.mxu3 %v5659_v13 }
 0x2c9   :  { %1667 = vmatpush.msra.mxu1 %v5660_v35 }
 0x2ca   :  { %1741 = vmatpush.msrb.mxu2 %v5661_v27  ;;  %1761 = vmatpush.msrb.mxu3 %v5662_v0 }
 0x2cb   :  { %1668 = vmatpush.msra.mxu1 %v5663_v34  ;;  %v5668_v34 = vld [vmem:[#allocation41_spill] sm:$0xff] }
 0x2cc   :  { %1742 = vmatpush.msrb.mxu2 %v5664_v6  ;;  %1762 = vmatpush.msrb.mxu3 %v5665_v18 }
 0x2ff   :  { %v1286_v17 = vpop.f32.mrf.mxu2  ;;  %v1306_v31 = vpop.f32.mrf.mxu3 }
 0x300   :  { %v1333_v46 = vadd.f32 %v1286_v17, %v5666_v12  ;;  %v1353_v37 = vadd.f32 %v1306_v31, %v5667_v47  ;;  %v1326_v31 = vpop.f32.mrf.mxu0 }
 0x302   :  { %v2495_v63 = vmul.f32 -1.442695, %v1333_v46  ;;  %v2496_v30 = vmul.f32 -1.442695, %v1353_v37  ;;  %v4485_v37 = vld [vmem:[#allocation9] ss:$0 sm:$0xff] }
 0x304   :  { %2587 = vpow2.f32 %v2495_v63  ;;  %v1373_v63 = vadd.f32 %v4485_v37, %v1326_v31 }
 0x305   :  { %2589 = vpow2.f32 %v2496_v30 }
 0x30a   :  { %v2588_v50 = vpop.eup %2587 }
 0x30b   :  { %v2590_v44 = vpop.eup %2589  ;;  %v1337_v59 = vadd.f32 1.0, %v2588_v50 }
 0x30c   :  { %v1357_v9 = vadd.f32 1.0, %v2590_v44 }
 0x30d   :  { %2591 = vrcp.f32 %v1337_v59  ;;  %v1349_v0 = vand.u32 2147483648, %v1337_v59  ;;  %v1347_v17 = vand.u32 2147483647, %v1337_v59  ;;  %vm1343_vm2 = vweird.f32 %v1337_v59 }
 0x30e   :  { %2593 = vrcp.f32 %v1357_v9  ;;  %vm1363_vm6 = vweird.f32 %v1357_v9 }
 0x30f   :  { %v1350_v47 = vor.u32 1.1754944e-38, %v1349_v0  ;;  %vm1348_vm4 = vcmp.eq.f32.partialorder %v1347_v17, 8.507059e+37 }
 0x313   :  { %v2592_v58 = vpop.eup %2591 }
 0x314   :  { %v2594_v42 = vpop.eup %2593  ;;  %v1339_v51 = vmul.f32 %v2592_v58, %v1337_v59  ;;  %vm1344_vm1 = vweird.f32 %v2592_v58 }
 0x315   :  { %v1359_v13 = vmul.f32 %v2594_v42, %v1357_v9  ;;  %vm1345_vm3 = vmor %vm1343_vm2, %vm1344_vm1  ;;  %vm1364_vm5 = vweird.f32 %v2594_v42 }
 0x316   :  { %v1340_v27 = vsub.f32 1.0, %v1339_v51  ;;  %vm1365_vm7 = vmor %vm1363_vm6, %vm1364_vm5 }
 0x317   :  { %v1360_v6 = vsub.f32 1.0, %v1359_v13  ;;  %v1369_v13 = vand.u32 2147483648, %v1357_v9 }
 0x318   :  { %v1341_v18 = vmul.f32 %v2592_v58, %v1340_v27  ;;  %v1367_v27 = vand.u32 2147483647, %v1357_v9 }
 0x319   :  { %v1361_v12 = vmul.f32 %v2594_v42, %v1360_v6  ;;  %v1370_v59 = vor.u32 1.1754944e-38, %v1369_v13 }
 0x31a   :  { %v1342_v46 = vadd.f32 %v2592_v58, %v1341_v18  ;;  %vm1368_vm8 = vcmp.eq.f32.partialorder %v1367_v27, 8.507059e+37  ;;  %v5677_v27 = vld [vmem:[#allocation20_spill] sm:$0xff] }
 0x31b   :  { %v1362_v44 = vadd.f32 %v2594_v42, %v1361_v12  ;;  %v5669_v12 = vld [vmem:[#allocation72_spill] sm:$0xff] }
 0x31c   :  { %v1346_v30 = vsel %vm1345_vm3, %v2592_v58, %v1342_v46 }
 0x31d   :  { %v1351_v50 = vsel %vm1348_vm4, %v1350_v47, %v1346_v30  ;;  %v1366_v6 = vsel %vm1365_vm7, %v2594_v42, %v1362_v44  ;;  %v5670_v30 = vld [vmem:[#allocation88_spill] sm:$0xff] }
 0x31e   :  { %v1374_v51 = vmul.f32 %v1373_v63, %v1351_v50  ;;  %v1371_v0 = vsel %vm1368_vm8, %v1370_v59, %v1366_v6  ;;  %v5678_v6 = vld [vmem:[#allocation23_spill] sm:$0xff] }
 0x31f   :  { %v1377_v18 = vsub.f32 1.0, %v1371_v0  ;;  %v1379_v58 = vmul.f32 %v1371_v0, %v4355_v4 }
 0x320   :  { %v1375_v35 = vadd.f32 %v1374_v51, %v5668_v34  ;;  %v4494_v34 = vld [vmem:[%s5120_s1 + $0x18] sm:$0xff] }
 0x322   :  { %2595 = vtanh.f32 %v1375_v35 }
 0x328   :  { %v2596_v7 = vpop.eup %2595 }
 0x329   :  { %v1378_v31 = vmul.f32 %v2596_v7, %v1377_v18  ;;  %v1401_v17 = vpop.f32.mrf.mxu1  ;;  %v5679_v18 = vld [vmem:[#allocation22_spill] sm:$0xff] }
 0x32a   :  { %v1448_v46 = vadd.f32 %v1401_v17, %v5669_v12 }
 0x32b   :  { %v1380_v47 = vadd.f32 %v1379_v58, %v1378_v31  ;;  %v5680_v58 = vld [vmem:[#allocation92_spill] sm:$0xff] }
 0x32c   :  { %v2497_v63 = vmul.f32 -1.442695, %v1448_v46  ;;  %v4535_v46 = vld [vmem:[%s5130_s11] ss:$0 sm:$0xff] }
 0x32d   :  { %v1381_v35 = vsub.f32 %v1380_v47, %v4355_v4 }
 0x32e   :  { %2597 = vpow2.f32 %v2497_v63  ;;  %v5682_v63 = vld [vmem:[#allocation94_spill] sm:$0xff] }
 0x32f   :  { %v1421_v9 = vpop.f32.mrf.mxu2  ;;  %v1382_v42 = vmul.f32 %v1381_v35, %v4494_v34 }
 0x330   :  { %v1468_v7 = vadd.f32 %v1421_v9, %v5670_v30  ;;  %v5683_v9 = vld [vmem:[#allocation95_spill] sm:$0xff] }
 0x331   :  { %v4500_v50 = vadd.f32 %v1382_v42, %v4355_v4  ;;  %v5684_v42 = vld [vmem:[#allocation96_spill] sm:$0xff] }
 0x332   :  { %v2498_v44 = vmul.f32 -1.442695, %v1468_v7 }
 0x333   :  { %1515 = vmatmul.f32.vlgmr.msrb.gmra.mxu0 %v4500_v50  ;;  %1535 = vmatmul.f32.vlgmr.msrb.gmra.mxu1 %v4500_v50 }
 0x334   :  { %v2598_v51 = vpop.eup %2597  ;;  %2599 = vpow2.f32 %v2498_v44  ;;  %1555 = vmatmul.f32.vlgmr.msra.gmra.mxu2 %v4500_v50  ;;  %1767 = vmatpush.msrb.mxu0 %v4086_v56 }
 0x335   :  { %v1452_v13 = vadd.f32 1.0, %v2598_v51  ;;  %1841 = vmatpush.msrb.mxu1 %v4091_v33  ;;  %1861 = vmatpush.msra.mxu2 %v4094_v10  ;;  %v5685_v51 = vld [vmem:[#allocation97_spill] sm:$0xff] }
 0x336   :  { %1768 = vmatpush.msrb.mxu0 %v4097_v38  ;;  %v5671_v38 = vld [vmem:[#allocation40_spill] sm:$0xff] }
 0x337   :  { %2601 = vrcp.f32 %v1452_v13  ;;  %1842 = vmatpush.msrb.mxu1 %v4101_v5  ;;  %1862 = vmatpush.msra.mxu2 %v4104_v60  ;;  %v5672_v5 = vld [vmem:[#allocation42_spill] sm:$0xff]  ;;  %v5673_v60 = vld [vmem:[#allocation49_spill] sm:$0xff]  ;;  %vm1458_vm10 = vweird.f32 %v1452_v13 }
 0x338   :  { %1769 = vmatpush.msrb.mxu0 %v4107_v32 }
 0x339   :  { %1843 = vmatpush.msrb.mxu1 %v5607_v53  ;;  %1863 = vmatpush.msra.mxu2 %v5608_v25  ;;  %v5674_v53 = vld [vmem:[#allocation53_spill] sm:$0xff]  ;;  %v1464_v25 = vand.u32 2147483648, %v1452_v13 }
 0x33a   :  { %v2600_v4 = vpop.eup %2599  ;;  %1770 = vmatpush.msrb.mxu0 %v5609_v22  ;;  %v5675_v22 = vld [vmem:[#allocation61_spill] sm:$0xff] }
 0x33b   :  { %v1472_v56 = vadd.f32 1.0, %v2600_v4  ;;  %1844 = vmatpush.msrb.mxu1 %v5610_v62  ;;  %1864 = vmatpush.msra.mxu2 %v5611_v48  ;;  %v1462_v48 = vand.u32 2147483647, %v1452_v13  ;;  %v1465_v31 = vor.u32 1.1754944e-38, %v1464_v25  ;;  %v5686_v4 = vld [vmem:[#allocation99_spill] sm:$0xff]  ;;  %v5691_v25 = vld [vmem:[#allocation108_spill] sm:$0xff] }
 0x33c   :  { %1771 = vmatpush.msrb.mxu0 %v5612_v28  ;;  %v5676_v28 = vld [vmem:[#allocation70_spill] sm:$0xff] }
 0x33d   :  { %v2602_v33 = vpop.eup %2601  ;;  %2603 = vrcp.f32 %v1472_v56  ;;  %1845 = vmatpush.msrb.mxu1 %v5613_v41  ;;  %1865 = vmatpush.msra.mxu2 %v5614_v40  ;;  %v1441_v40 = vpop.f32.mrf.mxu3  ;;  %vm1463_vm12 = vcmp.eq.f32.partialorder %v1462_v48, 8.507059e+37  ;;  %v1484_v7 = vand.u32 2147483648, %v1472_v56  ;;  %vm1478_vm14 = vweird.f32 %v1472_v56  ;;  %v4589_v48 = vld [vmem:[#allocation7 + $0x158] sm:$0xff] }
 0x33e   :  { %v1454_v10 = vmul.f32 %v2602_v33, %v1452_v13  ;;  %1772 = vmatpush.msrb.mxu0 %v5671_v38  ;;  %vm1459_vm9 = vweird.f32 %v2602_v33  ;;  %v1488_v47 = vadd.f32 %v4535_v46, %v1441_v40  ;;  %v1482_v13 = vand.u32 2147483647, %v1472_v56  ;;  %v4600_v40 = vld [vmem:[#allocation7 + $0x120] sm:$0xff] }
 0x33f   :  { %1846 = vmatpush.msrb.mxu1 %v5672_v5  ;;  %1866 = vmatpush.msra.mxu2 %v5673_v60  ;;  %vm1460_vm11 = vmor %vm1458_vm10, %vm1459_vm9  ;;  %v5688_v5 = vld [vmem:[#allocation100_spill] sm:$0xff]  ;;  %v5689_v60 = vld [vmem:[#allocation101_spill] sm:$0xff] }
 0x340   :  { %v1455_v32 = vsub.f32 1.0, %v1454_v10  ;;  %1773 = vmatpush.msrb.mxu0 %v5674_v53  ;;  %v5687_v10 = vld [vmem:[#allocation89_spill] sm:$0xff]  ;;  %vm1483_vm0 = vcmp.eq.f32.partialorder %v1482_v13, 8.507059e+37  ;;  %v5695_v13 = vld [vmem:[#allocation48_spill] sm:$0xff] }
 0x341   :  { %1847 = vmatpush.msrb.mxu1 %v5675_v22  ;;  %1867 = vmatpush.msra.mxu2 %v5620_v16  ;;  %v5681_v16 = vld [vmem:[#allocation93_spill] sm:$0xff] }
 0x342   :  { %v1456_v62 = vmul.f32 %v2602_v33, %v1455_v32  ;;  %1774 = vmatpush.msrb.mxu0 %v5676_v28  ;;  %v1485_v32 = vor.u32 1.1754944e-38, %v1484_v7  ;;  %v4593_v28 = vld [vmem:[#allocation7 + $0x138] sm:$0xff]  ;;  %v4687_v7 = vld [vmem:[#allocation7 + $0x8] sm:$0xff] }
 0x343   :  { %v2604_v41 = vpop.eup %2603  ;;  %1848 = vmatpush.msrb.mxu1 %v5677_v27  ;;  %1868 = vmatpush.msra.mxu2 %v5678_v6  ;;  %v4603_v27 = vld [vmem:[#allocation7 + $0x128] sm:$0xff]  ;;  %v4610_v6 = vld [vmem:[#allocation7 + $0x110] sm:$0xff] }
 0x344   :  { %v1474_v59 = vmul.f32 %v2604_v41, %v1472_v56  ;;  %v1457_v0 = vadd.f32 %v2602_v33, %v1456_v62  ;;  %1775 = vmatpush.msrb.mxu0 %v5679_v18  ;;  %vm1479_vm13 = vweird.f32 %v2604_v41  ;;  %v5690_v56 = vld [vmem:[#allocation107_spill] sm:$0xff] }
 0x345   :  { %1849 = vmatpush.msrb.mxu1 %v5680_v58  ;;  %1869 = vmatpush.msra.mxu2 %v5681_v16  ;;  %vm1480_vm15 = vmor %vm1478_vm14, %vm1479_vm13  ;;  %v4586_v62 = vld [vmem:[#allocation7 + $0x150] sm:$0xff]  ;;  %v4631_v18 = vld [vmem:[#allocation7 + $0xc8] sm:$0xff] }
 0x346   :  { %v1475_v17 = vsub.f32 1.0, %v1474_v59  ;;  %v1461_v12 = vsel %vm1460_vm11, %v2602_v33, %v1457_v0  ;;  %1776 = vmatpush.msrb.mxu0 %v5682_v63  ;;  %v4617_v59 = vld [vmem:[#allocation7 + $0xf8] sm:$0xff]  ;;  %v4624_v0 = vld [vmem:[#allocation7 + $0xe0] sm:$0xff] }
 0x347   :  { %v1466_v35 = vsel %vm1463_vm12, %v1465_v31, %v1461_v12  ;;  %1850 = vmatpush.msrb.mxu1 %v5683_v9  ;;  %1870 = vmatpush.msra.mxu2 %v5684_v42  ;;  %v4638_v31 = vld [vmem:[#allocation7 + $0xb0] sm:$0xff]  ;;  %v4645_v58 = vld [vmem:[#allocation7 + $0x98] sm:$0xff]  ;;  %v4652_v16 = vld [vmem:[#allocation7 + $0x80] sm:$0xff] }
 0x348   :  { %v1476_v30 = vmul.f32 %v2604_v41, %v1475_v17  ;;  %v1489_v44 = vmul.f32 %v1488_v47, %v1466_v35  ;;  %1777 = vmatpush.msrb.mxu0 %v5685_v51  ;;  %v4659_v17 = vld [vmem:[#allocation7 + $0x68] sm:$0xff]  ;;  %v4666_v12 = vld [vmem:[#allocation7 + $0x50] sm:$0xff]  ;;  %v4673_v63 = vld [vmem:[#allocation7 + $0x38] sm:$0xff] }
 0x349   :  { %1851 = vmatpush.msrb.mxu1 %v5626_v36  ;;  %1871 = vmatpush.msra.mxu2 %v5686_v4  ;;  %v5692_v47 = vld [vmem:[#allocation116_spill] sm:$0xff]  ;;  %v5693_v35 = vld [vmem:[#allocation117_spill] sm:$0xff]  ;;  %v5694_v42 = vld [vmem:[#allocation118_spill] sm:$0xff] }
 0x34a   :  { %v1477_v33 = vadd.f32 %v2604_v41, %v1476_v30  ;;  %v1490_v38 = vadd.f32 %v1489_v44, %v5687_v10  ;;  %1778 = vmatpush.msrb.mxu0 %v5688_v5  ;;  %v4680_v9 = vld [vmem:[#allocation7 + $0x20] sm:$0xff] }
 0x34b   :  { %1852 = vmatpush.msrb.mxu1 %v5689_v60  ;;  %1872 = vmatpush.msra.mxu2 %v5629_v45  ;;  %v4684_v30 = vld [vmem:[#allocation7] sm:$0xff] }
 0x34c   :  { %v1481_v53 = vsel %vm1480_vm15, %v2604_v41, %v1477_v33  ;;  %2605 = vtanh.f32 %v1490_v38  ;;  %1779 = vmatpush.msrb.mxu0 %v4218_v57  ;;  %v4596_v41 = vld [vmem:[#allocation7 + $0x140] sm:$0xff]  ;;  %v5696_v33 = vld [vmem:[#allocation52_spill] sm:$0xff] }
 0x34d   :  { %1853 = vmatpush.msrb.mxu1 %v5631_v24  ;;  %1873 = vmatpush.msra.mxu2 %v5632_v20  ;;  %v1486_v36 = vsel %vm1483_vm0, %v1485_v32, %v1481_v53 }
 0x34e   :  { %1780 = vmatpush.msrb.mxu0 %v5633_v2  ;;  %v1492_v45 = vsub.f32 1.0, %v1486_v36  ;;  %v1494_v20 = vmul.f32 %v1486_v36, %v4430_v49 }
 0x34f   :  { %1854 = vmatpush.msrb.mxu1 %v5634_v26  ;;  %1874 = vmatpush.msra.mxu2 %v5690_v56  ;;  %v4564_v26 = vld [vmem:[%s5120_s1 + $0x20] sm:$0xff] }
 0x350   :  { %1781 = vmatpush.msrb.mxu0 %v5691_v25 }
 0x351   :  { %1855 = vmatpush.msrb.mxu1 %v5638_v61  ;;  %1875 = vmatpush.msra.mxu2 %v5639_v14 }
 0x352   :  { %v2606_v57 = vpop.eup %2605  ;;  %1782 = vmatpush.msrb.mxu0 %v4245_v21  ;;  %v4580_v21 = vld [vmem:[#allocation7 + $0x170] sm:$0xff] }
 0x353   :  { %v1493_v24 = vmul.f32 %v2606_v57, %v1492_v45  ;;  %1856 = vmatpush.msrb.mxu1 %v4249_v8  ;;  %1876 = vmatpush.msra.mxu2 %v4252_v11  ;;  %v4574_v8 = vld [vmem:[#allocation12 + $0x178] sm:$0xff] }
 0x354   :  { %v4577_v11 = vld [vmem:[#allocation7 + $0x168] sm:$0xff] }
 0x355   :  { %v1495_v2 = vadd.f32 %v1494_v20, %v1493_v24 }
 0x357   :  { %v1496_v61 = vsub.f32 %v1495_v2, %v4430_v49 }
 0x359   :  { %v1497_v14 = vmul.f32 %v1496_v61, %v4564_v26 }
 0x35b   :  { %v4569_v22 = vadd.f32 %v1497_v14, %v4430_v49  ;;  %v4583_v49 = vld [vmem:[#allocation12 + $0x160] sm:$0xff] }
 0x35d   :  { %1629 = vmatmul.f32.vlgmr.msra.gmra.mxu3 %v4569_v22  ;;  %1649 = vmatmul.f32.vlgmr.msra.gmra.mxu0 %v4569_v22 }
 0x35e   :  { %1669 = vmatmul.f32.vlgmr.msra.gmra.mxu1 %v4569_v22  ;;  %1881 = vmatpush.msra.mxu3 %v4574_v8 }
 0x35f   :  { %1955 = vmatpush.msra.mxu0 %v4577_v11  ;;  %1975 = vmatpush.msra.mxu1 %v4580_v21 }
 0x360   :  { %1882 = vmatpush.msra.mxu3 %v4583_v49 }
 0x361   :  { %1956 = vmatpush.msra.mxu0 %v4586_v62  ;;  %1976 = vmatpush.msra.mxu1 %v4589_v48 }
 0x362   :  { %1883 = vmatpush.msra.mxu3 %v4271_v43  ;;  %v4607_v43 = vld [vmem:[#allocation7 + $0x108] sm:$0xff] }
 0x363   :  { %1957 = vmatpush.msra.mxu0 %v4593_v28  ;;  %1977 = vmatpush.msra.mxu1 %v4596_v41 }
 0x364   :  { %1884 = vmatpush.msra.mxu3 %v4276_v54  ;;  %v4614_v54 = vld [vmem:[#allocation7 + $0xf0] sm:$0xff] }
 0x365   :  { %1958 = vmatpush.msra.mxu0 %v4600_v40  ;;  %1978 = vmatpush.msra.mxu1 %v4603_v27 }
 0x366   :  { %1885 = vmatpush.msra.mxu3 %v4281_v3  ;;  %v4621_v3 = vld [vmem:[#allocation7 + $0xd8] sm:$0xff] }
 0x367   :  { %1959 = vmatpush.msra.mxu0 %v4607_v43  ;;  %1979 = vmatpush.msra.mxu1 %v4610_v6 }
 0x368   :  { %1886 = vmatpush.msra.mxu3 %v4286_v15  ;;  %v4628_v15 = vld [vmem:[#allocation7 + $0xc0] sm:$0xff] }
 0x369   :  { %1960 = vmatpush.msra.mxu0 %v4614_v54  ;;  %1980 = vmatpush.msra.mxu1 %v4617_v59 }
 0x36a   :  { %1887 = vmatpush.msra.mxu3 %v4291_v29  ;;  %v4635_v29 = vld [vmem:[#allocation7 + $0xa8] sm:$0xff] }
 0x36b   :  { %1961 = vmatpush.msra.mxu0 %v4621_v3  ;;  %1981 = vmatpush.msra.mxu1 %v4624_v0 }
 0x36c   :  { %1888 = vmatpush.msra.mxu3 %v4296_v1  ;;  %v4642_v1 = vld [vmem:[#allocation7 + $0x90] sm:$0xff] }
 0x36d   :  { %1962 = vmatpush.msra.mxu0 %v4628_v15  ;;  %1982 = vmatpush.msra.mxu1 %v4631_v18 }
 0x36e   :  { %1889 = vmatpush.msra.mxu3 %v5642_v39  ;;  %v4649_v39 = vld [vmem:[#allocation7 + $0x78] sm:$0xff] }
 0x36f   :  { %1963 = vmatpush.msra.mxu0 %v4635_v29  ;;  %1983 = vmatpush.msra.mxu1 %v4638_v31 }
 0x370   :  { %1890 = vmatpush.msra.mxu3 %v5645_v19  ;;  %v4656_v19 = vld [vmem:[#allocation7 + $0x60] sm:$0xff] }
 0x371   :  { %1964 = vmatpush.msra.mxu0 %v4642_v1  ;;  %1984 = vmatpush.msra.mxu1 %v4645_v58 }
 0x372   :  { %1891 = vmatpush.msra.mxu3 %v5648_v52  ;;  %v4663_v52 = vld [vmem:[#allocation7 + $0x48] sm:$0xff] }
 0x373   :  { %1965 = vmatpush.msra.mxu0 %v4649_v39  ;;  %1985 = vmatpush.msra.mxu1 %v4652_v16 }
 0x374   :  { %1892 = vmatpush.msra.mxu3 %v5651_v55  ;;  %v4670_v55 = vld [vmem:[#allocation7 + $0x30] sm:$0xff] }
 0x375   :  { %1966 = vmatpush.msra.mxu0 %v4656_v19  ;;  %1986 = vmatpush.msra.mxu1 %v4659_v17 }
 0x376   :  { %1893 = vmatpush.msra.mxu3 %v5654_v23  ;;  %v4677_v23 = vld [vmem:[#allocation7 + $0x18] sm:$0xff] }
 0x377   :  { %1967 = vmatpush.msra.mxu0 %v4663_v52  ;;  %1987 = vmatpush.msra.mxu1 %v4666_v12 }
 0x378   :  { %1894 = vmatpush.msra.mxu3 %v5692_v47 }
 0x379   :  { %1968 = vmatpush.msra.mxu0 %v4670_v55  ;;  %1988 = vmatpush.msra.mxu1 %v4673_v63 }
 0x37a   :  { %1895 = vmatpush.msra.mxu3 %v5693_v35 }
 0x37b   :  { %1969 = vmatpush.msra.mxu0 %v4677_v23  ;;  %1989 = vmatpush.msra.mxu1 %v4680_v9 }
 0x37c   :  { %1896 = vmatpush.msra.mxu3 %v5694_v42 }
 0x37d   :  { %1970 = vmatpush.msra.mxu0 %v4684_v30  ;;  %1990 = vmatpush.msra.mxu1 %v4687_v7 }
 0x3b0   :  { %v1516_v44 = vpop.f32.mrf.mxu0  ;;  %v1536_v51 = vpop.f32.mrf.mxu1 }
 0x3b1   :  { %v1562_v4 = vadd.f32 %v1516_v44, %v5695_v13  ;;  %v1582_v10 = vadd.f32 %v1536_v51, %v5696_v33 }
 0x3b3   :  { %v2499_v38 = vmul.f32 -1.442695, %v1562_v4  ;;  %v2500_v5 = vmul.f32 -1.442695, %v1582_v10 }
 0x3b5   :  { %2607 = vpow2.f32 %v2499_v38 }
 0x3b6   :  { %2609 = vpow2.f32 %v2500_v5 }
 0x3b7   :  { %v1556_v35 = vpop.f32.mrf.mxu2 }
 0x3b8   :  { %v1602_v13 = vadd.f32 %v4485_v37, %v1556_v35 }
 0x3bb   :  { %v2608_v60 = vpop.eup %2607 }
 0x3bc   :  { %v2610_v32 = vpop.eup %2609  ;;  %v1566_v53 = vadd.f32 1.0, %v2608_v60  ;;  %v5697_v60 = vld [vmem:[#allocation60_spill] sm:$0xff] }
 0x3bd   :  { %v1586_v36 = vadd.f32 1.0, %v2610_v32 }
 0x3be   :  { %2611 = vrcp.f32 %v1566_v53  ;;  %v1578_v2 = vand.u32 2147483648, %v1566_v53  ;;  %v1576_v14 = vand.u32 2147483647, %v1566_v53  ;;  %vm1572_vm2 = vweird.f32 %v1566_v53 }
 0x3bf   :  { %2613 = vrcp.f32 %v1586_v36  ;;  %v1598_v10 = vand.u32 2147483648, %v1586_v36  ;;  %vm1592_vm6 = vweird.f32 %v1586_v36  ;;  %v1596_v5 = vand.u32 2147483647, %v1586_v36 }
 0x3c0   :  { %v1579_v44 = vor.u32 1.1754944e-38, %v1578_v2  ;;  %vm1577_vm4 = vcmp.eq.f32.partialorder %v1576_v14, 8.507059e+37  ;;  %v5698_v14 = vld [vmem:[#allocation86_spill] sm:$0xff] }
 0x3c1   :  { %vm1597_vm8 = vcmp.eq.f32.partialorder %v1596_v5, 8.507059e+37  ;;  %v4710_v5 = vld [vmem:[#allocation12 + $0x168] sm:$0xff] }
 0x3c4   :  { %v2612_v56 = vpop.eup %2611 }
 0x3c5   :  { %v2614_v25 = vpop.eup %2613  ;;  %v1568_v45 = vmul.f32 %v2612_v56, %v1566_v53  ;;  %vm1573_vm1 = vweird.f32 %v2612_v56 }
 0x3c6   :  { %v1588_v57 = vmul.f32 %v2614_v25, %v1586_v36  ;;  %vm1574_vm3 = vmor %vm1572_vm2, %vm1573_vm1  ;;  %vm1593_vm5 = vweird.f32 %v2614_v25 }
 0x3c7   :  { %v1569_v24 = vsub.f32 1.0, %v1568_v45  ;;  %vm1594_vm7 = vmor %vm1592_vm6, %vm1593_vm5 }
 0x3c8   :  { %v1589_v20 = vsub.f32 1.0, %v1588_v57  ;;  %v1599_v57 = vor.u32 1.1754944e-38, %v1598_v10 }
 0x3c9   :  { %v1570_v61 = vmul.f32 %v2612_v56, %v1569_v24 }
 0x3ca   :  { %v1590_v47 = vmul.f32 %v2614_v25, %v1589_v20 }
 0x3cb   :  { %v1571_v42 = vadd.f32 %v2612_v56, %v1570_v61 }
 0x3cc   :  { %v1591_v4 = vadd.f32 %v2614_v25, %v1590_v47 }
 0x3cd   :  { %v1575_v51 = vsel %vm1574_vm3, %v2612_v56, %v1571_v42 }
 0x3ce   :  { %v1580_v33 = vsel %vm1577_vm4, %v1579_v44, %v1575_v51  ;;  %v1595_v45 = vsel %vm1594_vm7, %v2614_v25, %v1591_v4  ;;  %v5699_v51 = vld [vmem:[#allocation66_spill] sm:$0xff] }
 0x3cf   :  { %v1603_v38 = vmul.f32 %v1602_v13, %v1580_v33  ;;  %v1600_v53 = vsel %vm1597_vm8, %v1599_v57, %v1595_v45  ;;  %v4722_v45 = vld [vmem:[#allocation12 + $0x158] sm:$0xff] }
 0x3d0   :  { %v1606_v24 = vsub.f32 1.0, %v1600_v53  ;;  %v1608_v2 = vmul.f32 %v1600_v53, %v4500_v50  ;;  %v4726_v57 = vld [vmem:[#allocation7 + $0x148] sm:$0xff] }
 0x3d1   :  { %v1604_v32 = vadd.f32 %v1603_v38, %v5697_v60  ;;  %v4705_v38 = vld [vmem:[#allocation7 + $0x178] sm:$0xff]  ;;  %v4716_v60 = vld [vmem:[#allocation7 + $0x160] sm:$0xff]  ;;  %v4729_v53 = vld [vmem:[#allocation12 + $0x138] sm:$0xff] }
 0x3d3   :  { %2615 = vtanh.f32 %v1604_v32  ;;  %v4719_v32 = vld [vmem:[#allocation12 + $0x150] sm:$0xff] }
 0x3d9   :  { %v2616_v56 = vpop.eup %2615 }
 0x3da   :  { %v1607_v20 = vmul.f32 %v2616_v56, %v1606_v24  ;;  %v1650_v61 = vpop.f32.mrf.mxu0  ;;  %v4732_v24 = vld [vmem:[#allocation12 + $0x140] sm:$0xff] }
 0x3db   :  { %v1696_v47 = vadd.f32 %v1650_v61, %v5698_v14  ;;  %v4740_v61 = vld [vmem:[#allocation12 + $0x120] sm:$0xff]  ;;  %v4743_v14 = vld [vmem:[#allocation12 + $0x128] sm:$0xff] }
 0x3dc   :  { %v1609_v35 = vadd.f32 %v1608_v2, %v1607_v20  ;;  %v4735_v20 = vld [vmem:[#allocation7 + $0x130] sm:$0xff]  ;;  %5701 = vst [vmem:[#allocation19_spill] sm:$0xff] %v4740_v61 }
 0x3dd   :  { %v2502_v42 = vmul.f32 -1.442695, %v1696_v47  ;;  %5700 = vst [vmem:[#allocation18_spill] sm:$0xff] %v4735_v20  ;;  %v4746_v47 = vld [vmem:[#allocation7 + $0x118] sm:$0xff] }
 0x3de   :  { %v1610_v36 = vsub.f32 %v1609_v35, %v4500_v50  ;;  %5702 = vst [vmem:[#allocation29_spill] sm:$0xff] %v4743_v14  ;;  %v4750_v35 = vld [vmem:[#allocation12 + $0x108] sm:$0xff] }
 0x3df   :  { %2617 = vpow2.f32 %v2502_v42  ;;  %5703 = vst [vmem:[#allocation33_spill] sm:$0xff] %v4746_v47  ;;  %v4753_v42 = vld [vmem:[#allocation12 + $0x110] sm:$0xff] }
 0x3e0   :  { %v1611_v44 = vmul.f32 %v1610_v36, %v4564_v26  ;;  %v1630_v25 = vpop.f32.mrf.mxu3  ;;  %5704 = vst [vmem:[#allocation90_spill] sm:$0xff] %v4750_v35 }
 0x3e1   :  { %v1676_v13 = vadd.f32 %v1630_v25, %v5699_v51  ;;  %5705 = vst [vmem:[#allocation73_spill] sm:$0xff] %v4753_v42  ;;  %v4761_v25 = vld [vmem:[#allocation12 + $0xf0] sm:$0xff]  ;;  %v4764_v51 = vld [vmem:[#allocation12 + $0xf8] sm:$0xff] }
 0x3e2   :  { %v4700_v4 = vadd.f32 %v1611_v44, %v4500_v50  ;;  %v4713_v50 = vld [vmem:[#allocation12 + $0x170] sm:$0xff]  ;;  %5707 = vst [vmem:[#allocation57_spill] sm:$0xff] %v4761_v25 }
 0x3e3   :  { %v2501_v33 = vmul.f32 -1.442695, %v1676_v13  ;;  %v4758_v44 = vld [vmem:[#allocation7 + $0x100] sm:$0xff]  ;;  %5708 = vst [vmem:[#allocation56_spill] sm:$0xff] %v4764_v51  ;;  %v4767_v13 = vld [vmem:[#allocation7 + $0xe8] sm:$0xff] }
 0x3e4   :  { %1743 = vmatmul.f32.vlgmr.msrb.gmra.mxu2 %v4700_v4  ;;  %1763 = vmatmul.f32.vlgmr.msrb.gmra.mxu3 %v4700_v4  ;;  %5706 = vst [vmem:[#allocation54_spill] sm:$0xff] %v4758_v44 }
 0x3e5   :  { %v2618_v10 = vpop.eup %2617  ;;  %2619 = vpow2.f32 %v2501_v33  ;;  %1783 = vmatmul.f32.vlgmr.msrb.gmra.mxu0 %v4700_v4  ;;  %1995 = vmatpush.msrb.mxu2 %v4705_v38  ;;  %5709 = vst [vmem:[#allocation59_spill] sm:$0xff] %v4767_v13 }
 0x3e6   :  { %v4708_v26 = vadd.f32 1.0, %v2618_v10  ;;  %2069 = vmatpush.msrb.mxu3 %v4710_v5  ;;  %2089 = vmatpush.msrb.mxu0 %v4713_v50  ;;  %v4772_v10 = vld [vmem:[#allocation12 + $0xd8] sm:$0xff] }
 0x3e7   :  { %1996 = vmatpush.msrb.mxu2 %v4716_v60  ;;  %5710 = vst [vmem:[#allocation58_spill] sm:$0xff] %v4772_v10 }
 0x3e8   :  { %2070 = vmatpush.msrb.mxu3 %v4719_v32  ;;  %2090 = vmatpush.msrb.mxu0 %v4722_v45  ;;  %2621 = vrcp.f32 %v4708_v26  ;;  %vm1706_vm14 = vweird.f32 %v4708_v26 }
 0x3e9   :  { %1997 = vmatpush.msrb.mxu2 %v4726_v57 }
 0x3ea   :  { %2071 = vmatpush.msrb.mxu3 %v4729_v53  ;;  %2091 = vmatpush.msrb.mxu0 %v4732_v24 }
 0x3eb   :  { %v2620_v56 = vpop.eup %2619  ;;  %1998 = vmatpush.msrb.mxu2 %v4735_v20  ;;  %v4822_v20 = vld [vmem:[#allocation12 + $0x60] sm:$0xff] }
 0x3ec   :  { %v4738_v2 = vadd.f32 1.0, %v2620_v56  ;;  %2072 = vmatpush.msrb.mxu3 %v4740_v61  ;;  %2092 = vmatpush.msrb.mxu0 %v4743_v14  ;;  %v4775_v56 = vld [vmem:[#allocation12 + $0xe0] sm:$0xff]  ;;  %v4801_v14 = vld [vmem:[#allocation12 + $0x90] sm:$0xff]  ;;  %v4812_v61 = vld [vmem:[#allocation12 + $0x78] sm:$0xff]  ;;  %5725 = vst [vmem:[#allocation25_spill] sm:$0xff] %v4822_v20 }
 0x3ed   :  { %1999 = vmatpush.msrb.mxu2 %v4746_v47  ;;  %5711 = vst [vmem:[#allocation65_spill] sm:$0xff] %v4775_v56  ;;  %v4797_v47 = vld [vmem:[#allocation7 + $0xa0] sm:$0xff] }
 0x3ee   :  { %2623 = vrcp.f32 %v4738_v2  ;;  %2073 = vmatpush.msrb.mxu3 %v4750_v35  ;;  %2093 = vmatpush.msrb.mxu0 %v4753_v42  ;;  %v4756_v36 = vpop.eup %2621  ;;  %v4791_v35 = vld [vmem:[#allocation12 + $0xa8] sm:$0xff]  ;;  %5718 = vst [vmem:[#allocation103_spill] sm:$0xff] %v4797_v47  ;;  %vm1686_vm10 = vweird.f32 %v4738_v2 }
 0x3ef   :  { %2000 = vmatpush.msrb.mxu2 %v4758_v44  ;;  %v1702_v33 = vmul.f32 %v4756_v36, %v4708_v26  ;;  %v4781_v44 = vld [vmem:[#allocation12 + $0xc0] sm:$0xff]  ;;  %5716 = vst [vmem:[#allocation102_spill] sm:$0xff] %v4791_v35  ;;  %vm1707_vm13 = vweird.f32 %v4756_v36 }
 0x3f0   :  { %2074 = vmatpush.msrb.mxu3 %v4761_v25  ;;  %2094 = vmatpush.msrb.mxu0 %v4764_v51  ;;  %v4778_v25 = vld [vmem:[#allocation7 + $0xd0] sm:$0xff]  ;;  %5713 = vst [vmem:[#allocation68_spill] sm:$0xff] %v4781_v44  ;;  %vm4854_vm15 = vmor %vm1706_vm14, %vm1707_vm13 }
 0x3f1   :  { %2001 = vmatpush.msrb.mxu2 %v4767_v13  ;;  %5712 = vst [vmem:[#allocation67_spill] sm:$0xff] %v4778_v25  ;;  %v4784_v13 = vld [vmem:[#allocation12 + $0xc8] sm:$0xff] }
 0x3f2   :  { %2075 = vmatpush.msrb.mxu3 %v4772_v10  ;;  %2095 = vmatpush.msrb.mxu0 %v4775_v56  ;;  %5714 = vst [vmem:[#allocation63_spill] sm:$0xff] %v4784_v13  ;;  %v4788_v10 = vld [vmem:[#allocation7 + $0xb8] sm:$0xff]  ;;  %v1703_v56 = vsub.f32 1.0, %v1702_v33  ;;  %v4804_v33 = vld [vmem:[#allocation12 + $0x98] sm:$0xff] }
 0x3f3   :  { %2002 = vmatpush.msrb.mxu2 %v4778_v25  ;;  %5715 = vst [vmem:[#allocation98_spill] sm:$0xff] %v4788_v10  ;;  %v4794_v25 = vld [vmem:[#allocation12 + $0xb0] sm:$0xff] }
 0x3f4   :  { %v2624_v51 = vpop.eup %2623  ;;  %2076 = vmatpush.msrb.mxu3 %v4781_v44  ;;  %2096 = vmatpush.msrb.mxu0 %v4784_v13  ;;  %5717 = vst [vmem:[#allocation45_spill] sm:$0xff] %v4794_v25  ;;  %v1692_v13 = vand.u32 2147483648, %v4738_v2 }
 0x3f5   :  { %v1682_v42 = vmul.f32 %v2624_v51, %v4738_v2  ;;  %2003 = vmatpush.msrb.mxu2 %v4788_v10  ;;  %5719 = vst [vmem:[#allocation104_spill] sm:$0xff] %v4801_v14  ;;  %vm1687_vm9 = vweird.f32 %v2624_v51  ;;  %v1690_v10 = vand.u32 2147483647, %v4738_v2 }
 0x3f6   :  { %2077 = vmatpush.msrb.mxu3 %v4791_v35  ;;  %2097 = vmatpush.msrb.mxu0 %v4794_v25  ;;  %5720 = vst [vmem:[#allocation105_spill] sm:$0xff] %v4804_v33  ;;  %v4808_v25 = vld [vmem:[#allocation7 + $0x88] sm:$0xff]  ;;  %vm1688_vm11 = vmor %vm1686_vm10, %vm1687_vm9 }
 0x3f7   :  { %v1683_v44 = vsub.f32 1.0, %v1682_v42  ;;  %2004 = vmatpush.msrb.mxu2 %v4797_v47  ;;  %5721 = vst [vmem:[#allocation106_spill] sm:$0xff] %v4808_v25  ;;  %v1704_v42 = vmul.f32 %v4756_v36, %v1703_v56  ;;  %v1670_v47 = vpop.f32.mrf.mxu1  ;;  %v4825_v56 = vld [vmem:[#allocation12 + $0x68] sm:$0xff]  ;;  %vm1691_vm12 = vcmp.eq.f32.partialorder %v1690_v10, 8.507059e+37 }
 0x3f8   :  { %2078 = vmatpush.msrb.mxu3 %v4801_v14  ;;  %2098 = vmatpush.msrb.mxu0 %v4804_v33  ;;  %5722 = vst [vmem:[#allocation91_spill] sm:$0xff] %v4812_v61  ;;  %v4815_v14 = vld [vmem:[#allocation12 + $0x80] sm:$0xff]  ;;  %v4841_v10 = vld [vmem:[#allocation7 + $0x40] sm:$0xff] }
 0x3f9   :  { %v1684_v35 = vmul.f32 %v2624_v51, %v1683_v44  ;;  %2005 = vmatpush.msrb.mxu2 %v4808_v25  ;;  %5723 = vst [vmem:[#allocation109_spill] sm:$0xff] %v4815_v14  ;;  %v4819_v44 = vld [vmem:[#allocation7 + $0x70] sm:$0xff]  ;;  %v1693_v25 = vor.u32 1.1754944e-38, %v1692_v13  ;;  %v1705_v2 = vadd.f32 %v4756_v36, %v1704_v42 }
 0x3fa   :  { %2079 = vmatpush.msrb.mxu3 %v4812_v61  ;;  %2099 = vmatpush.msrb.mxu0 %v4815_v14  ;;  %5724 = vst [vmem:[#allocation110_spill] sm:$0xff] %v4819_v44  ;;  %v1716_v61 = vadd.f32 %v4535_v46, %v1670_v47  ;;  %v1712_v47 = vand.u32 2147483648, %v4708_v26  ;;  %v5733_v42 = vld [vmem:[#allocation87_spill] sm:$0xff] }
 0x3fb   :  { %v1685_v33 = vadd.f32 %v2624_v51, %v1684_v35  ;;  %2006 = vmatpush.msrb.mxu2 %v4819_v44  ;;  %v4829_v35 = vld [vmem:[#allocation7 + $0x58] sm:$0xff]  ;;  %5728 = vst [vmem:[#allocation27_spill] sm:$0xff] %v4841_v10 }
 0x3fc   :  { %2080 = vmatpush.msrb.mxu3 %v4822_v20  ;;  %2100 = vmatpush.msrb.mxu0 %v4825_v56  ;;  %v4834_v44 = vld [vmem:[#allocation12 + $0x48] sm:$0xff]  ;;  %v4837_v20 = vld [vmem:[#allocation12 + $0x50] sm:$0xff] }
 0x3fd   :  { %v1689_v14 = vsel %vm1688_vm11, %v2624_v51, %v1685_v33  ;;  %2007 = vmatpush.msrb.mxu2 %v4829_v35  ;;  %5726 = vst [vmem:[#allocation28_spill] sm:$0xff] %v4834_v44  ;;  %v1710_v33 = vand.u32 2147483647, %v4708_v26  ;;  %v1709_v26 = vsel %vm4854_vm15, %v4756_v36, %v1705_v2  ;;  %v4877_v36 = vld [vmem:[#allocation12 + $0x8] sm:$0xff] }
 0x3fe   :  { %v1694_v13 = vsel %vm1691_vm12, %v1693_v25, %v1689_v14  ;;  %2081 = vmatpush.msrb.mxu3 %v4834_v44  ;;  %5727 = vst [vmem:[#allocation111_spill] sm:$0xff] %v4837_v20  ;;  %2101 = vmatpush.msrb.mxu0 %v4837_v20  ;;  %v4846_v14 = vld [vmem:[#allocation12 + $0x30] sm:$0xff]  ;;  %v4849_v25 = vld [vmem:[#allocation12 + $0x38] sm:$0xff]  ;;  %v1713_v20 = vor.u32 1.1754944e-38, %v1712_v47 }
 0x3ff   :  { %v1717_v51 = vmul.f32 %v1716_v61, %v1694_v13  ;;  %2008 = vmatpush.msrb.mxu2 %v4841_v10  ;;  %5729 = vst [vmem:[#allocation26_spill] sm:$0xff] %v4846_v14  ;;  %v4859_v10 = vld [vmem:[#allocation7 + $0x28] sm:$0xff]  ;;  %v4871_v44 = vld [vmem:[#allocation7 + $0x10] sm:$0xff]  ;;  %vm1711_vm0 = vcmp.eq.f32.partialorder %v1710_v33, 8.507059e+37 }
 0x400   :  { %2082 = vmatpush.msrb.mxu3 %v4846_v14  ;;  %5730 = vst [vmem:[#allocation112_spill] sm:$0xff] %v4849_v25  ;;  %2102 = vmatpush.msrb.mxu0 %v4849_v25  ;;  %v4865_v14 = vld [vmem:[#allocation12 + $0x18] sm:$0xff]  ;;  %v4868_v25 = vld [vmem:[#allocation12 + $0x20] sm:$0xff]  ;;  %v1714_v2 = vsel %vm1711_vm0, %v1713_v20, %v1709_v26 }
 0x401   :  { %v1718_v13 = vadd.f32 %v1717_v51, %v5733_v42  ;;  %2009 = vmatpush.msrb.mxu2 %v4859_v10  ;;  %5734 = vst [vmem:[#allocation32_spill] sm:$0xff] %v4865_v14  ;;  %v4874_v51 = vld [vmem:[#allocation12] sm:$0xff]  ;;  %v1720_v61 = vsub.f32 1.0, %v1714_v2 }
 0x402   :  { %2083 = vmatpush.msrb.mxu3 %v4865_v14  ;;  %5735 = vst [vmem:[#allocation31_spill] sm:$0xff] %v4868_v25  ;;  %2103 = vmatpush.msrb.mxu0 %v4868_v25  ;;  %v1722_v25 = vmul.f32 %v1714_v2, %v4569_v22 }
 0x403   :  { %2625 = vtanh.f32 %v1718_v13  ;;  %5736 = vst [vmem:[#allocation113_spill] sm:$0xff] %v4871_v44  ;;  %2010 = vmatpush.msrb.mxu2 %v4871_v44 }
 0x404   :  { %2084 = vmatpush.msrb.mxu3 %v4874_v51  ;;  %2104 = vmatpush.msrb.mxu0 %v4877_v36 }
 0x409   :  { %v2626_v42 = vpop.eup %2625 }
 0x40a   :  { %v1721_v47 = vmul.f32 %v2626_v42, %v1720_v61 }
 0x40c   :  { %v1723_v13 = vadd.f32 %v1722_v25, %v1721_v47 }
 0x40e   :  { %v1724_v14 = vsub.f32 %v1723_v13, %v4569_v22 }
 0x410   :  { %v1725_v44 = vmul.f32 %v1724_v14, %v4494_v34  ;;  %v4895_v34 = vld [vmem:[#allocation12 + $0x148] sm:$0xff] }
 0x412   :  { %v4884_v33 = vadd.f32 %v1725_v44, %v4569_v22  ;;  %v4900_v22 = vld [vmem:[#allocation12 + $0x130] sm:$0xff] }
 0x414   :  { %1857 = vmatmul.f32.vlgmr.msrb.gmra.mxu1 %v4884_v33  ;;  %1877 = vmatmul.f32.vlgmr.msra.gmra.mxu2 %v4884_v33 }
 0x415   :  { %1897 = vmatmul.f32.vlgmr.msra.gmra.mxu3 %v4884_v33  ;;  %2109 = vmatpush.msrb.mxu1 %v4574_v8 }
 0x416   :  { %2183 = vmatpush.msra.mxu2 %v4577_v11  ;;  %2203 = vmatpush.msra.mxu3 %v4580_v21  ;;  %v4905_v11 = vld [vmem:[#allocation12 + $0x118] sm:$0xff]  ;;  %v4910_v21 = vld [vmem:[#allocation12 + $0x100] sm:$0xff] }
 0x417   :  { %2110 = vmatpush.msrb.mxu1 %v4583_v49 }
 0x418   :  { %2184 = vmatpush.msra.mxu2 %v4586_v62  ;;  %2204 = vmatpush.msra.mxu3 %v4589_v48  ;;  %v4915_v62 = vld [vmem:[#allocation12 + $0xe8] sm:$0xff]  ;;  %v4920_v48 = vld [vmem:[#allocation12 + $0xd0] sm:$0xff] }
 0x419   :  { %2111 = vmatpush.msrb.mxu1 %v4895_v34 }
 0x41a   :  { %2185 = vmatpush.msra.mxu2 %v4593_v28  ;;  %2205 = vmatpush.msra.mxu3 %v4596_v41  ;;  %v4925_v28 = vld [vmem:[#allocation12 + $0xb8] sm:$0xff]  ;;  %v4930_v41 = vld [vmem:[#allocation12 + $0xa0] sm:$0xff] }
 0x41b   :  { %2112 = vmatpush.msrb.mxu1 %v4900_v22 }
 0x41c   :  { %2186 = vmatpush.msra.mxu2 %v4600_v40  ;;  %2206 = vmatpush.msra.mxu3 %v4603_v27  ;;  %v4935_v40 = vld [vmem:[#allocation12 + $0x88] sm:$0xff]  ;;  %v4940_v27 = vld [vmem:[#allocation12 + $0x70] sm:$0xff] }
 0x41d   :  { %2113 = vmatpush.msrb.mxu1 %v4905_v11 }
 0x41e   :  { %2187 = vmatpush.msra.mxu2 %v4607_v43  ;;  %2207 = vmatpush.msra.mxu3 %v4610_v6  ;;  %v4945_v43 = vld [vmem:[#allocation12 + $0x58] sm:$0xff]  ;;  %v4950_v6 = vld [vmem:[#allocation12 + $0x40] sm:$0xff] }
 0x41f   :  { %2114 = vmatpush.msrb.mxu1 %v4910_v21 }
 0x420   :  { %2188 = vmatpush.msra.mxu2 %v4614_v54  ;;  %2208 = vmatpush.msra.mxu3 %v4617_v59  ;;  %v4955_v54 = vld [vmem:[#allocation12 + $0x28] sm:$0xff]  ;;  %v4960_v59 = vld [vmem:[#allocation12 + $0x10] sm:$0xff] }
 0x421   :  { %2115 = vmatpush.msrb.mxu1 %v4915_v62 }
 0x422   :  { %2189 = vmatpush.msra.mxu2 %v4621_v3  ;;  %2209 = vmatpush.msra.mxu3 %v4624_v0 }
 0x423   :  { %2116 = vmatpush.msrb.mxu1 %v4920_v48 }
 0x424   :  { %2190 = vmatpush.msra.mxu2 %v4628_v15  ;;  %2210 = vmatpush.msra.mxu3 %v4631_v18  ;;  %v5737_v15 = vld [vmem:[#allocation62_spill] sm:$0xff] }
 0x425   :  { %2117 = vmatpush.msrb.mxu1 %v4925_v28 }
 0x426   :  { %2191 = vmatpush.msra.mxu2 %v4635_v29  ;;  %2211 = vmatpush.msra.mxu3 %v4638_v31  ;;  %v5738_v29 = vld [vmem:[#allocation69_spill] sm:$0xff] }
 0x427   :  { %2118 = vmatpush.msrb.mxu1 %v4930_v41 }
 0x428   :  { %2192 = vmatpush.msra.mxu2 %v4642_v1  ;;  %2212 = vmatpush.msra.mxu3 %v4645_v58 }
 0x429   :  { %2119 = vmatpush.msrb.mxu1 %v4935_v40 }
 0x42a   :  { %2193 = vmatpush.msra.mxu2 %v4649_v39  ;;  %2213 = vmatpush.msra.mxu3 %v4652_v16 }
 0x42b   :  { %2120 = vmatpush.msrb.mxu1 %v4940_v27 }
 0x42c   :  { %2194 = vmatpush.msra.mxu2 %v4656_v19  ;;  %2214 = vmatpush.msra.mxu3 %v4659_v17 }
 0x42d   :  { %2121 = vmatpush.msrb.mxu1 %v4945_v43 }
 0x42e   :  { %2195 = vmatpush.msra.mxu2 %v4663_v52  ;;  %2215 = vmatpush.msra.mxu3 %v4666_v12 }
 0x42f   :  { %2122 = vmatpush.msrb.mxu1 %v4950_v6 }
 0x430   :  { %2196 = vmatpush.msra.mxu2 %v4670_v55  ;;  %2216 = vmatpush.msra.mxu3 %v4673_v63 }
 0x431   :  { %2123 = vmatpush.msrb.mxu1 %v4955_v54 }
 0x432   :  { %2197 = vmatpush.msra.mxu2 %v4677_v23  ;;  %2217 = vmatpush.msra.mxu3 %v4680_v9 }
 0x433   :  { %2124 = vmatpush.msrb.mxu1 %v4960_v59 }
 0x434   :  { %2198 = vmatpush.msra.mxu2 %v4684_v30  ;;  %2218 = vmatpush.msra.mxu3 %v4687_v7 }
 0x462   :  { %v1784_v44 = vpop.f32.mrf.mxu0 }
 0x463   :  { %v1830_v2 = vadd.f32 %v4485_v37, %v1784_v44 }
 0x467   :  { %v1744_v3 = vpop.f32.mrf.mxu2  ;;  %v1764_v0 = vpop.f32.mrf.mxu3 }
 0x468   :  { %v1790_v18 = vadd.f32 %v1744_v3, %v5737_v15  ;;  %v1810_v31 = vadd.f32 %v1764_v0, %v5738_v29  ;;  %v5739_v15 = vld [vmem:[#allocation71_spill] sm:$0xff] }
 0x46a   :  { %v2503_v1 = vmul.f32 -1.442695, %v1790_v18  ;;  %v2504_v58 = vmul.f32 -1.442695, %v1810_v31 }
 0x46c   :  { %2627 = vpow2.f32 %v2503_v1 }
 0x46d   :  { %2629 = vpow2.f32 %v2504_v58 }
 0x472   :  { %v2628_v39 = vpop.eup %2627 }
 0x473   :  { %v2630_v16 = vpop.eup %2629  ;;  %v1794_v19 = vadd.f32 1.0, %v2628_v39 }
 0x474   :  { %v1814_v17 = vadd.f32 1.0, %v2630_v16 }
 0x475   :  { %2631 = vrcp.f32 %v1794_v19  ;;  %v1806_v9 = vand.u32 2147483648, %v1794_v19  ;;  %v1804_v20 = vand.u32 2147483647, %v1794_v19  ;;  %vm1800_vm2 = vweird.f32 %v1794_v19 }
 0x476   :  { %2633 = vrcp.f32 %v1814_v17  ;;  %v1826_v3 = vand.u32 2147483648, %v1814_v17  ;;  %vm1820_vm6 = vweird.f32 %v1814_v17  ;;  %v1824_v0 = vand.u32 2147483647, %v1814_v17 }
 0x477   :  { %v1807_v26 = vor.u32 1.1754944e-38, %v1806_v9  ;;  %vm1805_vm4 = vcmp.eq.f32.partialorder %v1804_v20, 8.507059e+37 }
 0x478   :  { %v1827_v31 = vor.u32 1.1754944e-38, %v1826_v3  ;;  %vm1825_vm8 = vcmp.eq.f32.partialorder %v1824_v0, 8.507059e+37  ;;  %v5752_v0 = vld [vmem:[#allocation58_spill] sm:$0xff] }
 0x47b   :  { %v2632_v52 = vpop.eup %2631 }
 0x47c   :  { %v2634_v12 = vpop.eup %2633  ;;  %v1796_v55 = vmul.f32 %v2632_v52, %v1794_v19  ;;  %vm1801_vm1 = vweird.f32 %v2632_v52 }
 0x47d   :  { %v1816_v63 = vmul.f32 %v2634_v12, %v1814_v17  ;;  %vm1802_vm3 = vmor %vm1800_vm2, %vm1801_vm1  ;;  %vm1821_vm5 = vweird.f32 %v2634_v12 }
 0x47e   :  { %v1797_v23 = vsub.f32 1.0, %v1796_v55  ;;  %vm1822_vm7 = vmor %vm1820_vm6, %vm1821_vm5 }
 0x47f   :  { %v1817_v30 = vsub.f32 1.0, %v1816_v63 }
 0x480   :  { %v1798_v7 = vmul.f32 %v2632_v52, %v1797_v23 }
 0x481   :  { %v1818_v14 = vmul.f32 %v2634_v12, %v1817_v30 }
 0x482   :  { %v1799_v25 = vadd.f32 %v2632_v52, %v1798_v7  ;;  %v5741_v7 = vld [vmem:[#allocation84_spill] sm:$0xff] }
 0x483   :  { %v1819_v47 = vadd.f32 %v2634_v12, %v1818_v14 }
 0x484   :  { %v1803_v61 = vsel %vm1802_vm3, %v2632_v52, %v1799_v25  ;;  %v5740_v52 = vld [vmem:[#allocation24_spill] sm:$0xff] }
 0x485   :  { %v1808_v42 = vsel %vm1805_vm4, %v1807_v26, %v1803_v61  ;;  %v1823_v29 = vsel %vm1822_vm7, %v2634_v12, %v1819_v47  ;;  %v2881_v12 = vld [vmem:[%s5120_s1 + $0x28] sm:$0xff] }
 0x486   :  { %v1831_v13 = vmul.f32 %v1830_v2, %v1808_v42  ;;  %v1828_v1 = vsel %vm1825_vm8, %v1827_v31, %v1823_v29  ;;  %v5750_v42 = vld [vmem:[#allocation56_spill] sm:$0xff]  ;;  %v5754_v31 = vld [vmem:[#allocation67_spill] sm:$0xff] }
 0x487   :  { %v1834_v58 = vsub.f32 1.0, %v1828_v1  ;;  %v1836_v16 = vmul.f32 %v1828_v1, %v4700_v4 }
 0x488   :  { %v1832_v18 = vadd.f32 %v1831_v13, %v5739_v15  ;;  %v5751_v13 = vld [vmem:[#allocation59_spill] sm:$0xff]  ;;  %v5753_v15 = vld [vmem:[#allocation65_spill] sm:$0xff] }
 0x48a   :  { %2635 = vtanh.f32 %v1832_v18 }
 0x490   :  { %v2636_v39 = vpop.eup %2635 }
 0x491   :  { %v1835_v37 = vmul.f32 %v2636_v39, %v1834_v58  ;;  %v1858_v19 = vpop.f32.mrf.mxu1  ;;  %v5755_v39 = vld [vmem:[#allocation68_spill] sm:$0xff] }
 0x492   :  { %v1904_v55 = vadd.f32 %v1858_v19, %v5740_v52  ;;  %v5757_v52 = vld [vmem:[#allocation98_spill] sm:$0xff] }
 0x493   :  { %v1837_v63 = vadd.f32 %v1836_v16, %v1835_v37  ;;  %v5756_v37 = vld [vmem:[#allocation63_spill] sm:$0xff] }
 0x494   :  { %v2505_v23 = vmul.f32 -1.442695, %v1904_v55 }
 0x495   :  { %v1838_v17 = vsub.f32 %v1837_v63, %v4700_v4  ;;  %v5758_v63 = vld [vmem:[#allocation102_spill] sm:$0xff] }
 0x496   :  { %2637 = vpow2.f32 %v2505_v23  ;;  %v5759_v23 = vld [vmem:[#allocation45_spill] sm:$0xff] }
 0x497   :  { %v1878_v9 = vpop.f32.mrf.mxu2  ;;  %v1839_v30 = vmul.f32 %v2881_v12, %v1838_v17 }
 0x498   :  { %v1924_v20 = vadd.f32 %v1878_v9, %v5741_v7  ;;  %v1898_v58 = vpop.f32.mrf.mxu3 }
 0x499   :  { %v4977_v44 = vadd.f32 %v1839_v30, %v4700_v4  ;;  %v1944_v12 = vadd.f32 %v4535_v46, %v1898_v58  ;;  %v5760_v30 = vld [vmem:[#allocation103_spill] sm:$0xff]  ;;  %v5766_v46 = vld [vmem:[#allocation85_spill] sm:$0xff] }
 0x49a   :  { %v2506_v14 = vmul.f32 -1.442695, %v1924_v20  ;;  %v5761_v20 = vld [vmem:[#allocation104_spill] sm:$0xff] }
 0x49b   :  { %1971 = vmatmul.f32.vlgmr.msra.gmra.mxu0 %v4977_v44  ;;  %1991 = vmatmul.f32.vlgmr.msra.gmra.mxu1 %v4977_v44 }
 0x49c   :  { %v2638_v25 = vpop.eup %2637  ;;  %2639 = vpow2.f32 %v2506_v14  ;;  %2011 = vmatmul.f32.vlgmr.msrb.gmra.mxu2 %v4977_v44  ;;  %2223 = vmatpush.msra.mxu0 %v4705_v38  ;;  %v5742_v38 = vld [vmem:[#allocation18_spill] sm:$0xff]  ;;  %v5762_v14 = vld [vmem:[#allocation105_spill] sm:$0xff] }
 0x49d   :  { %v1908_v26 = vadd.f32 1.0, %v2638_v25  ;;  %2297 = vmatpush.msra.mxu1 %v4710_v5  ;;  %2317 = vmatpush.msrb.mxu2 %v4713_v50  ;;  %v5743_v5 = vld [vmem:[#allocation19_spill] sm:$0xff]  ;;  %v5744_v50 = vld [vmem:[#allocation29_spill] sm:$0xff] }
 0x49e   :  { %2224 = vmatpush.msra.mxu0 %v4716_v60  ;;  %v5745_v60 = vld [vmem:[#allocation33_spill] sm:$0xff] }
 0x49f   :  { %2641 = vrcp.f32 %v1908_v26  ;;  %2298 = vmatpush.msra.mxu1 %v4719_v32  ;;  %2318 = vmatpush.msrb.mxu2 %v4722_v45  ;;  %v5746_v32 = vld [vmem:[#allocation90_spill] sm:$0xff]  ;;  %v5747_v45 = vld [vmem:[#allocation73_spill] sm:$0xff]  ;;  %v1920_v3 = vand.u32 2147483648, %v1908_v26  ;;  %v1918_v29 = vand.u32 2147483647, %v1908_v26  ;;  %vm1914_vm10 = vweird.f32 %v1908_v26 }
 0x4a0   :  { %2225 = vmatpush.msra.mxu0 %v4726_v57 }
 0x4a1   :  { %2299 = vmatpush.msra.mxu1 %v4729_v53  ;;  %2319 = vmatpush.msrb.mxu2 %v4732_v24  ;;  %v5748_v53 = vld [vmem:[#allocation54_spill] sm:$0xff]  ;;  %v5749_v24 = vld [vmem:[#allocation57_spill] sm:$0xff]  ;;  %v1921_v55 = vor.u32 1.1754944e-38, %v1920_v3  ;;  %vm1919_vm12 = vcmp.eq.f32.partialorder %v1918_v29, 8.507059e+37 }
 0x4a2   :  { %v2640_v4 = vpop.eup %2639  ;;  %2226 = vmatpush.msra.mxu0 %v5742_v38  ;;  %v5763_v38 = vld [vmem:[#allocation106_spill] sm:$0xff]  ;;  %v5776_v29 = vld [vmem:[#allocation113_spill] sm:$0xff] }
 0x4a3   :  { %v1928_v2 = vadd.f32 1.0, %v2640_v4  ;;  %2300 = vmatpush.msra.mxu1 %v5743_v5  ;;  %2320 = vmatpush.msrb.mxu2 %v5744_v50  ;;  %v5764_v50 = vld [vmem:[#allocation91_spill] sm:$0xff]  ;;  %v5772_v3 = vld [vmem:[#allocation26_spill] sm:$0xff] }
 0x4a4   :  { %2227 = vmatpush.msra.mxu0 %v5745_v60  ;;  %v5765_v60 = vld [vmem:[#allocation109_spill] sm:$0xff] }
 0x4a5   :  { %v2642_v61 = vpop.eup %2641  ;;  %2643 = vrcp.f32 %v1928_v2  ;;  %2301 = vmatpush.msra.mxu1 %v5746_v32  ;;  %2321 = vmatpush.msrb.mxu2 %v5747_v45  ;;  %v1938_v5 = vand.u32 2147483647, %v1928_v2  ;;  %vm1934_vm14 = vweird.f32 %v1928_v2  ;;  %v5767_v45 = vld [vmem:[#allocation110_spill] sm:$0xff] }
 0x4a6   :  { %v1910_v57 = vmul.f32 %v2642_v61, %v1908_v26  ;;  %2228 = vmatpush.msra.mxu0 %v5748_v53  ;;  %vm1915_vm9 = vweird.f32 %v2642_v61  ;;  %v1940_v26 = vand.u32 2147483648, %v1928_v2 }
 0x4a7   :  { %2302 = vmatpush.msra.mxu1 %v5749_v24  ;;  %2322 = vmatpush.msrb.mxu2 %v5750_v42  ;;  %vm1916_vm11 = vmor %vm1914_vm10, %vm1915_vm9  ;;  %vm1939_vm0 = vcmp.eq.f32.partialorder %v1938_v5, 8.507059e+37  ;;  %v5769_v42 = vld [vmem:[#allocation28_spill] sm:$0xff] }
 0x4a8   :  { %v1911_v47 = vsub.f32 1.0, %v1910_v57  ;;  %2229 = vmatpush.msra.mxu0 %v5751_v13  ;;  %v5768_v57 = vld [vmem:[#allocation25_spill] sm:$0xff]  ;;  %v1941_v53 = vor.u32 1.1754944e-38, %v1940_v26  ;;  %v5771_v13 = vld [vmem:[#allocation27_spill] sm:$0xff] }
 0x4a9   :  { %2303 = vmatpush.msra.mxu1 %v5752_v0  ;;  %2323 = vmatpush.msrb.mxu2 %v5753_v15  ;;  %v5773_v0 = vld [vmem:[#allocation112_spill] sm:$0xff] }
 0x4aa   :  { %v1912_v18 = vmul.f32 %v2642_v61, %v1911_v47  ;;  %2230 = vmatpush.msra.mxu0 %v5754_v31  ;;  %v5770_v47 = vld [vmem:[#allocation111_spill] sm:$0xff]  ;;  %v5774_v15 = vld [vmem:[#allocation32_spill] sm:$0xff] }
 0x4ab   :  { %v2644_v1 = vpop.eup %2643  ;;  %2304 = vmatpush.msra.mxu1 %v5755_v39  ;;  %2324 = vmatpush.msrb.mxu2 %v5756_v37 }
 0x4ac   :  { %v1930_v16 = vmul.f32 %v2644_v1, %v1928_v2  ;;  %v1913_v19 = vadd.f32 %v2642_v61, %v1912_v18  ;;  %2231 = vmatpush.msra.mxu0 %v5757_v52  ;;  %vm1935_vm13 = vweird.f32 %v2644_v1  ;;  %v5775_v18 = vld [vmem:[#allocation31_spill] sm:$0xff] }
 0x4ad   :  { %2305 = vmatpush.msra.mxu1 %v5758_v63  ;;  %2325 = vmatpush.msrb.mxu2 %v5759_v23  ;;  %vm1936_vm15 = vmor %vm1934_vm14, %vm1935_vm13 }
 0x4ae   :  { %v1931_v17 = vsub.f32 1.0, %v1930_v16  ;;  %v1917_v9 = vsel %vm1916_vm11, %v2642_v61, %v1913_v19  ;;  %2232 = vmatpush.msra.mxu0 %v5760_v30 }
 0x4af   :  { %v1922_v7 = vsel %vm1919_vm12, %v1921_v55, %v1917_v9  ;;  %2306 = vmatpush.msra.mxu1 %v5761_v20  ;;  %2326 = vmatpush.msrb.mxu2 %v5762_v14 }
 0x4b0   :  { %v1932_v25 = vmul.f32 %v2644_v1, %v1931_v17  ;;  %v1945_v4 = vmul.f32 %v1944_v12, %v1922_v7  ;;  %2233 = vmatpush.msra.mxu0 %v5763_v38  ;;  %v5061_v12 = vld [vmem:[#allocation9] ss:$0 sm:$0xff] }
 0x4b1   :  { %2307 = vmatpush.msra.mxu1 %v5764_v50  ;;  %2327 = vmatpush.msrb.mxu2 %v5765_v60 }
 0x4b2   :  { %v1933_v61 = vadd.f32 %v2644_v1, %v1932_v25  ;;  %v1946_v32 = vadd.f32 %v1945_v4, %v5766_v46  ;;  %2234 = vmatpush.msra.mxu0 %v5767_v45  ;;  %v5779_v4 = vld [vmem:[#allocation76_spill] sm:$0xff] }
 0x4b3   :  { %2308 = vmatpush.msra.mxu1 %v5768_v57  ;;  %2328 = vmatpush.msrb.mxu2 %v4825_v56 }
 0x4b4   :  { %v1937_v24 = vsel %vm1936_vm15, %v2644_v1, %v1933_v61  ;;  %2645 = vtanh.f32 %v1946_v32  ;;  %2235 = vmatpush.msra.mxu0 %v4829_v35 }
 0x4b5   :  { %2309 = vmatpush.msra.mxu1 %v5769_v42  ;;  %2329 = vmatpush.msrb.mxu2 %v5770_v47  ;;  %v1942_v2 = vsel %vm1939_vm0, %v1941_v53, %v1937_v24  ;;  %v5780_v53 = vld [vmem:[#allocation82_spill] sm:$0xff] }
 0x4b6   :  { %2236 = vmatpush.msra.mxu0 %v5771_v13  ;;  %v1948_v56 = vsub.f32 1.0, %v1942_v2  ;;  %v1950_v1 = vmul.f32 %v1942_v2, %v4884_v33  ;;  %v2884_v13 = vld [vmem:[%s5120_s1 + $0x30] sm:$0xff] }
 0x4b7   :  { %2310 = vmatpush.msra.mxu1 %v5772_v3  ;;  %2330 = vmatpush.msrb.mxu2 %v5773_v0 }
 0x4b8   :  { %2237 = vmatpush.msra.mxu0 %v4859_v10  ;;  %v2882_v10 = vld [vmem:[%s5120_s1 + $0x10] sm:$0xff] }
 0x4b9   :  { %2311 = vmatpush.msra.mxu1 %v5774_v15  ;;  %2331 = vmatpush.msrb.mxu2 %v5775_v18 }
 0x4ba   :  { %v2646_v35 = vpop.eup %2645  ;;  %2238 = vmatpush.msra.mxu0 %v5776_v29 }
 0x4bb   :  { %v1949_v31 = vmul.f32 %v2646_v35, %v1948_v56  ;;  %2312 = vmatpush.msra.mxu1 %v4874_v51  ;;  %2332 = vmatpush.msrb.mxu2 %v4877_v36  ;;  %v5777_v51 = vld [vmem:[#allocation74_spill] sm:$0xff] }
 0x4bc   :  { %v5781_v56 = vld [vmem:[#allocation34_spill] sm:$0xff] }
 0x4bd   :  { %v1951_v58 = vadd.f32 %v1950_v1, %v1949_v31 }
 0x4bf   :  { %v1952_v39 = vsub.f32 %v1951_v58, %v4884_v33 }
 0x4c1   :  { %v1953_v37 = vmul.f32 %v2882_v10, %v1952_v39 }
 0x4c3   :  { %v5038_v16 = vadd.f32 %v1953_v37, %v4884_v33  ;;  %v5778_v33 = vld [vmem:[#allocation75_spill] sm:$0xff] }
 0x4c5   :  { %2085 = vmatmul.f32.vlgmr.msrb.gmra.mxu3 %v5038_v16  ;;  %2105 = vmatmul.f32.vlgmr.msrb.gmra.mxu0 %v5038_v16 }
 0x4c6   :  { %2125 = vmatmul.f32.vlgmr.msrb.gmra.mxu1 %v5038_v16  ;;  %2337 = vmatpush.msrb.mxu3 %v4574_v8 }
 0x4c8   :  { %2338 = vmatpush.msrb.mxu3 %v4583_v49 }
 0x4ca   :  { %2339 = vmatpush.msrb.mxu3 %v4895_v34 }
 0x4cc   :  { %2340 = vmatpush.msrb.mxu3 %v4900_v22 }
 0x4ce   :  { %2341 = vmatpush.msrb.mxu3 %v4905_v11 }
 0x4d0   :  { %2342 = vmatpush.msrb.mxu3 %v4910_v21 }
 0x4d2   :  { %2343 = vmatpush.msrb.mxu3 %v4915_v62 }
 0x4d4   :  { %2344 = vmatpush.msrb.mxu3 %v4920_v48 }
 0x4d6   :  { %2345 = vmatpush.msrb.mxu3 %v4925_v28 }
 0x4d8   :  { %2346 = vmatpush.msrb.mxu3 %v4930_v41 }
 0x4da   :  { %2347 = vmatpush.msrb.mxu3 %v4935_v40 }
 0x4dc   :  { %2348 = vmatpush.msrb.mxu3 %v4940_v27 }
 0x4de   :  { %2349 = vmatpush.msrb.mxu3 %v4945_v43 }
 0x4e0   :  { %2350 = vmatpush.msrb.mxu3 %v4950_v6 }
 0x4e2   :  { %2351 = vmatpush.msrb.mxu3 %v4955_v54 }
 0x4e4   :  { %2352 = vmatpush.msrb.mxu3 %v4960_v59 }
 0x518   :  { %v1972_v8 = vpop.f32.mrf.mxu0  ;;  %v1992_v49 = vpop.f32.mrf.mxu1 }
 0x519   :  { %v2018_v36 = vadd.f32 %v1972_v8, %v5777_v51  ;;  %v2038_v34 = vadd.f32 %v1992_v49, %v5778_v33 }
 0x51b   :  { %v2507_v22 = vmul.f32 -1.442695, %v2018_v36  ;;  %v2508_v11 = vmul.f32 -1.442695, %v2038_v34 }
 0x51d   :  { %2647 = vpow2.f32 %v2507_v22 }
 0x51e   :  { %2649 = vpow2.f32 %v2508_v11 }
 0x51f   :  { %v2012_v63 = vpop.f32.mrf.mxu2 }
 0x520   :  { %v2058_v30 = vadd.f32 %v5061_v12, %v2012_v63 }
 0x523   :  { %v2648_v21 = vpop.eup %2647 }
 0x524   :  { %v2650_v62 = vpop.eup %2649  ;;  %v2022_v48 = vadd.f32 1.0, %v2648_v21 }
 0x525   :  { %v2042_v28 = vadd.f32 1.0, %v2650_v62  ;;  %v5081_v62 = vld [vmem:[%s5130_s11] ss:$0 sm:$0xff] }
 0x526   :  { %2651 = vrcp.f32 %v2022_v48  ;;  %v2034_v59 = vand.u32 2147483648, %v2022_v48  ;;  %v2032_v52 = vand.u32 2147483647, %v2022_v48  ;;  %vm2028_vm2 = vweird.f32 %v2022_v48 }
 0x527   :  { %2653 = vrcp.f32 %v2042_v28  ;;  %v2054_v14 = vand.u32 2147483648, %v2042_v28  ;;  %vm2048_vm6 = vweird.f32 %v2042_v28  ;;  %v2052_v26 = vand.u32 2147483647, %v2042_v28 }
 0x528   :  { %v2035_v17 = vor.u32 1.1754944e-38, %v2034_v59  ;;  %vm2033_vm4 = vcmp.eq.f32.partialorder %v2032_v52, 8.507059e+37 }
 0x529   :  { %v2055_v50 = vor.u32 1.1754944e-38, %v2054_v14  ;;  %vm2053_vm8 = vcmp.eq.f32.partialorder %v2052_v26, 8.507059e+37 }
 0x52c   :  { %v2652_v41 = vpop.eup %2651 }
 0x52d   :  { %v2654_v40 = vpop.eup %2653  ;;  %v2024_v27 = vmul.f32 %v2652_v41, %v2022_v48  ;;  %vm2029_vm1 = vweird.f32 %v2652_v41 }
 0x52e   :  { %v2044_v43 = vmul.f32 %v2654_v40, %v2042_v28  ;;  %vm2030_vm3 = vmor %vm2028_vm2, %vm2029_vm1  ;;  %vm2049_vm5 = vweird.f32 %v2654_v40 }
 0x52f   :  { %v2025_v6 = vsub.f32 1.0, %v2024_v27  ;;  %vm2050_vm7 = vmor %vm2048_vm6, %vm2049_vm5 }
 0x530   :  { %v2045_v54 = vsub.f32 1.0, %v2044_v43 }
 0x531   :  { %v2026_v19 = vmul.f32 %v2652_v41, %v2025_v6 }
 0x532   :  { %v2046_v55 = vmul.f32 %v2654_v40, %v2045_v54  ;;  %v5782_v54 = vld [vmem:[#allocation83_spill] sm:$0xff] }
 0x533   :  { %v2027_v23 = vadd.f32 %v2652_v41, %v2026_v19 }
 0x534   :  { %v2047_v7 = vadd.f32 %v2654_v40, %v2046_v55 }
 0x535   :  { %v2031_v9 = vsel %vm2030_vm3, %v2652_v41, %v2027_v23 }
 0x536   :  { %v2036_v20 = vsel %vm2033_vm4, %v2035_v17, %v2031_v9  ;;  %v2051_v5 = vsel %vm2050_vm7, %v2654_v40, %v2047_v7 }
 0x537   :  { %v2059_v25 = vmul.f32 %v2058_v30, %v2036_v20  ;;  %v2056_v60 = vsel %vm2053_vm8, %v2055_v50, %v2051_v5  ;;  %v2886_v20 = vld [vmem:[%s5120_s1 + $0x8] sm:$0xff]  ;;  %v5784_v50 = vld [vmem:[#allocation78_spill] sm:$0xff] }
 0x538   :  { %v2062_v61 = vsub.f32 1.0, %v2056_v60  ;;  %v2064_v45 = vmul.f32 %v2056_v60, %v4977_v44 }
 0x539   :  { %v2060_v38 = vadd.f32 %v2059_v25, %v5779_v4 }
 0x53b   :  { %2655 = vtanh.f32 %v2060_v38  ;;  %v5783_v38 = vld [vmem:[#allocation77_spill] sm:$0xff] }
 0x541   :  { %v2656_v46 = vpop.eup %2655 }
 0x542   :  { %v2063_v32 = vmul.f32 %v2656_v46, %v2062_v61  ;;  %v2106_v57 = vpop.f32.mrf.mxu0 }
 0x543   :  { %v2152_v24 = vadd.f32 %v2106_v57, %v5780_v53  ;;  %v2126_v22 = vpop.f32.mrf.mxu1 }
 0x544   :  { %v2065_v42 = vadd.f32 %v2064_v45, %v2063_v32  ;;  %v2172_v48 = vadd.f32 %v5081_v62, %v2126_v22 }
 0x545   :  { %v2510_v47 = vmul.f32 -1.442695, %v2152_v24 }
 0x546   :  { %v2066_v2 = vsub.f32 %v2065_v42, %v4977_v44 }
 0x547   :  { %2657 = vpow2.f32 %v2510_v47 }
 0x548   :  { %v2067_v3 = vmul.f32 %v2884_v13, %v2066_v2  ;;  %v2086_v0 = vpop.f32.mrf.mxu3 }
 0x549   :  { %v2132_v15 = vadd.f32 %v2086_v0, %v5781_v56 }
 0x54a   :  { %v5073_v18 = vadd.f32 %v2067_v3, %v4977_v44 }
 0x54b   :  { %v2509_v35 = vmul.f32 -1.442695, %v2132_v15 }
 0x54c   :  { %2199 = vmatmul.f32.vlgmr.msra.gmra.mxu2 %v5073_v18  ;;  %2219 = vmatmul.f32.vlgmr.msra.gmra.mxu3 %v5073_v18 }
 0x54d   :  { %v2658_v29 = vpop.eup %2657  ;;  %2659 = vpow2.f32 %v2509_v35  ;;  %2239 = vmatmul.f32.vlgmr.msra.gmra.mxu0 %v5073_v18 }
 0x54e   :  { %v2156_v31 = vadd.f32 1.0, %v2658_v29 }
 0x550   :  { %2661 = vrcp.f32 %v2156_v31  ;;  %v2168_v27 = vand.u32 2147483648, %v2156_v31  ;;  %vm2162_vm14 = vweird.f32 %v2156_v31  ;;  %v2166_v6 = vand.u32 2147483647, %v2156_v31 }
 0x552   :  { %v2169_v52 = vor.u32 1.1754944e-38, %v2168_v27  ;;  %vm2167_vm0 = vcmp.eq.f32.partialorder %v2166_v6, 8.507059e+37 }
 0x553   :  { %v2660_v1 = vpop.eup %2659 }
 0x554   :  { %v2136_v58 = vadd.f32 1.0, %v2660_v1 }
 0x556   :  { %2663 = vrcp.f32 %v2136_v58  ;;  %v2662_v39 = vpop.eup %2661  ;;  %v2148_v51 = vand.u32 2147483648, %v2136_v58  ;;  %v2146_v33 = vand.u32 2147483647, %v2136_v58  ;;  %vm2142_vm10 = vweird.f32 %v2136_v58 }
 0x557   :  { %v2158_v10 = vmul.f32 %v2662_v39, %v2156_v31  ;;  %vm2163_vm13 = vweird.f32 %v2662_v39 }
 0x558   :  { %v2149_v21 = vor.u32 1.1754944e-38, %v2148_v51  ;;  %vm2147_vm12 = vcmp.eq.f32.partialorder %v2146_v33, 8.507059e+37  ;;  %vm2164_vm15 = vmor %vm2162_vm14, %vm2163_vm13 }
 0x559   :  { %v2159_v44 = vsub.f32 1.0, %v2158_v10 }
 0x55b   :  { %v2160_v34 = vmul.f32 %v2662_v39, %v2159_v44 }
 0x55c   :  { %v2664_v37 = vpop.eup %2663 }
 0x55d   :  { %v2138_v8 = vmul.f32 %v2664_v37, %v2136_v58  ;;  %vm2143_vm9 = vweird.f32 %v2664_v37  ;;  %v2161_v41 = vadd.f32 %v2662_v39, %v2160_v34 }
 0x55e   :  { %vm2144_vm11 = vmor %vm2142_vm10, %vm2143_vm9 }
 0x55f   :  { %v2139_v49 = vsub.f32 1.0, %v2138_v8  ;;  %v2165_v19 = vsel %vm2164_vm15, %v2662_v39, %v2161_v41 }
 0x560   :  { %v2170_v55 = vsel %vm2167_vm0, %v2169_v52, %v2165_v19  ;;  %v5787_v19 = vld [vmem:[#allocation80_spill] sm:$0xff] }
 0x561   :  { %v2140_v36 = vmul.f32 %v2664_v37, %v2139_v49  ;;  %v2176_v63 = vsub.f32 1.0, %v2170_v55  ;;  %v2178_v17 = vmul.f32 %v2170_v55, %v5038_v16  ;;  %v5785_v49 = vld [vmem:[#allocation79_spill] sm:$0xff] }
 0x563   :  { %v2141_v11 = vadd.f32 %v2664_v37, %v2140_v36 }
 0x565   :  { %v2145_v28 = vsel %vm2144_vm11, %v2664_v37, %v2141_v11 }
 0x566   :  { %v2150_v40 = vsel %vm2147_vm12, %v2149_v21, %v2145_v28  ;;  %v5786_v28 = vld [vmem:[#allocation21_spill] sm:$0xff] }
 0x567   :  { %v2173_v43 = vmul.f32 %v2172_v48, %v2150_v40 }
 0x569   :  { %v2174_v59 = vadd.f32 %v2173_v43, %v5782_v54  ;;  %v2887_v54 = vld [vmem:[%s5120_s1 + $0x38] sm:$0xff] }
 0x56b   :  { %2665 = vtanh.f32 %v2174_v59 }
 0x571   :  { %v2666_v23 = vpop.eup %2665 }
 0x572   :  { %v2177_v9 = vmul.f32 %v2666_v23, %v2176_v63 }
 0x574   :  { %v2179_v30 = vadd.f32 %v2178_v17, %v2177_v9 }
 0x576   :  { %v2180_v7 = vsub.f32 %v2179_v30, %v5038_v16 }
 0x578   :  { %v2181_v14 = vmul.f32 %v2886_v20, %v2180_v7 }
 0x57a   :  { %v5091_v25 = vadd.f32 %v2181_v14, %v5038_v16 }
 0x57c   :  { %2313 = vmatmul.f32.vlgmr.msra.gmra.mxu1 %v5091_v25  ;;  %2333 = vmatmul.f32.vlgmr.msrb.gmra.mxu2 %v5091_v25 }
 0x57d   :  { %2353 = vmatmul.f32.vlgmr.msrb.gmra.mxu3 %v5091_v25 }
 0x5ca   :  { %v2240_v15 = vpop.f32.mrf.mxu0 }
 0x5cb   :  { %v2286_v1 = vadd.f32 %v5061_v12, %v2240_v15 }
 0x5cf   :  { %v2200_v26 = vpop.f32.mrf.mxu2  ;;  %v2220_v4 = vpop.f32.mrf.mxu3 }
 0x5d0   :  { %v2246_v5 = vadd.f32 %v2200_v26, %v5783_v38  ;;  %v2266_v60 = vadd.f32 %v2220_v4, %v5784_v50 }
 0x5d2   :  { %v2511_v61 = vmul.f32 -1.442695, %v2246_v5  ;;  %v2512_v46 = vmul.f32 -1.442695, %v2266_v60 }
 0x5d4   :  { %2667 = vpow2.f32 %v2511_v61 }
 0x5d5   :  { %2669 = vpow2.f32 %v2512_v46 }
 0x5da   :  { %v2668_v32 = vpop.eup %2667 }
 0x5db   :  { %v2670_v45 = vpop.eup %2669  ;;  %v2250_v16 = vadd.f32 1.0, %v2668_v32 }
 0x5dc   :  { %v2270_v57 = vadd.f32 1.0, %v2670_v45 }
 0x5dd   :  { %2671 = vrcp.f32 %v2250_v16  ;;  %v2262_v13 = vand.u32 2147483648, %v2250_v16  ;;  %v2260_v56 = vand.u32 2147483647, %v2250_v16  ;;  %vm2256_vm2 = vweird.f32 %v2250_v16 }
 0x5de   :  { %2673 = vrcp.f32 %v2270_v57  ;;  %v2282_v8 = vand.u32 2147483648, %v2270_v57  ;;  %vm2276_vm6 = vweird.f32 %v2270_v57  ;;  %v2280_v44 = vand.u32 2147483647, %v2270_v57 }
 0x5df   :  { %v2263_v31 = vor.u32 1.1754944e-38, %v2262_v13  ;;  %vm2261_vm4 = vcmp.eq.f32.partialorder %v2260_v56, 8.507059e+37 }
 0x5e0   :  { %v2283_v33 = vor.u32 1.1754944e-38, %v2282_v8  ;;  %vm2281_vm8 = vcmp.eq.f32.partialorder %v2280_v44, 8.507059e+37 }
 0x5e3   :  { %v2672_v53 = vpop.eup %2671 }
 0x5e4   :  { %v2674_v24 = vpop.eup %2673  ;;  %v2252_v42 = vmul.f32 %v2672_v53, %v2250_v16  ;;  %vm2257_vm1 = vweird.f32 %v2672_v53 }
 0x5e5   :  { %v2272_v47 = vmul.f32 %v2674_v24, %v2270_v57  ;;  %vm2258_vm3 = vmor %vm2256_vm2, %vm2257_vm1  ;;  %vm2277_vm5 = vweird.f32 %v2674_v24 }
 0x5e6   :  { %v2253_v2 = vsub.f32 1.0, %v2252_v42  ;;  %vm2278_vm7 = vmor %vm2276_vm6, %vm2277_vm5 }
 0x5e7   :  { %v2273_v3 = vsub.f32 1.0, %v2272_v47 }
 0x5e8   :  { %v2254_v0 = vmul.f32 %v2672_v53, %v2253_v2  ;;  %v5788_v2 = vld [vmem:[#allocation81_spill] sm:$0xff] }
 0x5e9   :  { %v2274_v35 = vmul.f32 %v2674_v24, %v2273_v3 }
 0x5ea   :  { %v2255_v29 = vadd.f32 %v2672_v53, %v2254_v0 }
 0x5eb   :  { %v2275_v10 = vadd.f32 %v2674_v24, %v2274_v35 }
 0x5ec   :  { %v2259_v58 = vsel %vm2258_vm3, %v2672_v53, %v2255_v29 }
 0x5ed   :  { %v2264_v39 = vsel %vm2261_vm4, %v2263_v31, %v2259_v58  ;;  %v2279_v36 = vsel %vm2278_vm7, %v2674_v24, %v2275_v10  ;;  %v2888_v58 = vld [vmem:[%s5120_s1] sm:$0xff] }
 0x5ee   :  { %v2287_v37 = vmul.f32 %v2286_v1, %v2264_v39  ;;  %v2284_v34 = vsel %vm2281_vm8, %v2283_v33, %v2279_v36 }
 0x5ef   :  { %v2290_v22 = vsub.f32 1.0, %v2284_v34  ;;  %v2292_v21 = vmul.f32 %v2284_v34, %v5073_v18 }
 0x5f0   :  { %v2288_v51 = vadd.f32 %v2287_v37, %v5785_v49 }
 0x5f2   :  { %2675 = vtanh.f32 %v2288_v51 }
 0x5f8   :  { %v2676_v11 = vpop.eup %2675 }
 0x5f9   :  { %v2291_v12 = vmul.f32 %v2676_v11, %v2290_v22  ;;  %v2314_v48 = vpop.f32.mrf.mxu1 }
 0x5fa   :  { %v2360_v41 = vadd.f32 %v2314_v48, %v5786_v28 }
 0x5fb   :  { %v2293_v40 = vadd.f32 %v2292_v21, %v2291_v12 }
 0x5fc   :  { %v2513_v27 = vmul.f32 -1.442695, %v2360_v41 }
 0x5fd   :  { %v2294_v43 = vsub.f32 %v2293_v40, %v5073_v18 }
 0x5fe   :  { %2677 = vpow2.f32 %v2513_v27 }
 0x5ff   :  { %v2334_v6 = vpop.f32.mrf.mxu2  ;;  %v2295_v59 = vmul.f32 %v2887_v54, %v2294_v43 }
 0x600   :  { %v2380_v52 = vadd.f32 %v2334_v6, %v5787_v19  ;;  %v2354_v50 = vpop.f32.mrf.mxu3 }
 0x601   :  { %v2296_v55 = vadd.f32 %v2295_v59, %v5073_v18  ;;  %v2400_v45 = vadd.f32 %v5081_v62, %v2354_v50 }
 0x602   :  { %v2514_v63 = vmul.f32 -1.442695, %v2380_v52 }
 0x603   :  { %2411 = vst [vmem:[#allocation13] sm:$0xff] %v2296_v55 }
 0x604   :  { %v2678_v23 = vpop.eup %2677  ;;  %2679 = vpow2.f32 %v2514_v63 }
 0x605   :  { %v2364_v17 = vadd.f32 1.0, %v2678_v23 }
 0x607   :  { %2681 = vrcp.f32 %v2364_v17  ;;  %v2376_v26 = vand.u32 2147483648, %v2364_v17  ;;  %v2374_v38 = vand.u32 2147483647, %v2364_v17  ;;  %vm2370_vm10 = vweird.f32 %v2364_v17 }
 0x609   :  { %v2377_v61 = vor.u32 1.1754944e-38, %v2376_v26  ;;  %vm2375_vm12 = vcmp.eq.f32.partialorder %v2374_v38, 8.507059e+37 }
 0x60a   :  { %v2680_v9 = vpop.eup %2679 }
 0x60b   :  { %v2384_v30 = vadd.f32 1.0, %v2680_v9 }
 0x60d   :  { %v2682_v7 = vpop.eup %2681  ;;  %2683 = vrcp.f32 %v2384_v30  ;;  %v2396_v53 = vand.u32 2147483648, %v2384_v30  ;;  %v2394_v42 = vand.u32 2147483647, %v2384_v30  ;;  %vm2390_vm14 = vweird.f32 %v2384_v30 }
 0x60e   :  { %v2366_v20 = vmul.f32 %v2682_v7, %v2364_v17  ;;  %vm2371_vm9 = vweird.f32 %v2682_v7 }
 0x60f   :  { %vm2372_vm11 = vmor %vm2370_vm10, %vm2371_vm9  ;;  %v2397_v3 = vor.u32 1.1754944e-38, %v2396_v53  ;;  %vm2395_vm0 = vcmp.eq.f32.partialorder %v2394_v42, 8.507059e+37 }
 0x610   :  { %v2367_v14 = vsub.f32 1.0, %v2366_v20 }
 0x612   :  { %v2368_v4 = vmul.f32 %v2682_v7, %v2367_v14 }
 0x613   :  { %v2684_v5 = vpop.eup %2683 }
 0x614   :  { %v2386_v60 = vmul.f32 %v2684_v5, %v2384_v30  ;;  %v2369_v18 = vadd.f32 %v2682_v7, %v2368_v4  ;;  %vm2391_vm13 = vweird.f32 %v2684_v5 }
 0x615   :  { %vm2392_vm15 = vmor %vm2390_vm14, %vm2391_vm13 }
 0x616   :  { %v2387_v46 = vsub.f32 1.0, %v2386_v60  ;;  %v2373_v32 = vsel %vm2372_vm11, %v2682_v7, %v2369_v18 }
 0x617   :  { %v2378_v16 = vsel %vm2375_vm12, %v2377_v61, %v2373_v32 }
 0x618   :  { %v2388_v57 = vmul.f32 %v2684_v5, %v2387_v46  ;;  %v2401_v24 = vmul.f32 %v2400_v45, %v2378_v16 }
 0x61a   :  { %v2389_v47 = vadd.f32 %v2684_v5, %v2388_v57  ;;  %v2402_v13 = vadd.f32 %v2401_v24, %v5788_v2 }
 0x61c   :  { %v2393_v0 = vsel %vm2392_vm15, %v2684_v5, %v2389_v47  ;;  %2685 = vtanh.f32 %v2402_v13 }
 0x61d   :  { %v2398_v56 = vsel %vm2395_vm0, %v2397_v3, %v2393_v0 }
 0x61e   :  { %v2404_v15 = vsub.f32 1.0, %v2398_v56  ;;  %v2406_v62 = vmul.f32 %v2398_v56, %v5091_v25 }
 0x622   :  { %v2686_v35 = vpop.eup %2685 }
 0x623   :  { %v2405_v29 = vmul.f32 %v2686_v35, %v2404_v15 }
 0x625   :  { %v2407_v31 = vadd.f32 %v2406_v62, %v2405_v29 }
 0x627   :  { %v2408_v1 = vsub.f32 %v2407_v31, %v5091_v25 }
 0x629   :  { %v2409_v39 = vmul.f32 %v2888_v58, %v2408_v1 }
 0x62b   :  { %v2410_v10 = vadd.f32 %v2409_v39, %v5091_v25 }
 0x62d   :  { %2413 = vst [vmem:[#allocation13 + $0x8] sm:$0xff] %v2410_v10 }
 0x62e   :  { %2426 = dma.vmem_to_hbm [thread:$0]  %s2419_s7, 256, %s2421_s28, [#allocation6], %s3049_s13, %s3049_s13, %s3050_s14  }
 0x62f   :  { %3039 = dma.done.wait [#allocation6], 256  }
 0x630   :  { %3040 = vsyncadd [#allocation6], 4294967040 }
 0x631   :  { %2431 = vsyncpa [#allocation5], 1 }
 0x632   :  { %2432 = vsyncpa [#allocation8], 1 }
 0x633   :  { %2433 = vsyncpa [#allocation11], 1 }
 0x634   :  { %2434 = vsyncpa [#allocation6], 1 }

</bundles_post_ra>
